<compile_context>
chip_gen: v6e
topology: v6e:2x2x1
jax: 0.10.0
libtpu: 0.0.40
codegen_flags: <defaults>
</compile_context>

<pallas_src>
import jax
import jax.numpy as jnp
from jax.experimental import pallas as pl
from jax.experimental.pallas import tpu as pltpu


# ----------------------------------------------------------------------------
# helpers
# ----------------------------------------------------------------------------
def _round_up(n, m):
    return ((n + m - 1) // m) * m


def _row_tiling(rows, max_tile):
    """Row tile (multiple of 8, <= max_tile) and the padded row count it divides.

    When more than one tile is needed, the tile equals max_tile, which must be a
    multiple of 128 so id/row blocks stay lane-aligned."""
    tile = min(max_tile, _round_up(rows, 8))
    return tile, _round_up(rows, tile)


def _pad_rows(a, target):
    pad = target - a.shape[0]
    return a if pad == 0 else jnp.pad(a, ((0, pad), (0, 0)))


def _pad_ids(ids, target, fill=-1):
    ids = ids.astype(jnp.int32)
    pad = target - ids.shape[0]
    return ids if pad == 0 else jnp.pad(ids, (0, pad), constant_values=fill)


def _one_hot_bf16(mask):
    # bool -> f32 -> bf16 (all vreg converts; 0/1 are exact in bf16).
    return mask.astype(jnp.float32).astype(jnp.bfloat16)


# ----------------------------------------------------------------------------
# in-kernel MLP body (shared by all fused kernels)
# ----------------------------------------------------------------------------
def _mlp_body(xs, param_refs, layer_flags, compute_dtype=jnp.bfloat16):
    """Apply a full MLP to VMEM-resident row tiles.

    The layer-0 inputs are concatenated in VMEM (lane-dense single dot).
    Matmul operands are cast to `compute_dtype` (bf16 on the hot paths) with f32
    accumulation; LayerNorm / activations are computed in f32.
    Layers whose output width is 1 use a VPU multiply + lane reduction instead of
    an N=1 MXU matmul.
    param layout per layer: w, b, (gamma, beta if layer-norm).
    """
    x = xs[0] if len(xs) == 1 else jnp.concatenate(xs, axis=-1)
    h = x.astype(jnp.float32)
    p = 0
    for ln, act, vec_head in layer_flags:
        w = param_refs[p][...]
        b = param_refs[p + 1][...]
        p += 2
        if vec_head:
            # [T,K] * [1,K] -> lane-reduce -> [T,1]; VPU + XLU, skips the MXU.
            y = jnp.sum(h * w.astype(jnp.float32), axis=-1, keepdims=True) + b
        else:
            y = jnp.dot(h.astype(compute_dtype), w.astype(compute_dtype),
                        preferred_element_type=jnp.float32) + b
        if ln:
            g = param_refs[p][...]
            beta = param_refs[p + 1][...]
            p += 2
            mean = jnp.mean(y, axis=-1, keepdims=True)
            var = jnp.mean(jnp.square(y - mean), axis=-1, keepdims=True)
            y = (y - mean) * jax.lax.rsqrt(var + 1e-5) * g + beta   # torch LN eps
        if act == "tanh":
            y = jnp.tanh(y)
        elif act == "sigmoid":
            y = jax.nn.sigmoid(y)
        h = y
    return h


def _make_fused_mlp_kernel(n_inputs, layer_flags, residual_index, compute_dtype):
    def kernel(*refs):
        xs = [refs[i][...] for i in range(n_inputs)]
        out_ref = refs[-1]
        h = _mlp_body(xs, refs[n_inputs:-1], layer_flags, compute_dtype)
        if residual_index is not None:
            h = h + xs[residual_index].astype(jnp.float32)     # fused residual add
        out_ref[...] = h.astype(out_ref.dtype)
    return kernel


def _make_edge_weight_kernel(layer_flags):
    """edge MLP (in-VMEM concat) -> sigmoid -> (e*hi, e*ho); no [E,1] HBM output."""
    def kernel(*refs):
        hi = refs[0][...]
        ho = refs[1][...]
        whi_ref, who_ref = refs[-2], refs[-1]
        logit = _mlp_body([hi, ho], refs[2:-2], layer_flags)     # [TE, 1] f32
        e = jax.nn.sigmoid(logit)
        whi_ref[...] = (e * hi.astype(jnp.float32)).astype(whi_ref.dtype)
        who_ref[...] = (e * ho.astype(jnp.float32)).astype(who_ref.dtype)
    return kernel


# ----------------------------------------------------------------------------
# scatter-add kernels (one-hot @ messages on the MXU, tiled + accumulated)
# ----------------------------------------------------------------------------
def _make_segsum2_kernel(sub, n_sub):
    """Dual scatter_add: mi[n] = sum_{e: dst[e]==n} whi[e]; mo via src/who.

    Grid: (node tiles [parallel], edge tiles [arbitrary, reduction]).  Inside the
    kernel a static loop over `n_sub` sub-chunks of `sub` edges bounds the one-hot
    to [tn, sub] bf16 while the outer edge tile keeps HBM re-reads low."""
    def kernel(dst_ref, src_ref, whi_ref, who_ref, mi_ref, mo_ref, acc_i, acc_o):
        k = pl.program_id(1)

        @pl.when(k == 0)
        def _():
            acc_i[...] = jnp.zeros_like(acc_i)
            acc_o[...] = jnp.zeros_like(acc_o)

        tn = acc_i.shape[0]
        base = pl.program_id(0) * tn
        node_ids = jax.lax.broadcasted_iota(jnp.int32, (tn, 1), 0) + base

        for c in range(n_sub):                                   # static unroll
            ids_i = dst_ref[:, pl.ds(c * sub, sub)]              # (1, sub)
            ids_o = src_ref[:, pl.ds(c * sub, sub)]
            oh_i = _one_hot_bf16(node_ids == ids_i)              # (tn, sub) bf16
            oh_o = _one_hot_bf16(node_ids == ids_o)
            whi_c = whi_ref[pl.ds(c * sub, sub), :]               # (sub, H) bf16
            who_c = who_ref[pl.ds(c * sub, sub), :]
            acc_i[...] += jnp.dot(oh_i, whi_c, preferred_element_type=jnp.float32)
            acc_o[...] += jnp.dot(oh_o, who_c, preferred_element_type=jnp.float32)

        @pl.when(k == pl.num_programs(1) - 1)
        def _():
            mi_ref[...] = acc_i[...].astype(mi_ref.dtype)
            mo_ref[...] = acc_o[...].astype(mo_ref.dtype)
    return kernel


def _segsum_kernel(ids_ref, x_ref, out_ref, acc):
    """out[b] = sum_{n: ids[n]==b} x[n]  (graph summary; dim_size is small)."""
    k = pl.program_id(0)

    @pl.when(k == 0)
    def _():
        acc[...] = jnp.zeros_like(acc)

    nb = acc.shape[0]
    rows = jax.lax.broadcasted_iota(jnp.int32, (nb, 1), 0)
    oh = _one_hot_bf16(rows == ids_ref[...])                     # (nb, tr) bf16
    acc[...] += jnp.dot(oh, x_ref[...].astype(jnp.bfloat16),
                        preferred_element_type=jnp.float32)

    @pl.when(k == pl.num_programs(0) - 1)
    def _():
        out_ref[...] = acc[...].astype(out_ref.dtype)


# ----------------------------------------------------------------------------
# pallas_call wrappers
# ----------------------------------------------------------------------------
def _mlp_params(layers):
    """Flatten MLP parameters into operands + full-block specs (+ flags)."""
    zero_map = lambda i: (0, 0)
    ops, specs, flags = [], [], []
    for p in layers:
        fin, fout = p["w"].shape
        vec_head = fout == 1
        flags.append((bool(p["ln"]), p["act"], vec_head))
        w = p["w"].T if vec_head else p["w"]          # (1, fin) row for the VPU head
        ops.append(w)
        specs.append(pl.BlockSpec(w.shape, zero_map))
        ops.append(p["b"].reshape(1, fout))
        specs.append(pl.BlockSpec((1, fout), zero_map))
        if p["ln"]:
            ops.append(p["g"].reshape(1, fout))
            specs.append(pl.BlockSpec((1, fout), zero_map))
            ops.append(p["beta"].reshape(1, fout))
            specs.append(pl.BlockSpec((1, fout), zero_map))
    return ops, specs, flags


def fused_mlp(inputs, layers, *, residual_index=None, out_dtype=jnp.bfloat16,
              compute_dtype=jnp.bfloat16, max_tile=4096):
    """Whole MLP (all layers + LN + act [+ residual]) in one row-tiled kernel.

    `inputs` is a list of [R, Fin_i] arrays; they are concatenated in VMEM inside
    the kernel (single lane-dense layer-0 dot, no concat slab in HBM)."""
    rows = inputs[0].shape[0]
    tile, padded = _row_tiling(rows, max_tile)
    inputs_p = [_pad_rows(a, padded) for a in inputs]
    param_ops, param_specs, flags = _mlp_params(layers)
    in_specs = [pl.BlockSpec((tile, a.shape[1]), lambda i: (i, 0))
                for a in inputs_p] + param_specs
    fout = layers[-1]["w"].shape[1]
    kern = _make_fused_mlp_kernel(len(inputs), flags, residual_index, compute_dtype)
    out = pl.pallas_call(
        kern,
        out_shape=jax.ShapeDtypeStruct((padded, fout), out_dtype),
        grid=(padded // tile,),
        in_specs=in_specs,
        out_specs=pl.BlockSpec((tile, fout), lambda i: (i, 0)),
        compiler_params=pltpu.CompilerParams(dimension_semantics=("parallel",)),
    )(*inputs_p, *param_ops)
    return out[:rows]


def edge_messages(hi, ho, layers, *, max_tile=4096):
    """Fused edge path: edge MLP -> sigmoid -> (e*hi, e*ho), row-tiled over E."""
    e_rows, h = hi.shape
    tile, padded = _row_tiling(e_rows, max_tile)
    hi_p = _pad_rows(hi, padded)
    ho_p = _pad_rows(ho, padded)
    param_ops, param_specs, flags = _mlp_params(layers)
    row_spec = pl.BlockSpec((tile, h), lambda i: (i, 0))
    kern = _make_edge_weight_kernel(flags)
    whi, who = pl.pallas_call(
        kern,
        out_shape=(jax.ShapeDtypeStruct((padded, h), jnp.bfloat16),
                   jax.ShapeDtypeStruct((padded, h), jnp.bfloat16)),
        grid=(padded // tile,),
        in_specs=[row_spec, row_spec] + param_specs,
        out_specs=(row_spec, row_spec),
        compiler_params=pltpu.CompilerParams(dimension_semantics=("parallel",)),
    )(hi_p, ho_p, *param_ops)
    return whi[:e_rows], who[:e_rows]


def scatter_add_pair(whi, who, dst, src, n_nodes, *, max_node_tile=2048,
                     max_edge_tile=2048, edge_subchunk=512,
                     out_dtype=jnp.bfloat16):
    """mi = scatter_add(whi, dst, N); mo = scatter_add(who, src, N) — one call.

    TODO(synk): for production-size graphs an edge-sorted segmented sum (scalar-
    prefetched per-node-tile edge offsets) would replace this dense O(N*E*H) form."""
    e_rows, h = whi.shape
    te = min(max_edge_tile, _round_up(e_rows, edge_subchunk))    # multiple of 512
    e_pad = _round_up(e_rows, te)
    tn, n_pad = _row_tiling(n_nodes, max_node_tile)
    sub = min(edge_subchunk, te)
    n_sub = te // sub

    whi_p = _pad_rows(whi, e_pad)
    who_p = _pad_rows(who, e_pad)
    dst_p = _pad_ids(dst, e_pad).reshape(1, e_pad)   # pad with -1 (never matches)
    src_p = _pad_ids(src, e_pad).reshape(1, e_pad)

    id_spec = pl.BlockSpec((1, te), lambda n, k: (0, k))
    x_spec = pl.BlockSpec((te, h), lambda n, k: (k, 0))
    out_spec = pl.BlockSpec((tn, h), lambda n, k: (n, 0))
    mi, mo = pl.pallas_call(
        _make_segsum2_kernel(sub, n_sub),
        out_shape=(jax.ShapeDtypeStruct((n_pad, h), out_dtype),
                   jax.ShapeDtypeStruct((n_pad, h), out_dtype)),
        grid=(n_pad // tn, e_pad // te),
        in_specs=[id_spec, id_spec, x_spec, x_spec],
        out_specs=(out_spec, out_spec),
        scratch_shapes=[pltpu.VMEM((tn, h), jnp.float32),
                        pltpu.VMEM((tn, h), jnp.float32)],
        compiler_params=pltpu.CompilerParams(
            dimension_semantics=("parallel", "arbitrary"),
            # explicit, headroom-aware budget (actual use is a few MiB; raises the
            # v5e 16 MiB scoped default, stays within v7x's 64 MiB physical VMEM)
            vmem_limit_bytes=64 * 1024 * 1024),
    )(dst_p, src_p, whi_p, who_p)
    return mi[:n_nodes], mo[:n_nodes]


def scatter_add(x, ids, dim_size, *, max_tile=2048):
    """torch_scatter.scatter_add(x, ids, dim=0, dim_size=dim_size) — graph summary."""
    rows, h = x.shape
    tr, r_pad = _row_tiling(rows, max_tile)
    b_pad = _round_up(dim_size, 8)
    x_p = _pad_rows(x, r_pad)
    ids_p = _pad_ids(ids, r_pad).reshape(1, r_pad)
    out = pl.pallas_call(
        _segsum_kernel,
        out_shape=jax.ShapeDtypeStruct((b_pad, h), jnp.float32),
        grid=(r_pad // tr,),
        in_specs=[pl.BlockSpec((1, tr), lambda k: (0, k)),
                  pl.BlockSpec((tr, h), lambda k: (k, 0))],
        out_specs=pl.BlockSpec((b_pad, h), lambda k: (0, 0)),
        scratch_shapes=[pltpu.VMEM((b_pad, h), jnp.float32)],
        compiler_params=pltpu.CompilerParams(dimension_semantics=("arbitrary",)),
    )(ids_p, x_p)
    return out[:dim_size]


# ----------------------------------------------------------------------------
# Parameter construction (deterministic, mirrors make_mlp from the repo)
# ----------------------------------------------------------------------------
def _init_linear(key, fin, fout):
    k1, k2 = jax.random.split(key)
    bound = 1.0 / jnp.sqrt(jnp.asarray(fin, jnp.float32))
    w = jax.random.uniform(k1, (fin, fout), jnp.float32, -bound, bound)
    b = jax.random.uniform(k2, (fout,), jnp.float32, -bound, bound)
    return w, b


def init_mlp(key, input_size, sizes, hidden_act="tanh", output_act=None,
             layer_norm=True):
    """Mirror of make_mlp: Linear -> [LayerNorm] -> act per hidden layer;
    final layer gets LayerNorm/act only if output_act is not None."""
    dims = [input_size] + list(sizes)
    n = len(sizes)
    keys = jax.random.split(key, n)
    layers = []
    for i in range(n):
        w, b = _init_linear(keys[i], dims[i], dims[i + 1])
        last = i == n - 1
        act = (output_act if last else hidden_act) or "none"
        ln = bool(layer_norm) and ((not last) or (output_act is not None))
        layer = dict(w=w, b=b, act=act, ln=ln, g=None, beta=None)
        if ln:
            layer["g"] = jnp.ones((dims[i + 1],), jnp.float32)
            layer["beta"] = jnp.zeros((dims[i + 1],), jnp.float32)
        layers.append(layer)
    return layers


def init_params(key, input_dim=3, gnn_hidden=32, ip_hidden=32, n_graph_iters=2):
    k1, k2, k3, k4 = jax.random.split(key, 4)
    gnn = dict(
        input_network=init_mlp(k1, input_dim, [gnn_hidden],
                               hidden_act="tanh", output_act="tanh",
                               layer_norm=True),
        edge_network=init_mlp(k2, 2 * gnn_hidden, [gnn_hidden, gnn_hidden, 1],
                              hidden_act="tanh", output_act=None,
                              layer_norm=True),
        node_network=init_mlp(k3, 3 * gnn_hidden, [gnn_hidden] * 3,
                              hidden_act="tanh", output_act="tanh",
                              layer_norm=True),
    )
    ip_pred_mlp = init_mlp(k4, gnn_hidden, [ip_hidden] * 3 + [3],
                           hidden_act="tanh", output_act=None, layer_norm=True)
    return dict(gnn=gnn, ip_pred_mlp=ip_pred_mlp, n_graph_iters=n_graph_iters)


# ----------------------------------------------------------------------------
# Model forward
# ----------------------------------------------------------------------------
def gnn_forward(params, x, edge_index, n_graph_iters):
    # TODO(synk): GNN class source not provided with IpGNN; implemented in the
    # standard HEP.TrkX residual interaction-network form used by this repo.
    n_nodes = x.shape[0]
    src, dst = edge_index[0], edge_index[1]

    h = fused_mlp([x], params["input_network"])                     # [N, H] bf16
    for _ in range(n_graph_iters):
        # TODO(synk): fuse the hi/ho row gathers into the edge kernel (scalar-
        # prefetched indices + in-kernel gather); kept as an XLA gather on bf16 h
        # for lowering robustness (traffic already halved by the bf16 node state).
        hi = jnp.take(h, src, axis=0)                               # [E, H] bf16
        ho = jnp.take(h, dst, axis=0)                               # [E, H] bf16
        # fused: edge MLP (in-VMEM concat) + sigmoid + e*hi / e*ho
        whi, who = edge_messages(hi, ho, params["edge_network"])    # 2x [E, H] bf16
        # fused dual scatter_add (bf16 one-hot @ messages on the MXU, f32 acc)
        mi, mo = scatter_add_pair(whi, who, dst, src, n_nodes)      # 2x [N, H] bf16
        # fused node MLP (in-VMEM concat of [mi, mo, h]) + residual
        h = fused_mlp([mi, mo, h], params["node_network"], residual_index=2)
    # Note: the final edge_network pass (edge_output) is skipped because
    # IpGNN.forward discards it — only node_output feeds the IP prediction.
    return h


def ipgnn_forward(params, x, edge_index, batch, batch_size):
    node_output = gnn_forward(params["gnn"], x, edge_index,
                              params["n_graph_iters"])
    ip_summary = scatter_add(node_output, batch, batch_size)        # [B, H] f32
    # ip_pred_mlp is tiny ([B, H]); run it in f32 for a sharper final prediction.
    ip_pred = fused_mlp([ip_summary], params["ip_pred_mlp"],
                        out_dtype=jnp.float32, compute_dtype=jnp.float32)
    return ip_pred                                                   # [B, 3]


# ----------------------------------------------------------------------------
# Pure-JAX reference (for correctness validation)
# ----------------------------------------------------------------------------
def _ref_forward(params, x, edge_index, batch, batch_size):
    hp = jax.lax.Precision.HIGHEST

    def mlp(layers, a):
        for p in layers:
            y = jnp.dot(a, p["w"], precision=hp) + p["b"]
            if p["ln"]:
                mean = y.mean(-1, keepdims=True)
                var = ((y - mean) ** 2).mean(-1, keepdims=True)
                y = (y - mean) / jnp.sqrt(var + 1e-5) * p["g"] + p["beta"]
            if p["act"] == "tanh":
                y = jnp.tanh(y)
            elif p["act"] == "sigmoid":
                y = jax.nn.sigmoid(y)
            a = y
        return a

    src, dst = edge_index[0], edge_index[1]
    n = x.shape[0]
    g = params["gnn"]
    h = mlp(g["input_network"], x)
    for _ in range(params["n_graph_iters"]):
        h0 = h
        hi, ho = h[src], h[dst]
        e = jax.nn.sigmoid(mlp(g["edge_network"], jnp.concatenate([hi, ho], 1)))
        mi = jax.ops.segment_sum(e * hi, dst, num_segments=n)
        mo = jax.ops.segment_sum(e * ho, src, num_segments=n)
        h = mlp(g["node_network"], jnp.concatenate([mi, mo, h], 1)) + h0
    summary = jax.ops.segment_sum(h, batch, num_segments=batch_size)
    return mlp(params["ip_pred_mlp"], summary)


# ----------------------------------------------------------------------------
# Demo
# ----------------------------------------------------------------------------
if __name__ == "__main__":
    key = jax.random.PRNGKey(0)
    N_NODES, N_EDGES, BATCH_SIZE = 64, 128, 2
    GNN_HIDDEN, IP_HIDDEN, N_ITERS = 32, 32, 2

    k_x, k_e, k_p = jax.random.split(key, 3)
    x = jax.random.normal(k_x, (N_NODES, 3), jnp.float32)           # hit (r,phi,z)
    edge_index = jax.random.randint(k_e, (2, N_EDGES), 0, N_NODES, jnp.int32)
    batch = jnp.concatenate(
        [jnp.zeros((N_NODES // 2,), jnp.int32),
         jnp.ones((N_NODES - N_NODES // 2,), jnp.int32)])

    params = init_params(k_p, input_dim=3, gnn_hidden=GNN_HIDDEN,
                         ip_hidden=IP_HIDDEN, n_graph_iters=N_ITERS)

    fwd = jax.jit(lambda xx, ee, bb: ipgnn_forward(params, xx, ee, bb, BATCH_SIZE))
    ip_pred = fwd(x, edge_index, batch)
    jax.block_until_ready(ip_pred)
    assert ip_pred.shape == (BATCH_SIZE, 3)

    # Reference runs in f32/HIGHEST; the Pallas path uses bf16 MXU operands and
    # bf16 HBM intermediates (per perf review), so compare at bf16-appropriate
    # tolerances.
    ref = _ref_forward(params, x, edge_index, batch, BATCH_SIZE)
    assert jnp.allclose(ip_pred, ref, atol=5e-2, rtol=5e-2), (ip_pred, ref)

    print("KERNEL_OK")
</pallas_src>

<mosaic_0001>
module attributes {stable_mosaic.version = 11 : i64} {
  func.func @kernel(%arg0: i32, %arg1: memref<64x3xf32, #tpu.memory_space<vmem>>, %arg2: memref<3x32xf32, #tpu.memory_space<vmem>>, %arg3: memref<1x32xf32, #tpu.memory_space<vmem>>, %arg4: memref<1x32xf32, #tpu.memory_space<vmem>>, %arg5: memref<1x32xf32, #tpu.memory_space<vmem>>, %arg6: memref<64x32xbf16, #tpu.memory_space<vmem>>) attributes {dimension_semantics = [#tpu.dimension_semantics<parallel>], iteration_bounds = array<i64: 1>, scalar_prefetch = 0 : i64, scratch_operands = 0 : i64, tpu.core_type = #tpu.core_type<tc>, window_params = [{transform_indices = @transform_0, window_bounds = array<i64: 64, 3>}, {pipeline_mode = #tpu.pipeline_mode<synchronous>, transform_indices = @transform_1, window_bounds = array<i64: 3, 32>}, {pipeline_mode = #tpu.pipeline_mode<synchronous>, transform_indices = @transform_2, window_bounds = array<i64: 1, 32>}, {pipeline_mode = #tpu.pipeline_mode<synchronous>, transform_indices = @transform_3, window_bounds = array<i64: 1, 32>}, {pipeline_mode = #tpu.pipeline_mode<synchronous>, transform_indices = @transform_4, window_bounds = array<i64: 1, 32>}, {transform_indices = @transform_5, window_bounds = array<i64: 64, 32>}]} {
    %c0 = arith.constant 0 : index
    %c0_0 = arith.constant 0 : index
    %0 = vector.load %arg1[%c0, %c0_0] : memref<64x3xf32, #tpu.memory_space<vmem>>, vector<64x3xf32>
    %c0_1 = arith.constant 0 : index
    %c0_2 = arith.constant 0 : index
    %1 = vector.load %arg2[%c0_1, %c0_2] : memref<3x32xf32, #tpu.memory_space<vmem>>, vector<3x32xf32>
    %c0_3 = arith.constant 0 : index
    %c0_4 = arith.constant 0 : index
    %2 = vector.load %arg3[%c0_3, %c0_4] : memref<1x32xf32, #tpu.memory_space<vmem>>, vector<1x32xf32>
    %3 = arith.truncf %0 : vector<64x3xf32> to vector<64x3xbf16>
    %4 = arith.truncf %1 : vector<3x32xf32> to vector<3x32xbf16>
    %cst = arith.constant dense<0.000000e+00> : vector<64x32xf32>
    %5 = tpu.matmul %3, %4, %cst {dimension_numbers = #tpu.dot_dimension_numbers<[1], [0], [0], [1], [0, 0, 1, 1], [], []>} : vector<64x3xbf16>, vector<3x32xbf16>, vector<64x32xf32> -> vector<64x32xf32>
    %6 = vector.broadcast %2 : vector<1x32xf32> to vector<64x32xf32>
    %7 = arith.addf %5, %6 : vector<64x32xf32>
    %c0_5 = arith.constant 0 : index
    %c0_6 = arith.constant 0 : index
    %8 = vector.load %arg4[%c0_5, %c0_6] : memref<1x32xf32, #tpu.memory_space<vmem>>, vector<1x32xf32>
    %c0_7 = arith.constant 0 : index
    %c0_8 = arith.constant 0 : index
    %9 = vector.load %arg5[%c0_7, %c0_8] : memref<1x32xf32, #tpu.memory_space<vmem>>, vector<1x32xf32>
    %cst_9 = arith.constant dense<0.000000e+00> : vector<64xf32>
    %10 = vector.multi_reduction <add>, %7, %cst_9 [1] : vector<64x32xf32> to vector<64xf32>
    %11 = vector.shape_cast %10 : vector<64xf32> to vector<64x1xf32>
    %cst_10 = arith.constant 3.200000e+01 : f32
    %12 = vector.broadcast %cst_10 : f32 to vector<64x1xf32>
    %13 = arith.divf %11, %12 : vector<64x1xf32>
    %14 = vector.broadcast %13 : vector<64x1xf32> to vector<64x32xf32>
    %15 = arith.subf %7, %14 : vector<64x32xf32>
    %16 = arith.mulf %15, %15 : vector<64x32xf32>
    %cst_11 = arith.constant dense<0.000000e+00> : vector<64xf32>
    %17 = vector.multi_reduction <add>, %16, %cst_11 [1] : vector<64x32xf32> to vector<64xf32>
    %18 = vector.shape_cast %17 : vector<64xf32> to vector<64x1xf32>
    %cst_12 = arith.constant 3.200000e+01 : f32
    %19 = vector.broadcast %cst_12 : f32 to vector<64x1xf32>
    %20 = arith.divf %18, %19 : vector<64x1xf32>
    %21 = vector.broadcast %13 : vector<64x1xf32> to vector<64x32xf32>
    %22 = arith.subf %7, %21 : vector<64x32xf32>
    %cst_13 = arith.constant 9.99999974E-6 : f32
    %23 = vector.broadcast %cst_13 : f32 to vector<64x1xf32>
    %24 = arith.addf %20, %23 : vector<64x1xf32>
    %25 = math.rsqrt %24 : vector<64x1xf32>
    %26 = vector.broadcast %25 : vector<64x1xf32> to vector<64x32xf32>
    %27 = arith.mulf %22, %26 : vector<64x32xf32>
    %28 = vector.broadcast %8 : vector<1x32xf32> to vector<64x32xf32>
    %29 = arith.mulf %27, %28 : vector<64x32xf32>
    %30 = vector.broadcast %9 : vector<1x32xf32> to vector<64x32xf32>
    %31 = arith.addf %29, %30 : vector<64x32xf32>
    %32 = math.tanh %31 : vector<64x32xf32>
    %33 = arith.truncf %32 : vector<64x32xf32> to vector<64x32xbf16>
    %c0_14 = arith.constant 0 : index
    %c0_15 = arith.constant 0 : index
    %34 = vector.load %arg6[%c0_14, %c0_15] : memref<64x32xbf16, #tpu.memory_space<vmem>>, vector<64x32xbf16>
    tpu.vector_store %arg6[%c0_14, %c0_15], %33 {strides = array<i32>} : memref<64x32xbf16, #tpu.memory_space<vmem>>, vector<64x32xbf16>,
    return
  }
  func.func @transform_0(%arg0: i32) -> (i32, i32) {
    %c0_i32 = arith.constant 0 : i32
    %c0_i32_0 = arith.constant 0 : i32
    return %arg0, %c0_i32 : i32, i32
  }
  func.func @transform_1(%arg0: i32) -> (i32, i32) {
    %c0_i32 = arith.constant 0 : i32
    %c0_i32_0 = arith.constant 0 : i32
    %c0_i32_1 = arith.constant 0 : i32
    return %c0_i32, %c0_i32_0 : i32, i32
  }
  func.func @transform_2(%arg0: i32) -> (i32, i32) {
    %c0_i32 = arith.constant 0 : i32
    %c0_i32_0 = arith.constant 0 : i32
    %c0_i32_1 = arith.constant 0 : i32
    return %c0_i32, %c0_i32_0 : i32, i32
  }
  func.func @transform_3(%arg0: i32) -> (i32, i32) {
    %c0_i32 = arith.constant 0 : i32
    %c0_i32_0 = arith.constant 0 : i32
    %c0_i32_1 = arith.constant 0 : i32
    return %c0_i32, %c0_i32_0 : i32, i32
  }
  func.func @transform_4(%arg0: i32) -> (i32, i32) {
    %c0_i32 = arith.constant 0 : i32
    %c0_i32_0 = arith.constant 0 : i32
    %c0_i32_1 = arith.constant 0 : i32
    return %c0_i32, %c0_i32_0 : i32, i32
  }
  func.func @transform_5(%arg0: i32) -> (i32, i32) {
    %c0_i32 = arith.constant 0 : i32
    %c0_i32_0 = arith.constant 0 : i32
    return %arg0, %c0_i32 : i32, i32
  }
}

module attributes {stable_mosaic.version = 11 : i64} {
  func.func @kernel(%arg0: i32, %arg1: memref<128x32xbf16, #tpu.memory_space<vmem>>, %arg2: memref<128x32xbf16, #tpu.memory_space<vmem>>, %arg3: memref<64x32xf32, #tpu.memory_space<vmem>>, %arg4: memref<1x32xf32, #tpu.memory_space<vmem>>, %arg5: memref<1x32xf32, #tpu.memory_space<vmem>>, %arg6: memref<1x32xf32, #tpu.memory_space<vmem>>, %arg7: memref<32x32xf32, #tpu.memory_space<vmem>>, %arg8: memref<1x32xf32, #tpu.memory_space<vmem>>, %arg9: memref<1x32xf32, #tpu.memory_space<vmem>>, %arg10: memref<1x32xf32, #tpu.memory_space<vmem>>, %arg11: memref<1x32xf32, #tpu.memory_space<vmem>>, %arg12: memref<1x1xf32, #tpu.memory_space<vmem>>, %arg13: memref<128x32xbf16, #tpu.memory_space<vmem>>, %arg14: memref<128x32xbf16, #tpu.memory_space<vmem>>) attributes {dimension_semantics = [#tpu.dimension_semantics<parallel>], iteration_bounds = array<i64: 1>, scalar_prefetch = 0 : i64, scratch_operands = 0 : i64, tpu.core_type = #tpu.core_type<tc>, window_params = [{transform_indices = @transform_0, window_bounds = array<i64: 128, 32>}, {transform_indices = @transform_1, window_bounds = array<i64: 128, 32>}, {pipeline_mode = #tpu.pipeline_mode<synchronous>, transform_indices = @transform_2, window_bounds = array<i64: 64, 32>}, {pipeline_mode = #tpu.pipeline_mode<synchronous>, transform_indices = @transform_3, window_bounds = array<i64: 1, 32>}, {pipeline_mode = #tpu.pipeline_mode<synchronous>, transform_indices = @transform_4, window_bounds = array<i64: 1, 32>}, {pipeline_mode = #tpu.pipeline_mode<synchronous>, transform_indices = @transform_5, window_bounds = array<i64: 1, 32>}, {pipeline_mode = #tpu.pipeline_mode<synchronous>, transform_indices = @transform_6, window_bounds = array<i64: 32, 32>}, {pipeline_mode = #tpu.pipeline_mode<synchronous>, transform_indices = @transform_7, window_bounds = array<i64: 1, 32>}, {pipeline_mode = #tpu.pipeline_mode<synchronous>, transform_indices = @transform_8, window_bounds = array<i64: 1, 32>}, {pipeline_mode = #tpu.pipeline_mode<synchronous>, transform_indices = @transform_9, window_bounds = array<i64: 1, 32>}, {pipeline_mode = #tpu.pipeline_mode<synchronous>, transform_indices = @transform_10, window_bounds = array<i64: 1, 32>}, {pipeline_mode = #tpu.pipeline_mode<synchronous>, transform_indices = @transform_11, window_bounds = array<i64: 1, 1>}, {transform_indices = @transform_12, window_bounds = array<i64: 128, 32>}, {transform_indices = @transform_13, window_bounds = array<i64: 128, 32>}]} {
    %c0 = arith.constant 0 : index
    %c0_0 = arith.constant 0 : index
    %0 = vector.load %arg1[%c0, %c0_0] : memref<128x32xbf16, #tpu.memory_space<vmem>>, vector<128x32xbf16>
    %c0_1 = arith.constant 0 : index
    %c0_2 = arith.constant 0 : index
    %1 = vector.load %arg2[%c0_1, %c0_2] : memref<128x32xbf16, #tpu.memory_space<vmem>>, vector<128x32xbf16>
    %2 = tpu.concatenate %0, %1 in 1 : vector<128x32xbf16>, vector<128x32xbf16> -> vector<128x64xbf16>
    %3 = arith.extf %2 : vector<128x64xbf16> to vector<128x64xf32>
    %c0_3 = arith.constant 0 : index
    %c0_4 = arith.constant 0 : index
    %4 = vector.load %arg3[%c0_3, %c0_4] : memref<64x32xf32, #tpu.memory_space<vmem>>, vector<64x32xf32>
    %c0_5 = arith.constant 0 : index
    %c0_6 = arith.constant 0 : index
    %5 = vector.load %arg4[%c0_5, %c0_6] : memref<1x32xf32, #tpu.memory_space<vmem>>, vector<1x32xf32>
    %6 = arith.truncf %3 : vector<128x64xf32> to vector<128x64xbf16>
    %7 = arith.truncf %4 : vector<64x32xf32> to vector<64x32xbf16>
    %cst = arith.constant dense<0.000000e+00> : vector<128x32xf32>
    %8 = tpu.matmul %6, %7, %cst {dimension_numbers = #tpu.dot_dimension_numbers<[1], [0], [0], [1], [0, 0, 1, 1], [], []>} : vector<128x64xbf16>, vector<64x32xbf16>, vector<128x32xf32> -> vector<128x32xf32>
    %9 = vector.broadcast %5 : vector<1x32xf32> to vector<128x32xf32>
    %10 = arith.addf %8, %9 : vector<128x32xf32>
    %c0_7 = arith.constant 0 : index
    %c0_8 = arith.constant 0 : index
    %11 = vector.load %arg5[%c0_7, %c0_8] : memref<1x32xf32, #tpu.memory_space<vmem>>, vector<1x32xf32>
    %c0_9 = arith.constant 0 : index
    %c0_10 = arith.constant 0 : index
    %12 = vector.load %arg6[%c0_9, %c0_10] : memref<1x32xf32, #tpu.memory_space<vmem>>, vector<1x32xf32>
    %cst_11 = arith.constant dense<0.000000e+00> : vector<128xf32>
    %13 = vector.multi_reduction <add>, %10, %cst_11 [1] : vector<128x32xf32> to vector<128xf32>
    %14 = vector.shape_cast %13 : vector<128xf32> to vector<128x1xf32>
    %cst_12 = arith.constant 3.200000e+01 : f32
    %15 = vector.broadcast %cst_12 : f32 to vector<128x1xf32>
    %16 = arith.divf %14, %15 : vector<128x1xf32>
    %17 = vector.broadcast %16 : vector<128x1xf32> to vector<128x32xf32>
    %18 = arith.subf %10, %17 : vector<128x32xf32>
    %19 = arith.mulf %18, %18 : vector<128x32xf32>
    %cst_13 = arith.constant dense<0.000000e+00> : vector<128xf32>
    %20 = vector.multi_reduction <add>, %19, %cst_13 [1] : vector<128x32xf32> to vector<128xf32>
    %21 = vector.shape_cast %20 : vector<128xf32> to vector<128x1xf32>
    %cst_14 = arith.constant 3.200000e+01 : f32
    %22 = vector.broadcast %cst_14 : f32 to vector<128x1xf32>
    %23 = arith.divf %21, %22 : vector<128x1xf32>
    %24 = vector.broadcast %16 : vector<128x1xf32> to vector<128x32xf32>
    %25 = arith.subf %10, %24 : vector<128x32xf32>
    %cst_15 = arith.constant 9.99999974E-6 : f32
    %26 = vector.broadcast %cst_15 : f32 to vector<128x1xf32>
    %27 = arith.addf %23, %26 : vector<128x1xf32>
    %28 = math.rsqrt %27 : vector<128x1xf32>
    %29 = vector.broadcast %28 : vector<128x1xf32> to vector<128x32xf32>
    %30 = arith.mulf %25, %29 : vector<128x32xf32>
    %31 = vector.broadcast %11 : vector<1x32xf32> to vector<128x32xf32>
    %32 = arith.mulf %30, %31 : vector<128x32xf32>
    %33 = vector.broadcast %12 : vector<1x32xf32> to vector<128x32xf32>
    %34 = arith.addf %32, %33 : vector<128x32xf32>
    %35 = math.tanh %34 : vector<128x32xf32>
    %c0_16 = arith.constant 0 : index
    %c0_17 = arith.constant 0 : index
    %36 = vector.load %arg7[%c0_16, %c0_17] : memref<32x32xf32, #tpu.memory_space<vmem>>, vector<32x32xf32>
    %c0_18 = arith.constant 0 : index
    %c0_19 = arith.constant 0 : index
    %37 = vector.load %arg8[%c0_18, %c0_19] : memref<1x32xf32, #tpu.memory_space<vmem>>, vector<1x32xf32>
    %38 = arith.truncf %35 : vector<128x32xf32> to vector<128x32xbf16>
    %39 = arith.truncf %36 : vector<32x32xf32> to vector<32x32xbf16>
    %cst_20 = arith.constant dense<0.000000e+00> : vector<128x32xf32>
    %40 = tpu.matmul %38, %39, %cst_20 {dimension_numbers = #tpu.dot_dimension_numbers<[1], [0], [0], [1], [0, 0, 1, 1], [], []>} : vector<128x32xbf16>, vector<32x32xbf16>, vector<128x32xf32> -> vector<128x32xf32>
    %41 = vector.broadcast %37 : vector<1x32xf32> to vector<128x32xf32>
    %42 = arith.addf %40, %41 : vector<128x32xf32>
    %c0_21 = arith.constant 0 : index
    %c0_22 = arith.constant 0 : index
    %43 = vector.load %arg9[%c0_21, %c0_22] : memref<1x32xf32, #tpu.memory_space<vmem>>, vector<1x32xf32>
    %c0_23 = arith.constant 0 : index
    %c0_24 = arith.constant 0 : index
    %44 = vector.load %arg10[%c0_23, %c0_24] : memref<1x32xf32, #tpu.memory_space<vmem>>, vector<1x32xf32>
    %cst_25 = arith.constant dense<0.000000e+00> : vector<128xf32>
    %45 = vector.multi_reduction <add>, %42, %cst_25 [1] : vector<128x32xf32> to vector<128xf32>
    %46 = vector.shape_cast %45 : vector<128xf32> to vector<128x1xf32>
    %cst_26 = arith.constant 3.200000e+01 : f32
    %47 = vector.broadcast %cst_26 : f32 to vector<128x1xf32>
    %48 = arith.divf %46, %47 : vector<128x1xf32>
    %49 = vector.broadcast %48 : vector<128x1xf32> to vector<128x32xf32>
    %50 = arith.subf %42, %49 : vector<128x32xf32>
    %51 = arith.mulf %50, %50 : vector<128x32xf32>
    %cst_27 = arith.constant dense<0.000000e+00> : vector<128xf32>
    %52 = vector.multi_reduction <add>, %51, %cst_27 [1] : vector<128x32xf32> to vector<128xf32>
    %53 = vector.shape_cast %52 : vector<128xf32> to vector<128x1xf32>
    %cst_28 = arith.constant 3.200000e+01 : f32
    %54 = vector.broadcast %cst_28 : f32 to vector<128x1xf32>
    %55 = arith.divf %53, %54 : vector<128x1xf32>
    %56 = vector.broadcast %48 : vector<128x1xf32> to vector<128x32xf32>
    %57 = arith.subf %42, %56 : vector<128x32xf32>
    %cst_29 = arith.constant 9.99999974E-6 : f32
    %58 = vector.broadcast %cst_29 : f32 to vector<128x1xf32>
    %59 = arith.addf %55, %58 : vector<128x1xf32>
    %60 = math.rsqrt %59 : vector<128x1xf32>
    %61 = vector.broadcast %60 : vector<128x1xf32> to vector<128x32xf32>
    %62 = arith.mulf %57, %61 : vector<128x32xf32>
    %63 = vector.broadcast %43 : vector<1x32xf32> to vector<128x32xf32>
    %64 = arith.mulf %62, %63 : vector<128x32xf32>
    %65 = vector.broadcast %44 : vector<1x32xf32> to vector<128x32xf32>
    %66 = arith.addf %64, %65 : vector<128x32xf32>
    %67 = math.tanh %66 : vector<128x32xf32>
    %c0_30 = arith.constant 0 : index
    %c0_31 = arith.constant 0 : index
    %68 = vector.load %arg11[%c0_30, %c0_31] : memref<1x32xf32, #tpu.memory_space<vmem>>, vector<1x32xf32>
    %c0_32 = arith.constant 0 : index
    %c0_33 = arith.constant 0 : index
    %69 = vector.load %arg12[%c0_32, %c0_33] : memref<1x1xf32, #tpu.memory_space<vmem>>, vector<1x1xf32>
    %70 = vector.broadcast %68 : vector<1x32xf32> to vector<128x32xf32>
    %71 = arith.mulf %67, %70 : vector<128x32xf32>
    %cst_34 = arith.constant dense<0.000000e+00> : vector<128xf32>
    %72 = vector.multi_reduction <add>, %71, %cst_34 [1] : vector<128x32xf32> to vector<128xf32>
    %73 = vector.shape_cast %72 : vector<128xf32> to vector<128x1xf32>
    %74 = vector.broadcast %69 : vector<1x1xf32> to vector<128x1xf32>
    %75 = arith.addf %73, %74 : vector<128x1xf32>
    %76 = arith.negf %75 : vector<128x1xf32>
    %77 = math.exp %76 : vector<128x1xf32>
    %cst_35 = arith.constant 1.000000e+00 : f32
    %78 = vector.broadcast %cst_35 : f32 to vector<128x1xf32>
    %79 = arith.addf %78, %77 : vector<128x1xf32>
    %80 = arith.divf %78, %79 : vector<128x1xf32>
    %81 = arith.extf %0 : vector<128x32xbf16> to vector<128x32xf32>
    %82 = vector.broadcast %80 : vector<128x1xf32> to vector<128x32xf32>
    %83 = arith.mulf %82, %81 : vector<128x32xf32>
    %84 = arith.truncf %83 : vector<128x32xf32> to vector<128x32xbf16>
    %c0_36 = arith.constant 0 : index
    %c0_37 = arith.constant 0 : index
    %85 = vector.load %arg13[%c0_36, %c0_37] : memref<128x32xbf16, #tpu.memory_space<vmem>>, vector<128x32xbf16>
    tpu.vector_store %arg13[%c0_36, %c0_37], %84 {strides = array<i32>} : memref<128x32xbf16, #tpu.memory_space<vmem>>, vector<128x32xbf16>,
    %86 = arith.extf %1 : vector<128x32xbf16> to vector<128x32xf32>
    %87 = vector.broadcast %80 : vector<128x1xf32> to vector<128x32xf32>
    %88 = arith.mulf %87, %86 : vector<128x32xf32>
    %89 = arith.truncf %88 : vector<128x32xf32> to vector<128x32xbf16>
    %c0_38 = arith.constant 0 : index
    %c0_39 = arith.constant 0 : index
    %90 = vector.load %arg14[%c0_38, %c0_39] : memref<128x32xbf16, #tpu.memory_space<vmem>>, vector<128x32xbf16>
    tpu.vector_store %arg14[%c0_38, %c0_39], %89 {strides = array<i32>} : memref<128x32xbf16, #tpu.memory_space<vmem>>, vector<128x32xbf16>,
    return
  }
  func.func @transform_0(%arg0: i32) -> (i32, i32) {
    %c0_i32 = arith.constant 0 : i32
    %c0_i32_0 = arith.constant 0 : i32
    return %arg0, %c0_i32 : i32, i32
  }
  func.func @transform_1(%arg0: i32) -> (i32, i32) {
    %c0_i32 = arith.constant 0 : i32
    %c0_i32_0 = arith.constant 0 : i32
    return %arg0, %c0_i32 : i32, i32
  }
  func.func @transform_2(%arg0: i32) -> (i32, i32) {
    %c0_i32 = arith.constant 0 : i32
    %c0_i32_0 = arith.constant 0 : i32
    %c0_i32_1 = arith.constant 0 : i32
    return %c0_i32, %c0_i32_0 : i32, i32
  }
  func.func @transform_3(%arg0: i32) -> (i32, i32) {
    %c0_i32 = arith.constant 0 : i32
    %c0_i32_0 = arith.constant 0 : i32
    %c0_i32_1 = arith.constant 0 : i32
    return %c0_i32, %c0_i32_0 : i32, i32
  }
  func.func @transform_4(%arg0: i32) -> (i32, i32) {
    %c0_i32 = arith.constant 0 : i32
    %c0_i32_0 = arith.constant 0 : i32
    %c0_i32_1 = arith.constant 0 : i32
    return %c0_i32, %c0_i32_0 : i32, i32
  }
  func.func @transform_5(%arg0: i32) -> (i32, i32) {
    %c0_i32 = arith.constant 0 : i32
    %c0_i32_0 = arith.constant 0 : i32
    %c0_i32_1 = arith.constant 0 : i32
    return %c0_i32, %c0_i32_0 : i32, i32
  }
  func.func @transform_6(%arg0: i32) -> (i32, i32) {
    %c0_i32 = arith.constant 0 : i32
    %c0_i32_0 = arith.constant 0 : i32
    %c0_i32_1 = arith.constant 0 : i32
    return %c0_i32, %c0_i32_0 : i32, i32
  }
  func.func @transform_7(%arg0: i32) -> (i32, i32) {
    %c0_i32 = arith.constant 0 : i32
    %c0_i32_0 = arith.constant 0 : i32
    %c0_i32_1 = arith.constant 0 : i32
    return %c0_i32, %c0_i32_0 : i32, i32
  }
  func.func @transform_8(%arg0: i32) -> (i32, i32) {
    %c0_i32 = arith.constant 0 : i32
    %c0_i32_0 = arith.constant 0 : i32
    %c0_i32_1 = arith.constant 0 : i32
    return %c0_i32, %c0_i32_0 : i32, i32
  }
  func.func @transform_9(%arg0: i32) -> (i32, i32) {
    %c0_i32 = arith.constant 0 : i32
    %c0_i32_0 = arith.constant 0 : i32
    %c0_i32_1 = arith.constant 0 : i32
    return %c0_i32, %c0_i32_0 : i32, i32
  }
  func.func @transform_10(%arg0: i32) -> (i32, i32) {
    %c0_i32 = arith.constant 0 : i32
    %c0_i32_0 = arith.constant 0 : i32
    %c0_i32_1 = arith.constant 0 : i32
    return %c0_i32, %c0_i32_0 : i32, i32
  }
  func.func @transform_11(%arg0: i32) -> (i32, i32) {
    %c0_i32 = arith.constant 0 : i32
    %c0_i32_0 = arith.constant 0 : i32
    %c0_i32_1 = arith.constant 0 : i32
    return %c0_i32, %c0_i32_0 : i32, i32
  }
  func.func @transform_12(%arg0: i32) -> (i32, i32) {
    %c0_i32 = arith.constant 0 : i32
    %c0_i32_0 = arith.constant 0 : i32
    return %arg0, %c0_i32 : i32, i32
  }
  func.func @transform_13(%arg0: i32) -> (i32, i32) {
    %c0_i32 = arith.constant 0 : i32
    %c0_i32_0 = arith.constant 0 : i32
    return %arg0, %c0_i32 : i32, i32
  }
}

module attributes {stable_mosaic.version = 11 : i64} {
  func.func @kernel(%arg0: i32, %arg1: i32, %arg2: memref<1x512xi32, #tpu.memory_space<vmem>>, %arg3: memref<1x512xi32, #tpu.memory_space<vmem>>, %arg4: memref<512x32xbf16, #tpu.memory_space<vmem>>, %arg5: memref<512x32xbf16, #tpu.memory_space<vmem>>, %arg6: memref<64x32xbf16, #tpu.memory_space<vmem>>, %arg7: memref<64x32xbf16, #tpu.memory_space<vmem>>, %arg8: memref<64x32xf32, #tpu.memory_space<vmem>>, %arg9: memref<64x32xf32, #tpu.memory_space<vmem>>) attributes {dimension_semantics = [#tpu.dimension_semantics<parallel>, #tpu.dimension_semantics<arbitrary>], iteration_bounds = array<i64: 1, 1>, scalar_prefetch = 0 : i64, scratch_operands = 2 : i64, tpu.core_type = #tpu.core_type<tc>, window_params = [{transform_indices = @transform_0, window_bounds = array<i64: 1, 512>}, {transform_indices = @transform_1, window_bounds = array<i64: 1, 512>}, {transform_indices = @transform_2, window_bounds = array<i64: 512, 32>}, {transform_indices = @transform_3, window_bounds = array<i64: 512, 32>}, {transform_indices = @transform_4, window_bounds = array<i64: 64, 32>}, {transform_indices = @transform_5, window_bounds = array<i64: 64, 32>}]} {
    %c0_i32 = arith.constant 0 : i32
    %0 = arith.cmpi eq, %arg1, %c0_i32 : i32
    %1 = arith.extui %0 : i1 to i32
    %c0_i32_0 = arith.constant 0 : i32
    %2 = arith.cmpi ne, %1, %c0_i32_0 : i32
    scf.if %2 {
      %cst_19 = arith.constant 0.000000e+00 : f32
      %34 = vector.broadcast %cst_19 : f32 to vector<64x32xf32>
      %c0_20 = arith.constant 0 : index
      %c0_21 = arith.constant 0 : index
      %35 = vector.load %arg8[%c0_20, %c0_21] : memref<64x32xf32, #tpu.memory_space<vmem>>, vector<64x32xf32>
      tpu.vector_store %arg8[%c0_20, %c0_21], %34 {strides = array<i32>} : memref<64x32xf32, #tpu.memory_space<vmem>>, vector<64x32xf32>,
      %cst_22 = arith.constant 0.000000e+00 : f32
      %36 = vector.broadcast %cst_22 : f32 to vector<64x32xf32>
      %c0_23 = arith.constant 0 : index
      %c0_24 = arith.constant 0 : index
      %37 = vector.load %arg9[%c0_23, %c0_24] : memref<64x32xf32, #tpu.memory_space<vmem>>, vector<64x32xf32>
      tpu.vector_store %arg9[%c0_23, %c0_24], %36 {strides = array<i32>} : memref<64x32xf32, #tpu.memory_space<vmem>>, vector<64x32xf32>,
    } else {
    }
    %c64_i32 = arith.constant 64 : i32
    %3 = arith.muli %arg0, %c64_i32 : i32
    %4 = tpu.iota {dimensions = array<i32: 0>} : vector<64x1xi32>
    %5 = vector.broadcast %3 : i32 to vector<64x1xi32>
    %6 = arith.addi %4, %5 : vector<64x1xi32>
    %c0 = arith.constant 0 : index
    %c0_1 = arith.constant 0 : index
    %7 = vector.load %arg2[%c0, %c0_1] : memref<1x512xi32, #tpu.memory_space<vmem>>, vector<1x512xi32>
    %c0_2 = arith.constant 0 : index
    %c0_3 = arith.constant 0 : index
    %8 = vector.load %arg3[%c0_2, %c0_3] : memref<1x512xi32, #tpu.memory_space<vmem>>, vector<1x512xi32>
    %9 = vector.broadcast %6 : vector<64x1xi32> to vector<64x512xi32>
    %10 = vector.broadcast %7 : vector<1x512xi32> to vector<64x512xi32>
    %11 = arith.cmpi eq, %9, %10 : vector<64x512xi32>
    %12 = arith.extui %11 : vector<64x512xi1> to vector<64x512xi32>
    %13 = arith.sitofp %12 : vector<64x512xi32> to vector<64x512xf32>
    %14 = arith.truncf %13 : vector<64x512xf32> to vector<64x512xbf16>
    %15 = vector.broadcast %6 : vector<64x1xi32> to vector<64x512xi32>
    %16 = vector.broadcast %8 : vector<1x512xi32> to vector<64x512xi32>
    %17 = arith.cmpi eq, %15, %16 : vector<64x512xi32>
    %18 = arith.extui %17 : vector<64x512xi1> to vector<64x512xi32>
    %19 = arith.sitofp %18 : vector<64x512xi32> to vector<64x512xf32>
    %20 = arith.truncf %19 : vector<64x512xf32> to vector<64x512xbf16>
    %c0_4 = arith.constant 0 : index
    %c0_5 = arith.constant 0 : index
    %21 = vector.load %arg4[%c0_4, %c0_5] : memref<512x32xbf16, #tpu.memory_space<vmem>>, vector<512x32xbf16>
    %c0_6 = arith.constant 0 : index
    %c0_7 = arith.constant 0 : index
    %22 = vector.load %arg5[%c0_6, %c0_7] : memref<512x32xbf16, #tpu.memory_space<vmem>>, vector<512x32xbf16>
    %c0_8 = arith.constant 0 : index
    %c0_9 = arith.constant 0 : index
    %23 = vector.load %arg8[%c0_8, %c0_9] : memref<64x32xf32, #tpu.memory_space<vmem>>, vector<64x32xf32>
    %cst = arith.constant dense<0.000000e+00> : vector<64x32xf32>
    %24 = tpu.matmul %14, %21, %cst {dimension_numbers = #tpu.dot_dimension_numbers<[1], [0], [0], [1], [0, 0, 1, 1], [], []>} : vector<64x512xbf16>, vector<512x32xbf16>, vector<64x32xf32> -> vector<64x32xf32>
    %25 = arith.addf %23, %24 : vector<64x32xf32>
    %c0_10 = arith.constant 0 : index
    %c0_11 = arith.constant 0 : index
    %26 = vector.load %arg8[%c0_10, %c0_11] : memref<64x32xf32, #tpu.memory_space<vmem>>, vector<64x32xf32>
    tpu.vector_store %arg8[%c0_10, %c0_11], %25 {strides = array<i32>} : memref<64x32xf32, #tpu.memory_space<vmem>>, vector<64x32xf32>,
    %c0_12 = arith.constant 0 : index
    %c0_13 = arith.constant 0 : index
    %27 = vector.load %arg9[%c0_12, %c0_13] : memref<64x32xf32, #tpu.memory_space<vmem>>, vector<64x32xf32>
    %cst_14 = arith.constant dense<0.000000e+00> : vector<64x32xf32>
    %28 = tpu.matmul %20, %22, %cst_14 {dimension_numbers = #tpu.dot_dimension_numbers<[1], [0], [0], [1], [0, 0, 1, 1], [], []>} : vector<64x512xbf16>, vector<512x32xbf16>, vector<64x32xf32> -> vector<64x32xf32>
    %29 = arith.addf %27, %28 : vector<64x32xf32>
    %c0_15 = arith.constant 0 : index
    %c0_16 = arith.constant 0 : index
    %30 = vector.load %arg9[%c0_15, %c0_16] : memref<64x32xf32, #tpu.memory_space<vmem>>, vector<64x32xf32>
    tpu.vector_store %arg9[%c0_15, %c0_16], %29 {strides = array<i32>} : memref<64x32xf32, #tpu.memory_space<vmem>>, vector<64x32xf32>,
    %c0_i32_17 = arith.constant 0 : i32
    %31 = arith.cmpi eq, %arg1, %c0_i32_17 : i32
    %32 = arith.extui %31 : i1 to i32
    %c0_i32_18 = arith.constant 0 : i32
    %33 = arith.cmpi ne, %32, %c0_i32_18 : i32
    scf.if %33 {
      %c0_19 = arith.constant 0 : index
      %c0_20 = arith.constant 0 : index
      %34 = vector.load %arg8[%c0_19, %c0_20] : memref<64x32xf32, #tpu.memory_space<vmem>>, vector<64x32xf32>
      %35 = arith.truncf %34 : vector<64x32xf32> to vector<64x32xbf16>
      %c0_21 = arith.constant 0 : index
      %c0_22 = arith.constant 0 : index
      %36 = vector.load %arg6[%c0_21, %c0_22] : memref<64x32xbf16, #tpu.memory_space<vmem>>, vector<64x32xbf16>
      tpu.vector_store %arg6[%c0_21, %c0_22], %35 {strides = array<i32>} : memref<64x32xbf16, #tpu.memory_space<vmem>>, vector<64x32xbf16>,
      %c0_23 = arith.constant 0 : index
      %c0_24 = arith.constant 0 : index
      %37 = vector.load %arg9[%c0_23, %c0_24] : memref<64x32xf32, #tpu.memory_space<vmem>>, vector<64x32xf32>
      %38 = arith.truncf %37 : vector<64x32xf32> to vector<64x32xbf16>
      %c0_25 = arith.constant 0 : index
      %c0_26 = arith.constant 0 : index
      %39 = vector.load %arg7[%c0_25, %c0_26] : memref<64x32xbf16, #tpu.memory_space<vmem>>, vector<64x32xbf16>
      tpu.vector_store %arg7[%c0_25, %c0_26], %38 {strides = array<i32>} : memref<64x32xbf16, #tpu.memory_space<vmem>>, vector<64x32xbf16>,
    } else {
    }
    return
  }
  func.func @transform_0(%arg0: i32, %arg1: i32) -> (i32, i32) {
    %c0_i32 = arith.constant 0 : i32
    %c0_i32_0 = arith.constant 0 : i32
    return %c0_i32, %arg1 : i32, i32
  }
  func.func @transform_1(%arg0: i32, %arg1: i32) -> (i32, i32) {
    %c0_i32 = arith.constant 0 : i32
    %c0_i32_0 = arith.constant 0 : i32
    return %c0_i32, %arg1 : i32, i32
  }
  func.func @transform_2(%arg0: i32, %arg1: i32) -> (i32, i32) {
    %c0_i32 = arith.constant 0 : i32
    %c0_i32_0 = arith.constant 0 : i32
    return %arg1, %c0_i32 : i32, i32
  }
  func.func @transform_3(%arg0: i32, %arg1: i32) -> (i32, i32) {
    %c0_i32 = arith.constant 0 : i32
    %c0_i32_0 = arith.constant 0 : i32
    return %arg1, %c0_i32 : i32, i32
  }
  func.func @transform_4(%arg0: i32, %arg1: i32) -> (i32, i32) {
    %c0_i32 = arith.constant 0 : i32
    %c0_i32_0 = arith.constant 0 : i32
    return %arg0, %c0_i32 : i32, i32
  }
  func.func @transform_5(%arg0: i32, %arg1: i32) -> (i32, i32) {
    %c0_i32 = arith.constant 0 : i32
    %c0_i32_0 = arith.constant 0 : i32
    return %arg0, %c0_i32 : i32, i32
  }
}

module attributes {stable_mosaic.version = 11 : i64} {
  func.func @kernel(%arg0: i32, %arg1: memref<64x32xbf16, #tpu.memory_space<vmem>>, %arg2: memref<64x32xbf16, #tpu.memory_space<vmem>>, %arg3: memref<64x32xbf16, #tpu.memory_space<vmem>>, %arg4: memref<96x32xf32, #tpu.memory_space<vmem>>, %arg5: memref<1x32xf32, #tpu.memory_space<vmem>>, %arg6: memref<1x32xf32, #tpu.memory_space<vmem>>, %arg7: memref<1x32xf32, #tpu.memory_space<vmem>>, %arg8: memref<32x32xf32, #tpu.memory_space<vmem>>, %arg9: memref<1x32xf32, #tpu.memory_space<vmem>>, %arg10: memref<1x32xf32, #tpu.memory_space<vmem>>, %arg11: memref<1x32xf32, #tpu.memory_space<vmem>>, %arg12: memref<32x32xf32, #tpu.memory_space<vmem>>, %arg13: memref<1x32xf32, #tpu.memory_space<vmem>>, %arg14: memref<1x32xf32, #tpu.memory_space<vmem>>, %arg15: memref<1x32xf32, #tpu.memory_space<vmem>>, %arg16: memref<64x32xbf16, #tpu.memory_space<vmem>>) attributes {dimension_semantics = [#tpu.dimension_semantics<parallel>], iteration_bounds = array<i64: 1>, scalar_prefetch = 0 : i64, scratch_operands = 0 : i64, tpu.core_type = #tpu.core_type<tc>, window_params = [{transform_indices = @transform_0, window_bounds = array<i64: 64, 32>}, {transform_indices = @transform_1, window_bounds = array<i64: 64, 32>}, {transform_indices = @transform_2, window_bounds = array<i64: 64, 32>}, {pipeline_mode = #tpu.pipeline_mode<synchronous>, transform_indices = @transform_3, window_bounds = array<i64: 96, 32>}, {pipeline_mode = #tpu.pipeline_mode<synchronous>, transform_indices = @transform_4, window_bounds = array<i64: 1, 32>}, {pipeline_mode = #tpu.pipeline_mode<synchronous>, transform_indices = @transform_5, window_bounds = array<i64: 1, 32>}, {pipeline_mode = #tpu.pipeline_mode<synchronous>, transform_indices = @transform_6, window_bounds = array<i64: 1, 32>}, {pipeline_mode = #tpu.pipeline_mode<synchronous>, transform_indices = @transform_7, window_bounds = array<i64: 32, 32>}, {pipeline_mode = #tpu.pipeline_mode<synchronous>, transform_indices = @transform_8, window_bounds = array<i64: 1, 32>}, {pipeline_mode = #tpu.pipeline_mode<synchronous>, transform_indices = @transform_9, window_bounds = array<i64: 1, 32>}, {pipeline_mode = #tpu.pipeline_mode<synchronous>, transform_indices = @transform_10, window_bounds = array<i64: 1, 32>}, {pipeline_mode = #tpu.pipeline_mode<synchronous>, transform_indices = @transform_11, window_bounds = array<i64: 32, 32>}, {pipeline_mode = #tpu.pipeline_mode<synchronous>, transform_indices = @transform_12, window_bounds = array<i64: 1, 32>}, {pipeline_mode = #tpu.pipeline_mode<synchronous>, transform_indices = @transform_13, window_bounds = array<i64: 1, 32>}, {pipeline_mode = #tpu.pipeline_mode<synchronous>, transform_indices = @transform_14, window_bounds = array<i64: 1, 32>}, {transform_indices = @transform_15, window_bounds = array<i64: 64, 32>}]} {
    %c0 = arith.constant 0 : index
    %c0_0 = arith.constant 0 : index
    %0 = vector.load %arg1[%c0, %c0_0] : memref<64x32xbf16, #tpu.memory_space<vmem>>, vector<64x32xbf16>
    %c0_1 = arith.constant 0 : index
    %c0_2 = arith.constant 0 : index
    %1 = vector.load %arg2[%c0_1, %c0_2] : memref<64x32xbf16, #tpu.memory_space<vmem>>, vector<64x32xbf16>
    %c0_3 = arith.constant 0 : index
    %c0_4 = arith.constant 0 : index
    %2 = vector.load %arg3[%c0_3, %c0_4] : memref<64x32xbf16, #tpu.memory_space<vmem>>, vector<64x32xbf16>
    %3 = tpu.concatenate %0, %1, %2 in 1 : vector<64x32xbf16>, vector<64x32xbf16>, vector<64x32xbf16> -> vector<64x96xbf16>
    %4 = arith.extf %3 : vector<64x96xbf16> to vector<64x96xf32>
    %c0_5 = arith.constant 0 : index
    %c0_6 = arith.constant 0 : index
    %5 = vector.load %arg4[%c0_5, %c0_6] : memref<96x32xf32, #tpu.memory_space<vmem>>, vector<96x32xf32>
    %c0_7 = arith.constant 0 : index
    %c0_8 = arith.constant 0 : index
    %6 = vector.load %arg5[%c0_7, %c0_8] : memref<1x32xf32, #tpu.memory_space<vmem>>, vector<1x32xf32>
    %7 = arith.truncf %4 : vector<64x96xf32> to vector<64x96xbf16>
    %8 = arith.truncf %5 : vector<96x32xf32> to vector<96x32xbf16>
    %cst = arith.constant dense<0.000000e+00> : vector<64x32xf32>
    %9 = tpu.matmul %7, %8, %cst {dimension_numbers = #tpu.dot_dimension_numbers<[1], [0], [0], [1], [0, 0, 1, 1], [], []>} : vector<64x96xbf16>, vector<96x32xbf16>, vector<64x32xf32> -> vector<64x32xf32>
    %10 = vector.broadcast %6 : vector<1x32xf32> to vector<64x32xf32>
    %11 = arith.addf %9, %10 : vector<64x32xf32>
    %c0_9 = arith.constant 0 : index
    %c0_10 = arith.constant 0 : index
    %12 = vector.load %arg6[%c0_9, %c0_10] : memref<1x32xf32, #tpu.memory_space<vmem>>, vector<1x32xf32>
    %c0_11 = arith.constant 0 : index
    %c0_12 = arith.constant 0 : index
    %13 = vector.load %arg7[%c0_11, %c0_12] : memref<1x32xf32, #tpu.memory_space<vmem>>, vector<1x32xf32>
    %cst_13 = arith.constant dense<0.000000e+00> : vector<64xf32>
    %14 = vector.multi_reduction <add>, %11, %cst_13 [1] : vector<64x32xf32> to vector<64xf32>
    %15 = vector.shape_cast %14 : vector<64xf32> to vector<64x1xf32>
    %cst_14 = arith.constant 3.200000e+01 : f32
    %16 = vector.broadcast %cst_14 : f32 to vector<64x1xf32>
    %17 = arith.divf %15, %16 : vector<64x1xf32>
    %18 = vector.broadcast %17 : vector<64x1xf32> to vector<64x32xf32>
    %19 = arith.subf %11, %18 : vector<64x32xf32>
    %20 = arith.mulf %19, %19 : vector<64x32xf32>
    %cst_15 = arith.constant dense<0.000000e+00> : vector<64xf32>
    %21 = vector.multi_reduction <add>, %20, %cst_15 [1] : vector<64x32xf32> to vector<64xf32>
    %22 = vector.shape_cast %21 : vector<64xf32> to vector<64x1xf32>
    %cst_16 = arith.constant 3.200000e+01 : f32
    %23 = vector.broadcast %cst_16 : f32 to vector<64x1xf32>
    %24 = arith.divf %22, %23 : vector<64x1xf32>
    %25 = vector.broadcast %17 : vector<64x1xf32> to vector<64x32xf32>
    %26 = arith.subf %11, %25 : vector<64x32xf32>
    %cst_17 = arith.constant 9.99999974E-6 : f32
    %27 = vector.broadcast %cst_17 : f32 to vector<64x1xf32>
    %28 = arith.addf %24, %27 : vector<64x1xf32>
    %29 = math.rsqrt %28 : vector<64x1xf32>
    %30 = vector.broadcast %29 : vector<64x1xf32> to vector<64x32xf32>
    %31 = arith.mulf %26, %30 : vector<64x32xf32>
    %32 = vector.broadcast %12 : vector<1x32xf32> to vector<64x32xf32>
    %33 = arith.mulf %31, %32 : vector<64x32xf32>
    %34 = vector.broadcast %13 : vector<1x32xf32> to vector<64x32xf32>
    %35 = arith.addf %33, %34 : vector<64x32xf32>
    %36 = math.tanh %35 : vector<64x32xf32>
    %c0_18 = arith.constant 0 : index
    %c0_19 = arith.constant 0 : index
    %37 = vector.load %arg8[%c0_18, %c0_19] : memref<32x32xf32, #tpu.memory_space<vmem>>, vector<32x32xf32>
    %c0_20 = arith.constant 0 : index
    %c0_21 = arith.constant 0 : index
    %38 = vector.load %arg9[%c0_20, %c0_21] : memref<1x32xf32, #tpu.memory_space<vmem>>, vector<1x32xf32>
    %39 = arith.truncf %36 : vector<64x32xf32> to vector<64x32xbf16>
    %40 = arith.truncf %37 : vector<32x32xf32> to vector<32x32xbf16>
    %cst_22 = arith.constant dense<0.000000e+00> : vector<64x32xf32>
    %41 = tpu.matmul %39, %40, %cst_22 {dimension_numbers = #tpu.dot_dimension_numbers<[1], [0], [0], [1], [0, 0, 1, 1], [], []>} : vector<64x32xbf16>, vector<32x32xbf16>, vector<64x32xf32> -> vector<64x32xf32>
    %42 = vector.broadcast %38 : vector<1x32xf32> to vector<64x32xf32>
    %43 = arith.addf %41, %42 : vector<64x32xf32>
    %c0_23 = arith.constant 0 : index
    %c0_24 = arith.constant 0 : index
    %44 = vector.load %arg10[%c0_23, %c0_24] : memref<1x32xf32, #tpu.memory_space<vmem>>, vector<1x32xf32>
    %c0_25 = arith.constant 0 : index
    %c0_26 = arith.constant 0 : index
    %45 = vector.load %arg11[%c0_25, %c0_26] : memref<1x32xf32, #tpu.memory_space<vmem>>, vector<1x32xf32>
    %cst_27 = arith.constant dense<0.000000e+00> : vector<64xf32>
    %46 = vector.multi_reduction <add>, %43, %cst_27 [1] : vector<64x32xf32> to vector<64xf32>
    %47 = vector.shape_cast %46 : vector<64xf32> to vector<64x1xf32>
    %cst_28 = arith.constant 3.200000e+01 : f32
    %48 = vector.broadcast %cst_28 : f32 to vector<64x1xf32>
    %49 = arith.divf %47, %48 : vector<64x1xf32>
    %50 = vector.broadcast %49 : vector<64x1xf32> to vector<64x32xf32>
    %51 = arith.subf %43, %50 : vector<64x32xf32>
    %52 = arith.mulf %51, %51 : vector<64x32xf32>
    %cst_29 = arith.constant dense<0.000000e+00> : vector<64xf32>
    %53 = vector.multi_reduction <add>, %52, %cst_29 [1] : vector<64x32xf32> to vector<64xf32>
    %54 = vector.shape_cast %53 : vector<64xf32> to vector<64x1xf32>
    %cst_30 = arith.constant 3.200000e+01 : f32
    %55 = vector.broadcast %cst_30 : f32 to vector<64x1xf32>
    %56 = arith.divf %54, %55 : vector<64x1xf32>
    %57 = vector.broadcast %49 : vector<64x1xf32> to vector<64x32xf32>
    %58 = arith.subf %43, %57 : vector<64x32xf32>
    %cst_31 = arith.constant 9.99999974E-6 : f32
    %59 = vector.broadcast %cst_31 : f32 to vector<64x1xf32>
    %60 = arith.addf %56, %59 : vector<64x1xf32>
    %61 = math.rsqrt %60 : vector<64x1xf32>
    %62 = vector.broadcast %61 : vector<64x1xf32> to vector<64x32xf32>
    %63 = arith.mulf %58, %62 : vector<64x32xf32>
    %64 = vector.broadcast %44 : vector<1x32xf32> to vector<64x32xf32>
    %65 = arith.mulf %63, %64 : vector<64x32xf32>
    %66 = vector.broadcast %45 : vector<1x32xf32> to vector<64x32xf32>
    %67 = arith.addf %65, %66 : vector<64x32xf32>
    %68 = math.tanh %67 : vector<64x32xf32>
    %c0_32 = arith.constant 0 : index
    %c0_33 = arith.constant 0 : index
    %69 = vector.load %arg12[%c0_32, %c0_33] : memref<32x32xf32, #tpu.memory_space<vmem>>, vector<32x32xf32>
    %c0_34 = arith.constant 0 : index
    %c0_35 = arith.constant 0 : index
    %70 = vector.load %arg13[%c0_34, %c0_35] : memref<1x32xf32, #tpu.memory_space<vmem>>, vector<1x32xf32>
    %71 = arith.truncf %68 : vector<64x32xf32> to vector<64x32xbf16>
    %72 = arith.truncf %69 : vector<32x32xf32> to vector<32x32xbf16>
    %cst_36 = arith.constant dense<0.000000e+00> : vector<64x32xf32>
    %73 = tpu.matmul %71, %72, %cst_36 {dimension_numbers = #tpu.dot_dimension_numbers<[1], [0], [0], [1], [0, 0, 1, 1], [], []>} : vector<64x32xbf16>, vector<32x32xbf16>, vector<64x32xf32> -> vector<64x32xf32>
    %74 = vector.broadcast %70 : vector<1x32xf32> to vector<64x32xf32>
    %75 = arith.addf %73, %74 : vector<64x32xf32>
    %c0_37 = arith.constant 0 : index
    %c0_38 = arith.constant 0 : index
    %76 = vector.load %arg14[%c0_37, %c0_38] : memref<1x32xf32, #tpu.memory_space<vmem>>, vector<1x32xf32>
    %c0_39 = arith.constant 0 : index
    %c0_40 = arith.constant 0 : index
    %77 = vector.load %arg15[%c0_39, %c0_40] : memref<1x32xf32, #tpu.memory_space<vmem>>, vector<1x32xf32>
    %cst_41 = arith.constant dense<0.000000e+00> : vector<64xf32>
    %78 = vector.multi_reduction <add>, %75, %cst_41 [1] : vector<64x32xf32> to vector<64xf32>
    %79 = vector.shape_cast %78 : vector<64xf32> to vector<64x1xf32>
    %cst_42 = arith.constant 3.200000e+01 : f32
    %80 = vector.broadcast %cst_42 : f32 to vector<64x1xf32>
    %81 = arith.divf %79, %80 : vector<64x1xf32>
    %82 = vector.broadcast %81 : vector<64x1xf32> to vector<64x32xf32>
    %83 = arith.subf %75, %82 : vector<64x32xf32>
    %84 = arith.mulf %83, %83 : vector<64x32xf32>
    %cst_43 = arith.constant dense<0.000000e+00> : vector<64xf32>
    %85 = vector.multi_reduction <add>, %84, %cst_43 [1] : vector<64x32xf32> to vector<64xf32>
    %86 = vector.shape_cast %85 : vector<64xf32> to vector<64x1xf32>
    %cst_44 = arith.constant 3.200000e+01 : f32
    %87 = vector.broadcast %cst_44 : f32 to vector<64x1xf32>
    %88 = arith.divf %86, %87 : vector<64x1xf32>
    %89 = vector.broadcast %81 : vector<64x1xf32> to vector<64x32xf32>
    %90 = arith.subf %75, %89 : vector<64x32xf32>
    %cst_45 = arith.constant 9.99999974E-6 : f32
    %91 = vector.broadcast %cst_45 : f32 to vector<64x1xf32>
    %92 = arith.addf %88, %91 : vector<64x1xf32>
    %93 = math.rsqrt %92 : vector<64x1xf32>
    %94 = vector.broadcast %93 : vector<64x1xf32> to vector<64x32xf32>
    %95 = arith.mulf %90, %94 : vector<64x32xf32>
    %96 = vector.broadcast %76 : vector<1x32xf32> to vector<64x32xf32>
    %97 = arith.mulf %95, %96 : vector<64x32xf32>
    %98 = vector.broadcast %77 : vector<1x32xf32> to vector<64x32xf32>
    %99 = arith.addf %97, %98 : vector<64x32xf32>
    %100 = math.tanh %99 : vector<64x32xf32>
    %101 = arith.extf %2 : vector<64x32xbf16> to vector<64x32xf32>
    %102 = arith.addf %100, %101 : vector<64x32xf32>
    %103 = arith.truncf %102 : vector<64x32xf32> to vector<64x32xbf16>
    %c0_46 = arith.constant 0 : index
    %c0_47 = arith.constant 0 : index
    %104 = vector.load %arg16[%c0_46, %c0_47] : memref<64x32xbf16, #tpu.memory_space<vmem>>, vector<64x32xbf16>
    tpu.vector_store %arg16[%c0_46, %c0_47], %103 {strides = array<i32>} : memref<64x32xbf16, #tpu.memory_space<vmem>>, vector<64x32xbf16>,
    return
  }
  func.func @transform_0(%arg0: i32) -> (i32, i32) {
    %c0_i32 = arith.constant 0 : i32
    %c0_i32_0 = arith.constant 0 : i32
    return %arg0, %c0_i32 : i32, i32
  }
  func.func @transform_1(%arg0: i32) -> (i32, i32) {
    %c0_i32 = arith.constant 0 : i32
    %c0_i32_0 = arith.constant 0 : i32
    return %arg0, %c0_i32 : i32, i32
  }
  func.func @transform_2(%arg0: i32) -> (i32, i32) {
    %c0_i32 = arith.constant 0 : i32
    %c0_i32_0 = arith.constant 0 : i32
    return %arg0, %c0_i32 : i32, i32
  }
  func.func @transform_3(%arg0: i32) -> (i32, i32) {
    %c0_i32 = arith.constant 0 : i32
    %c0_i32_0 = arith.constant 0 : i32
    %c0_i32_1 = arith.constant 0 : i32
    return %c0_i32, %c0_i32_0 : i32, i32
  }
  func.func @transform_4(%arg0: i32) -> (i32, i32) {
    %c0_i32 = arith.constant 0 : i32
    %c0_i32_0 = arith.constant 0 : i32
    %c0_i32_1 = arith.constant 0 : i32
    return %c0_i32, %c0_i32_0 : i32, i32
  }
  func.func @transform_5(%arg0: i32) -> (i32, i32) {
    %c0_i32 = arith.constant 0 : i32
    %c0_i32_0 = arith.constant 0 : i32
    %c0_i32_1 = arith.constant 0 : i32
    return %c0_i32, %c0_i32_0 : i32, i32
  }
  func.func @transform_6(%arg0: i32) -> (i32, i32) {
    %c0_i32 = arith.constant 0 : i32
    %c0_i32_0 = arith.constant 0 : i32
    %c0_i32_1 = arith.constant 0 : i32
    return %c0_i32, %c0_i32_0 : i32, i32
  }
  func.func @transform_7(%arg0: i32) -> (i32, i32) {
    %c0_i32 = arith.constant 0 : i32
    %c0_i32_0 = arith.constant 0 : i32
    %c0_i32_1 = arith.constant 0 : i32
    return %c0_i32, %c0_i32_0 : i32, i32
  }
  func.func @transform_8(%arg0: i32) -> (i32, i32) {
    %c0_i32 = arith.constant 0 : i32
    %c0_i32_0 = arith.constant 0 : i32
    %c0_i32_1 = arith.constant 0 : i32
    return %c0_i32, %c0_i32_0 : i32, i32
  }
  func.func @transform_9(%arg0: i32) -> (i32, i32) {
    %c0_i32 = arith.constant 0 : i32
    %c0_i32_0 = arith.constant 0 : i32
    %c0_i32_1 = arith.constant 0 : i32
    return %c0_i32, %c0_i32_0 : i32, i32
  }
  func.func @transform_10(%arg0: i32) -> (i32, i32) {
    %c0_i32 = arith.constant 0 : i32
    %c0_i32_0 = arith.constant 0 : i32
    %c0_i32_1 = arith.constant 0 : i32
    return %c0_i32, %c0_i32_0 : i32, i32
  }
  func.func @transform_11(%arg0: i32) -> (i32, i32) {
    %c0_i32 = arith.constant 0 : i32
    %c0_i32_0 = arith.constant 0 : i32
    %c0_i32_1 = arith.constant 0 : i32
    return %c0_i32, %c0_i32_0 : i32, i32
  }
  func.func @transform_12(%arg0: i32) -> (i32, i32) {
    %c0_i32 = arith.constant 0 : i32
    %c0_i32_0 = arith.constant 0 : i32
    %c0_i32_1 = arith.constant 0 : i32
    return %c0_i32, %c0_i32_0 : i32, i32
  }
  func.func @transform_13(%arg0: i32) -> (i32, i32) {
    %c0_i32 = arith.constant 0 : i32
    %c0_i32_0 = arith.constant 0 : i32
    %c0_i32_1 = arith.constant 0 : i32
    return %c0_i32, %c0_i32_0 : i32, i32
  }
  func.func @transform_14(%arg0: i32) -> (i32, i32) {
    %c0_i32 = arith.constant 0 : i32
    %c0_i32_0 = arith.constant 0 : i32
    %c0_i32_1 = arith.constant 0 : i32
    return %c0_i32, %c0_i32_0 : i32, i32
  }
  func.func @transform_15(%arg0: i32) -> (i32, i32) {
    %c0_i32 = arith.constant 0 : i32
    %c0_i32_0 = arith.constant 0 : i32
    return %arg0, %c0_i32 : i32, i32
  }
}

module attributes {stable_mosaic.version = 11 : i64} {
  func.func @_segsum_kernel(%arg0: i32, %arg1: memref<1x64xi32, #tpu.memory_space<vmem>>, %arg2: memref<64x32xbf16, #tpu.memory_space<vmem>>, %arg3: memref<8x32xf32, #tpu.memory_space<vmem>>, %arg4: memref<8x32xf32, #tpu.memory_space<vmem>>) attributes {dimension_semantics = [#tpu.dimension_semantics<arbitrary>], iteration_bounds = array<i64: 1>, scalar_prefetch = 0 : i64, scratch_operands = 1 : i64, tpu.core_type = #tpu.core_type<tc>, window_params = [{transform_indices = @transform_0, window_bounds = array<i64: 1, 64>}, {transform_indices = @transform_1, window_bounds = array<i64: 64, 32>}, {pipeline_mode = #tpu.pipeline_mode<synchronous>, transform_indices = @transform_2, window_bounds = array<i64: 8, 32>}]} {
    %c0_i32 = arith.constant 0 : i32
    %0 = arith.cmpi eq, %arg0, %c0_i32 : i32
    %1 = arith.extui %0 : i1 to i32
    %c0_i32_0 = arith.constant 0 : i32
    %2 = arith.cmpi ne, %1, %c0_i32_0 : i32
    scf.if %2 {
      %cst_10 = arith.constant 0.000000e+00 : f32
      %19 = vector.broadcast %cst_10 : f32 to vector<8x32xf32>
      %c0_11 = arith.constant 0 : index
      %c0_12 = arith.constant 0 : index
      %20 = vector.load %arg4[%c0_11, %c0_12] : memref<8x32xf32, #tpu.memory_space<vmem>>, vector<8x32xf32>
      tpu.vector_store %arg4[%c0_11, %c0_12], %19 {strides = array<i32>} : memref<8x32xf32, #tpu.memory_space<vmem>>, vector<8x32xf32>,
    } else {
    }
    %3 = tpu.iota {dimensions = array<i32: 0>} : vector<8x1xi32>
    %c0 = arith.constant 0 : index
    %c0_1 = arith.constant 0 : index
    %4 = vector.load %arg1[%c0, %c0_1] : memref<1x64xi32, #tpu.memory_space<vmem>>, vector<1x64xi32>
    %5 = vector.broadcast %3 : vector<8x1xi32> to vector<8x64xi32>
    %6 = vector.broadcast %4 : vector<1x64xi32> to vector<8x64xi32>
    %7 = arith.cmpi eq, %5, %6 : vector<8x64xi32>
    %8 = arith.extui %7 : vector<8x64xi1> to vector<8x64xi32>
    %9 = arith.sitofp %8 : vector<8x64xi32> to vector<8x64xf32>
    %10 = arith.truncf %9 : vector<8x64xf32> to vector<8x64xbf16>
    %c0_2 = arith.constant 0 : index
    %c0_3 = arith.constant 0 : index
    %11 = vector.load %arg4[%c0_2, %c0_3] : memref<8x32xf32, #tpu.memory_space<vmem>>, vector<8x32xf32>
    %c0_4 = arith.constant 0 : index
    %c0_5 = arith.constant 0 : index
    %12 = vector.load %arg2[%c0_4, %c0_5] : memref<64x32xbf16, #tpu.memory_space<vmem>>, vector<64x32xbf16>
    %cst = arith.constant dense<0.000000e+00> : vector<8x32xf32>
    %13 = tpu.matmul %10, %12, %cst {dimension_numbers = #tpu.dot_dimension_numbers<[1], [0], [0], [1], [0, 0, 1, 1], [], []>} : vector<8x64xbf16>, vector<64x32xbf16>, vector<8x32xf32> -> vector<8x32xf32>
    %14 = arith.addf %11, %13 : vector<8x32xf32>
    %c0_6 = arith.constant 0 : index
    %c0_7 = arith.constant 0 : index
    %15 = vector.load %arg4[%c0_6, %c0_7] : memref<8x32xf32, #tpu.memory_space<vmem>>, vector<8x32xf32>
    tpu.vector_store %arg4[%c0_6, %c0_7], %14 {strides = array<i32>} : memref<8x32xf32, #tpu.memory_space<vmem>>, vector<8x32xf32>,
    %c0_i32_8 = arith.constant 0 : i32
    %16 = arith.cmpi eq, %arg0, %c0_i32_8 : i32
    %17 = arith.extui %16 : i1 to i32
    %c0_i32_9 = arith.constant 0 : i32
    %18 = arith.cmpi ne, %17, %c0_i32_9 : i32
    scf.if %18 {
      %c0_10 = arith.constant 0 : index
      %c0_11 = arith.constant 0 : index
      %19 = vector.load %arg4[%c0_10, %c0_11] : memref<8x32xf32, #tpu.memory_space<vmem>>, vector<8x32xf32>
      %c0_12 = arith.constant 0 : index
      %c0_13 = arith.constant 0 : index
      %20 = vector.load %arg3[%c0_12, %c0_13] : memref<8x32xf32, #tpu.memory_space<vmem>>, vector<8x32xf32>
      tpu.vector_store %arg3[%c0_12, %c0_13], %19 {strides = array<i32>} : memref<8x32xf32, #tpu.memory_space<vmem>>, vector<8x32xf32>,
    } else {
    }
    return
  }
  func.func @transform_0(%arg0: i32) -> (i32, i32) {
    %c0_i32 = arith.constant 0 : i32
    %c0_i32_0 = arith.constant 0 : i32
    return %c0_i32, %arg0 : i32, i32
  }
  func.func @transform_1(%arg0: i32) -> (i32, i32) {
    %c0_i32 = arith.constant 0 : i32
    %c0_i32_0 = arith.constant 0 : i32
    return %arg0, %c0_i32 : i32, i32
  }
  func.func @transform_2(%arg0: i32) -> (i32, i32) {
    %c0_i32 = arith.constant 0 : i32
    %c0_i32_0 = arith.constant 0 : i32
    %c0_i32_1 = arith.constant 0 : i32
    return %c0_i32, %c0_i32_0 : i32, i32
  }
}

module attributes {stable_mosaic.version = 11 : i64} {
  func.func @kernel(%arg0: i32, %arg1: memref<8x32xf32, #tpu.memory_space<vmem>>, %arg2: memref<32x32xf32, #tpu.memory_space<vmem>>, %arg3: memref<1x32xf32, #tpu.memory_space<vmem>>, %arg4: memref<1x32xf32, #tpu.memory_space<vmem>>, %arg5: memref<1x32xf32, #tpu.memory_space<vmem>>, %arg6: memref<32x32xf32, #tpu.memory_space<vmem>>, %arg7: memref<1x32xf32, #tpu.memory_space<vmem>>, %arg8: memref<1x32xf32, #tpu.memory_space<vmem>>, %arg9: memref<1x32xf32, #tpu.memory_space<vmem>>, %arg10: memref<32x32xf32, #tpu.memory_space<vmem>>, %arg11: memref<1x32xf32, #tpu.memory_space<vmem>>, %arg12: memref<1x32xf32, #tpu.memory_space<vmem>>, %arg13: memref<1x32xf32, #tpu.memory_space<vmem>>, %arg14: memref<32x3xf32, #tpu.memory_space<vmem>>, %arg15: memref<1x3xf32, #tpu.memory_space<vmem>>, %arg16: memref<8x3xf32, #tpu.memory_space<vmem>>) attributes {dimension_semantics = [#tpu.dimension_semantics<parallel>], iteration_bounds = array<i64: 1>, scalar_prefetch = 0 : i64, scratch_operands = 0 : i64, tpu.core_type = #tpu.core_type<tc>, window_params = [{transform_indices = @transform_0, window_bounds = array<i64: 8, 32>}, {pipeline_mode = #tpu.pipeline_mode<synchronous>, transform_indices = @transform_1, window_bounds = array<i64: 32, 32>}, {pipeline_mode = #tpu.pipeline_mode<synchronous>, transform_indices = @transform_2, window_bounds = array<i64: 1, 32>}, {pipeline_mode = #tpu.pipeline_mode<synchronous>, transform_indices = @transform_3, window_bounds = array<i64: 1, 32>}, {pipeline_mode = #tpu.pipeline_mode<synchronous>, transform_indices = @transform_4, window_bounds = array<i64: 1, 32>}, {pipeline_mode = #tpu.pipeline_mode<synchronous>, transform_indices = @transform_5, window_bounds = array<i64: 32, 32>}, {pipeline_mode = #tpu.pipeline_mode<synchronous>, transform_indices = @transform_6, window_bounds = array<i64: 1, 32>}, {pipeline_mode = #tpu.pipeline_mode<synchronous>, transform_indices = @transform_7, window_bounds = array<i64: 1, 32>}, {pipeline_mode = #tpu.pipeline_mode<synchronous>, transform_indices = @transform_8, window_bounds = array<i64: 1, 32>}, {pipeline_mode = #tpu.pipeline_mode<synchronous>, transform_indices = @transform_9, window_bounds = array<i64: 32, 32>}, {pipeline_mode = #tpu.pipeline_mode<synchronous>, transform_indices = @transform_10, window_bounds = array<i64: 1, 32>}, {pipeline_mode = #tpu.pipeline_mode<synchronous>, transform_indices = @transform_11, window_bounds = array<i64: 1, 32>}, {pipeline_mode = #tpu.pipeline_mode<synchronous>, transform_indices = @transform_12, window_bounds = array<i64: 1, 32>}, {pipeline_mode = #tpu.pipeline_mode<synchronous>, transform_indices = @transform_13, window_bounds = array<i64: 32, 3>}, {pipeline_mode = #tpu.pipeline_mode<synchronous>, transform_indices = @transform_14, window_bounds = array<i64: 1, 3>}, {transform_indices = @transform_15, window_bounds = array<i64: 8, 3>}]} {
    %c0 = arith.constant 0 : index
    %c0_0 = arith.constant 0 : index
    %0 = vector.load %arg1[%c0, %c0_0] : memref<8x32xf32, #tpu.memory_space<vmem>>, vector<8x32xf32>
    %c0_1 = arith.constant 0 : index
    %c0_2 = arith.constant 0 : index
    %1 = vector.load %arg2[%c0_1, %c0_2] : memref<32x32xf32, #tpu.memory_space<vmem>>, vector<32x32xf32>
    %c0_3 = arith.constant 0 : index
    %c0_4 = arith.constant 0 : index
    %2 = vector.load %arg3[%c0_3, %c0_4] : memref<1x32xf32, #tpu.memory_space<vmem>>, vector<1x32xf32>
    %cst = arith.constant dense<0.000000e+00> : vector<8x32xf32>
    %3 = tpu.matmul %0, %1, %cst {dimension_numbers = #tpu.dot_dimension_numbers<[1], [0], [0], [1], [0, 0, 1, 1], [], []>} : vector<8x32xf32>, vector<32x32xf32>, vector<8x32xf32> -> vector<8x32xf32>
    %4 = vector.broadcast %2 : vector<1x32xf32> to vector<8x32xf32>
    %5 = arith.addf %3, %4 : vector<8x32xf32>
    %c0_5 = arith.constant 0 : index
    %c0_6 = arith.constant 0 : index
    %6 = vector.load %arg4[%c0_5, %c0_6] : memref<1x32xf32, #tpu.memory_space<vmem>>, vector<1x32xf32>
    %c0_7 = arith.constant 0 : index
    %c0_8 = arith.constant 0 : index
    %7 = vector.load %arg5[%c0_7, %c0_8] : memref<1x32xf32, #tpu.memory_space<vmem>>, vector<1x32xf32>
    %cst_9 = arith.constant dense<0.000000e+00> : vector<8xf32>
    %8 = vector.multi_reduction <add>, %5, %cst_9 [1] : vector<8x32xf32> to vector<8xf32>
    %9 = vector.shape_cast %8 : vector<8xf32> to vector<8x1xf32>
    %cst_10 = arith.constant 3.200000e+01 : f32
    %10 = vector.broadcast %cst_10 : f32 to vector<8x1xf32>
    %11 = arith.divf %9, %10 : vector<8x1xf32>
    %12 = vector.broadcast %11 : vector<8x1xf32> to vector<8x32xf32>
    %13 = arith.subf %5, %12 : vector<8x32xf32>
    %14 = arith.mulf %13, %13 : vector<8x32xf32>
    %cst_11 = arith.constant dense<0.000000e+00> : vector<8xf32>
    %15 = vector.multi_reduction <add>, %14, %cst_11 [1] : vector<8x32xf32> to vector<8xf32>
    %16 = vector.shape_cast %15 : vector<8xf32> to vector<8x1xf32>
    %cst_12 = arith.constant 3.200000e+01 : f32
    %17 = vector.broadcast %cst_12 : f32 to vector<8x1xf32>
    %18 = arith.divf %16, %17 : vector<8x1xf32>
    %19 = vector.broadcast %11 : vector<8x1xf32> to vector<8x32xf32>
    %20 = arith.subf %5, %19 : vector<8x32xf32>
    %cst_13 = arith.constant 9.99999974E-6 : f32
    %21 = vector.broadcast %cst_13 : f32 to vector<8x1xf32>
    %22 = arith.addf %18, %21 : vector<8x1xf32>
    %23 = math.rsqrt %22 : vector<8x1xf32>
    %24 = vector.broadcast %23 : vector<8x1xf32> to vector<8x32xf32>
    %25 = arith.mulf %20, %24 : vector<8x32xf32>
    %26 = vector.broadcast %6 : vector<1x32xf32> to vector<8x32xf32>
    %27 = arith.mulf %25, %26 : vector<8x32xf32>
    %28 = vector.broadcast %7 : vector<1x32xf32> to vector<8x32xf32>
    %29 = arith.addf %27, %28 : vector<8x32xf32>
    %30 = math.tanh %29 : vector<8x32xf32>
    %c0_14 = arith.constant 0 : index
    %c0_15 = arith.constant 0 : index
    %31 = vector.load %arg6[%c0_14, %c0_15] : memref<32x32xf32, #tpu.memory_space<vmem>>, vector<32x32xf32>
    %c0_16 = arith.constant 0 : index
    %c0_17 = arith.constant 0 : index
    %32 = vector.load %arg7[%c0_16, %c0_17] : memref<1x32xf32, #tpu.memory_space<vmem>>, vector<1x32xf32>
    %cst_18 = arith.constant dense<0.000000e+00> : vector<8x32xf32>
    %33 = tpu.matmul %30, %31, %cst_18 {dimension_numbers = #tpu.dot_dimension_numbers<[1], [0], [0], [1], [0, 0, 1, 1], [], []>} : vector<8x32xf32>, vector<32x32xf32>, vector<8x32xf32> -> vector<8x32xf32>
    %34 = vector.broadcast %32 : vector<1x32xf32> to vector<8x32xf32>
    %35 = arith.addf %33, %34 : vector<8x32xf32>
    %c0_19 = arith.constant 0 : index
    %c0_20 = arith.constant 0 : index
    %36 = vector.load %arg8[%c0_19, %c0_20] : memref<1x32xf32, #tpu.memory_space<vmem>>, vector<1x32xf32>
    %c0_21 = arith.constant 0 : index
    %c0_22 = arith.constant 0 : index
    %37 = vector.load %arg9[%c0_21, %c0_22] : memref<1x32xf32, #tpu.memory_space<vmem>>, vector<1x32xf32>
    %cst_23 = arith.constant dense<0.000000e+00> : vector<8xf32>
    %38 = vector.multi_reduction <add>, %35, %cst_23 [1] : vector<8x32xf32> to vector<8xf32>
    %39 = vector.shape_cast %38 : vector<8xf32> to vector<8x1xf32>
    %cst_24 = arith.constant 3.200000e+01 : f32
    %40 = vector.broadcast %cst_24 : f32 to vector<8x1xf32>
    %41 = arith.divf %39, %40 : vector<8x1xf32>
    %42 = vector.broadcast %41 : vector<8x1xf32> to vector<8x32xf32>
    %43 = arith.subf %35, %42 : vector<8x32xf32>
    %44 = arith.mulf %43, %43 : vector<8x32xf32>
    %cst_25 = arith.constant dense<0.000000e+00> : vector<8xf32>
    %45 = vector.multi_reduction <add>, %44, %cst_25 [1] : vector<8x32xf32> to vector<8xf32>
    %46 = vector.shape_cast %45 : vector<8xf32> to vector<8x1xf32>
    %cst_26 = arith.constant 3.200000e+01 : f32
    %47 = vector.broadcast %cst_26 : f32 to vector<8x1xf32>
    %48 = arith.divf %46, %47 : vector<8x1xf32>
    %49 = vector.broadcast %41 : vector<8x1xf32> to vector<8x32xf32>
    %50 = arith.subf %35, %49 : vector<8x32xf32>
    %cst_27 = arith.constant 9.99999974E-6 : f32
    %51 = vector.broadcast %cst_27 : f32 to vector<8x1xf32>
    %52 = arith.addf %48, %51 : vector<8x1xf32>
    %53 = math.rsqrt %52 : vector<8x1xf32>
    %54 = vector.broadcast %53 : vector<8x1xf32> to vector<8x32xf32>
    %55 = arith.mulf %50, %54 : vector<8x32xf32>
    %56 = vector.broadcast %36 : vector<1x32xf32> to vector<8x32xf32>
    %57 = arith.mulf %55, %56 : vector<8x32xf32>
    %58 = vector.broadcast %37 : vector<1x32xf32> to vector<8x32xf32>
    %59 = arith.addf %57, %58 : vector<8x32xf32>
    %60 = math.tanh %59 : vector<8x32xf32>
    %c0_28 = arith.constant 0 : index
    %c0_29 = arith.constant 0 : index
    %61 = vector.load %arg10[%c0_28, %c0_29] : memref<32x32xf32, #tpu.memory_space<vmem>>, vector<32x32xf32>
    %c0_30 = arith.constant 0 : index
    %c0_31 = arith.constant 0 : index
    %62 = vector.load %arg11[%c0_30, %c0_31] : memref<1x32xf32, #tpu.memory_space<vmem>>, vector<1x32xf32>
    %cst_32 = arith.constant dense<0.000000e+00> : vector<8x32xf32>
    %63 = tpu.matmul %60, %61, %cst_32 {dimension_numbers = #tpu.dot_dimension_numbers<[1], [0], [0], [1], [0, 0, 1, 1], [], []>} : vector<8x32xf32>, vector<32x32xf32>, vector<8x32xf32> -> vector<8x32xf32>
    %64 = vector.broadcast %62 : vector<1x32xf32> to vector<8x32xf32>
    %65 = arith.addf %63, %64 : vector<8x32xf32>
    %c0_33 = arith.constant 0 : index
    %c0_34 = arith.constant 0 : index
    %66 = vector.load %arg12[%c0_33, %c0_34] : memref<1x32xf32, #tpu.memory_space<vmem>>, vector<1x32xf32>
    %c0_35 = arith.constant 0 : index
    %c0_36 = arith.constant 0 : index
    %67 = vector.load %arg13[%c0_35, %c0_36] : memref<1x32xf32, #tpu.memory_space<vmem>>, vector<1x32xf32>
    %cst_37 = arith.constant dense<0.000000e+00> : vector<8xf32>
    %68 = vector.multi_reduction <add>, %65, %cst_37 [1] : vector<8x32xf32> to vector<8xf32>
    %69 = vector.shape_cast %68 : vector<8xf32> to vector<8x1xf32>
    %cst_38 = arith.constant 3.200000e+01 : f32
    %70 = vector.broadcast %cst_38 : f32 to vector<8x1xf32>
    %71 = arith.divf %69, %70 : vector<8x1xf32>
    %72 = vector.broadcast %71 : vector<8x1xf32> to vector<8x32xf32>
    %73 = arith.subf %65, %72 : vector<8x32xf32>
    %74 = arith.mulf %73, %73 : vector<8x32xf32>
    %cst_39 = arith.constant dense<0.000000e+00> : vector<8xf32>
    %75 = vector.multi_reduction <add>, %74, %cst_39 [1] : vector<8x32xf32> to vector<8xf32>
    %76 = vector.shape_cast %75 : vector<8xf32> to vector<8x1xf32>
    %cst_40 = arith.constant 3.200000e+01 : f32
    %77 = vector.broadcast %cst_40 : f32 to vector<8x1xf32>
    %78 = arith.divf %76, %77 : vector<8x1xf32>
    %79 = vector.broadcast %71 : vector<8x1xf32> to vector<8x32xf32>
    %80 = arith.subf %65, %79 : vector<8x32xf32>
    %cst_41 = arith.constant 9.99999974E-6 : f32
    %81 = vector.broadcast %cst_41 : f32 to vector<8x1xf32>
    %82 = arith.addf %78, %81 : vector<8x1xf32>
    %83 = math.rsqrt %82 : vector<8x1xf32>
    %84 = vector.broadcast %83 : vector<8x1xf32> to vector<8x32xf32>
    %85 = arith.mulf %80, %84 : vector<8x32xf32>
    %86 = vector.broadcast %66 : vector<1x32xf32> to vector<8x32xf32>
    %87 = arith.mulf %85, %86 : vector<8x32xf32>
    %88 = vector.broadcast %67 : vector<1x32xf32> to vector<8x32xf32>
    %89 = arith.addf %87, %88 : vector<8x32xf32>
    %90 = math.tanh %89 : vector<8x32xf32>
    %c0_42 = arith.constant 0 : index
    %c0_43 = arith.constant 0 : index
    %91 = vector.load %arg14[%c0_42, %c0_43] : memref<32x3xf32, #tpu.memory_space<vmem>>, vector<32x3xf32>
    %c0_44 = arith.constant 0 : index
    %c0_45 = arith.constant 0 : index
    %92 = vector.load %arg15[%c0_44, %c0_45] : memref<1x3xf32, #tpu.memory_space<vmem>>, vector<1x3xf32>
    %cst_46 = arith.constant dense<0.000000e+00> : vector<8x3xf32>
    %93 = tpu.matmul %90, %91, %cst_46 {dimension_numbers = #tpu.dot_dimension_numbers<[1], [0], [0], [1], [0, 0, 1, 1], [], []>} : vector<8x32xf32>, vector<32x3xf32>, vector<8x3xf32> -> vector<8x3xf32>
    %94 = vector.broadcast %92 : vector<1x3xf32> to vector<8x3xf32>
    %95 = arith.addf %93, %94 : vector<8x3xf32>
    %c0_47 = arith.constant 0 : index
    %c0_48 = arith.constant 0 : index
    %96 = vector.load %arg16[%c0_47, %c0_48] : memref<8x3xf32, #tpu.memory_space<vmem>>, vector<8x3xf32>
    tpu.vector_store %arg16[%c0_47, %c0_48], %95 {strides = array<i32>} : memref<8x3xf32, #tpu.memory_space<vmem>>, vector<8x3xf32>,
    return
  }
  func.func @transform_0(%arg0: i32) -> (i32, i32) {
    %c0_i32 = arith.constant 0 : i32
    %c0_i32_0 = arith.constant 0 : i32
    return %arg0, %c0_i32 : i32, i32
  }
  func.func @transform_1(%arg0: i32) -> (i32, i32) {
    %c0_i32 = arith.constant 0 : i32
    %c0_i32_0 = arith.constant 0 : i32
    %c0_i32_1 = arith.constant 0 : i32
    return %c0_i32, %c0_i32_0 : i32, i32
  }
  func.func @transform_2(%arg0: i32) -> (i32, i32) {
    %c0_i32 = arith.constant 0 : i32
    %c0_i32_0 = arith.constant 0 : i32
    %c0_i32_1 = arith.constant 0 : i32
    return %c0_i32, %c0_i32_0 : i32, i32
  }
  func.func @transform_3(%arg0: i32) -> (i32, i32) {
    %c0_i32 = arith.constant 0 : i32
    %c0_i32_0 = arith.constant 0 : i32
    %c0_i32_1 = arith.constant 0 : i32
    return %c0_i32, %c0_i32_0 : i32, i32
  }
  func.func @transform_4(%arg0: i32) -> (i32, i32) {
    %c0_i32 = arith.constant 0 : i32
    %c0_i32_0 = arith.constant 0 : i32
    %c0_i32_1 = arith.constant 0 : i32
    return %c0_i32, %c0_i32_0 : i32, i32
  }
  func.func @transform_5(%arg0: i32) -> (i32, i32) {
    %c0_i32 = arith.constant 0 : i32
    %c0_i32_0 = arith.constant 0 : i32
    %c0_i32_1 = arith.constant 0 : i32
    return %c0_i32, %c0_i32_0 : i32, i32
  }
  func.func @transform_6(%arg0: i32) -> (i32, i32) {
    %c0_i32 = arith.constant 0 : i32
    %c0_i32_0 = arith.constant 0 : i32
    %c0_i32_1 = arith.constant 0 : i32
    return %c0_i32, %c0_i32_0 : i32, i32
  }
  func.func @transform_7(%arg0: i32) -> (i32, i32) {
    %c0_i32 = arith.constant 0 : i32
    %c0_i32_0 = arith.constant 0 : i32
    %c0_i32_1 = arith.constant 0 : i32
    return %c0_i32, %c0_i32_0 : i32, i32
  }
  func.func @transform_8(%arg0: i32) -> (i32, i32) {
    %c0_i32 = arith.constant 0 : i32
    %c0_i32_0 = arith.constant 0 : i32
    %c0_i32_1 = arith.constant 0 : i32
    return %c0_i32, %c0_i32_0 : i32, i32
  }
  func.func @transform_9(%arg0: i32) -> (i32, i32) {
    %c0_i32 = arith.constant 0 : i32
    %c0_i32_0 = arith.constant 0 : i32
    %c0_i32_1 = arith.constant 0 : i32
    return %c0_i32, %c0_i32_0 : i32, i32
  }
  func.func @transform_10(%arg0: i32) -> (i32, i32) {
    %c0_i32 = arith.constant 0 : i32
    %c0_i32_0 = arith.constant 0 : i32
    %c0_i32_1 = arith.constant 0 : i32
    return %c0_i32, %c0_i32_0 : i32, i32
  }
  func.func @transform_11(%arg0: i32) -> (i32, i32) {
    %c0_i32 = arith.constant 0 : i32
    %c0_i32_0 = arith.constant 0 : i32
    %c0_i32_1 = arith.constant 0 : i32
    return %c0_i32, %c0_i32_0 : i32, i32
  }
  func.func @transform_12(%arg0: i32) -> (i32, i32) {
    %c0_i32 = arith.constant 0 : i32
    %c0_i32_0 = arith.constant 0 : i32
    %c0_i32_1 = arith.constant 0 : i32
    return %c0_i32, %c0_i32_0 : i32, i32
  }
  func.func @transform_13(%arg0: i32) -> (i32, i32) {
    %c0_i32 = arith.constant 0 : i32
    %c0_i32_0 = arith.constant 0 : i32
    %c0_i32_1 = arith.constant 0 : i32
    return %c0_i32, %c0_i32_0 : i32, i32
  }
  func.func @transform_14(%arg0: i32) -> (i32, i32) {
    %c0_i32 = arith.constant 0 : i32
    %c0_i32_0 = arith.constant 0 : i32
    %c0_i32_1 = arith.constant 0 : i32
    return %c0_i32, %c0_i32_0 : i32, i32
  }
  func.func @transform_15(%arg0: i32) -> (i32, i32) {
    %c0_i32 = arith.constant 0 : i32
    %c0_i32_0 = arith.constant 0 : i32
    return %arg0, %c0_i32 : i32, i32
  }
}

</mosaic_0001>

<bundles_post_ra>
// kernel: _lambda_.9
= control target key start
LH: loop header
LB: loop body
LE: loop exit
PB: predicated region body
PF: predicated region fallthrough
CT: control target
= control target key end

     0   :  { %vm55_vm0 = vcmask 1040384   ;;  %vm56_vm1 = vcmask 1041408   ;;  %v389_v1 = vmov 65535   ;;  %vm42_vm2 = vcmask 23552   ;;  %s548_s1 = inlined_call_operand.vmem [shape: f32[3,32], index: 1, kind: input, shape index: {}]   ;;  %s549_s0 = inlined_call_operand.vmem [shape: f32[64,3], index: 0, kind: input, shape index: {}]   ;;  %s550_s2 = inlined_call_operand.vmem [shape: f32[1,32], index: 2, kind: input, shape index: {}]   ;;  %s551_s3 = inlined_call_operand.vmem [shape: f32[1,32], index: 3, kind: input, shape index: {}]   ;;  %s552_s4 = inlined_call_operand.vmem [shape: f32[1,32], index: 4, kind: input, shape index: {}]   ;;  %s553_s5 = inlined_call_operand.vmem [shape: bf16[64,32], index: 5, kind: output, shape index: {}]  }
   0x1   :  { %v29_v0 = vld [vmem:[%s548_s1] sm:$0x7]  ;;  %v57_v2 = vsel %vm55_vm0, 4294967295, %v389_v1  ;;  %v22_v4 = vld [vmem:[%s549_s0 + $0x8] sm:$0xff]  ;;  %v23_v10 = vld [vmem:[%s549_s0 + $0x10] sm:$0xff]  ;;  %vm129_vm3 = vcmask 261120  }
   0x2   :  { %v21_v3 = vld [vmem:[%s549_s0] sm:$0xff]  ;;  %v35_v5 = vpack.c.bf16 %v29_v0, %v29_v0  ;;  %v58_v6 = vsel %vm56_vm1, %v57_v2, 0  ;;  %v26_v9 = vld [vmem:[%s549_s0 + $0x28] sm:$0xff]  ;;  %v24_v12 = vld [vmem:[%s549_s0 + $0x18] sm:$0xff]  ;;  %vm303_vm4 = vcmask 257024  }
   0x3   :  { %v31_v7 = vpack.c.bf16 %v22_v4, %v21_v3  ;;  %v25_v8 = vld [vmem:[%s549_s0 + $0x20] sm:$0xff]  ;;  %v27_v13 = vld [vmem:[%s549_s0 + $0x30] sm:$0xff]  ;;  %v28_v14 = vld [vmem:[%s549_s0 + $0x38] sm:$0xff]  ;;  %v32_v16 = vpack.c.bf16 %v24_v12, %v23_v10 }
   0x4   :  { %v33_v11 = vpack.c.bf16 %v26_v9, %v25_v8  ;;  %v60_v15 = vand.u32 %v58_v6, %v35_v5  ;;  %v34_v17 = vpack.c.bf16 %v28_v14, %v27_v13  ;;  %v316_v18 = vld [vmem:[%s550_s2] ss:$0 sm:$0xff] }
   0x5   :  { %346 = vmatprep.mubr.msk.bf16.mxu0 %vm42_vm2, %v31_v7 }
   0x6   :  { %350 = vmatprep.mubr.msk.bf16.mxu1 %vm42_vm2, %v33_v11  ;;  %344 = vmatprep.subr.bf16.mxu0 %v60_v15 }
   0x7   :  { %354 = vmatprep.subr.bf16.mxu1 %v60_v15  ;;  %345 = vmatpush3.bf16.msra.mxu0 %v60_v15 }
   0x8   :  { %355 = vmatpush3.bf16.msra.mxu1 %v60_v15 }
   0xa   :  { %347 = vmatmul.mubr.msk.bf16.vlgmr.msra.gmra.mxu0 %vm42_vm2, %v32_v16 }
   0xb   :  { %351 = vmatmul.mubr.msk.bf16.vlgmr.msra.gmra.mxu1 %vm42_vm2, %v34_v17 }
  0xca   :  { %v348_v19 = vpop.f32.mrf.mxu0 }
  0xcb   :  { %v352_v20 = vpop.f32.mrf.mxu1  ;;  %v105_v21 = vadd.f32 %v348_v19, %v316_v18 }
  0xcc   :  { %v96_v22 = vpop.f32.mrf.mxu0  ;;  %v121_v39 = vadd.f32 %v352_v20, %v316_v18 }
  0xcd   :  { %v112_v23 = vpop.f32.mrf.mxu1  ;;  %v97_v24 = vadd.f32 %v316_v18, %v96_v22  ;;  %v136_v25 = vsel %vm129_vm3, %v105_v21, 0.0 }
  0xce   :  { %137 = vadd.xlane.f32.xlu1 %v136_v25  ;;  %v349_v27 = vpop.f32.mrf.mxu0  ;;  %v113_v28 = vadd.f32 %v316_v18, %v112_v23  ;;  %v148_v42 = vsel %vm129_vm3, %v121_v39, 0.0 }
  0xcf   :  { %v353_v26 = vpop.f32.mrf.mxu1  ;;  %v108_v29 = vadd.f32 %v349_v27, %v316_v18  ;;  %v130_v30 = vsel %vm129_vm3, %v97_v24, 0.0 }
  0xd0   :  { %v99_v31 = vpop.f32.mrf.mxu0  ;;  %131 = vadd.xlane.f32.xlu0 %v130_v30  ;;  %v142_v36 = vsel %vm129_vm3, %v113_v28, 0.0  ;;  %v124_v37 = vadd.f32 %v353_v26, %v316_v18 }
  0xd1   :  { %v115_v32 = vpop.f32.mrf.mxu1  ;;  %v139_v34 = vsel %vm129_vm3, %v108_v29, 0.0  ;;  %v100_v35 = vadd.f32 %v316_v18, %v99_v31 }
  0xd2   :  { %v116_v33 = vadd.f32 %v316_v18, %v115_v32  ;;  %140 = vadd.xlane.f32.xlu1 %v139_v34  ;;  %v151_v41 = vsel %vm129_vm3, %v124_v37, 0.0 }
  0xd3   :  { %v133_v40 = vsel %vm129_vm3, %v100_v35, 0.0 }
  0xd4   :  { %143 = vadd.xlane.f32.xlu0 %v142_v36  ;;  %v145_v38 = vsel %vm129_vm3, %v116_v33, 0.0 }
  0xd6   :  { %146 = vadd.xlane.f32.xlu1 %v145_v38 }
  0xd8   :  { %134 = vadd.xlane.f32.xlu0 %v133_v40 }
  0xda   :  { %152 = vadd.xlane.f32.xlu1 %v151_v41  ;;  %v321_v41 = vld [vmem:[%s551_s3] ss:$0 sm:$0xff] }
  0xdc   :  { %149 = vadd.xlane.f32.xlu0 %v148_v42 }
 0x157   :  { %v138_v43 = vpop.xlane.xlu1 %137 }
 0x158   :  { %v157_v44 = vmul.f32 0.03125, %v138_v43 }
 0x159   :  { %v132_v45 = vpop.xlane.xlu0 %131 }
 0x15a   :  { %v462_v46 = vsub.f32 %v105_v21, %v157_v44  ;;  %v155_v47 = vmul.f32 0.03125, %v132_v45  ;;  %v322_v45 = vld [vmem:[%s552_s4] ss:$0 sm:$0xff] }
 0x15b   :  { %v141_v48 = vpop.xlane.xlu1 %140 }
 0x15c   :  { %v464_v49 = vsub.f32 %v97_v24, %v155_v47  ;;  %v158_v50 = vmul.f32 0.03125, %v141_v48  ;;  %v173_v51 = vmul.f32 %v462_v46, %v462_v46 }
 0x15d   :  { %v144_v52 = vpop.xlane.xlu0 %143 }
 0x15e   :  { %v468_v53 = vsub.f32 %v108_v29, %v158_v50  ;;  %v159_v54 = vmul.f32 0.03125, %v144_v52  ;;  %v185_v55 = vsel %vm129_vm3, %v173_v51, 0.0  ;;  %v171_v56 = vmul.f32 %v464_v49, %v464_v49 }
 0x15f   :  { %v147_v57 = vpop.xlane.xlu1 %146  ;;  %186 = vadd.xlane.f32.xlu0 %v185_v55 }
 0x160   :  { %v473_v58 = vsub.f32 %v113_v28, %v159_v54  ;;  %v160_v59 = vmul.f32 0.03125, %v147_v57  ;;  %v174_v60 = vmul.f32 %v468_v53, %v468_v53  ;;  %v179_v0 = vsel %vm129_vm3, %v171_v56, 0.0 }
 0x161   :  { %v135_v61 = vpop.xlane.xlu0 %134 }
 0x162   :  { %v156_v62 = vmul.f32 0.03125, %v135_v61  ;;  %v188_v63 = vsel %vm129_vm3, %v174_v60, 0.0  ;;  %v175_v1 = vmul.f32 %v473_v58, %v473_v58  ;;  %v481_v3 = vsub.f32 %v116_v33, %v160_v59 }
 0x163   :  { %189 = vadd.xlane.f32.xlu1 %v188_v63  ;;  %v153_v2 = vpop.xlane.xlu1 %152  ;;  %180 = vadd.xlane.f32.xlu0 %v179_v0 }
 0x164   :  { %v483_v4 = vsub.f32 %v100_v35, %v156_v62  ;;  %v162_v5 = vmul.f32 0.03125, %v153_v2  ;;  %v191_v8 = vsel %vm129_vm3, %v175_v1, 0.0  ;;  %v176_v13 = vmul.f32 %v481_v3, %v481_v3 }
 0x165   :  { %v150_v6 = vpop.xlane.xlu0 %149 }
 0x166   :  { %v161_v7 = vmul.f32 0.03125, %v150_v6  ;;  %v172_v9 = vmul.f32 %v483_v4, %v483_v4  ;;  %v488_v10 = vsub.f32 %v124_v37, %v162_v5  ;;  %v194_v15 = vsel %vm129_vm3, %v176_v13, 0.0 }
 0x167   :  { %192 = vadd.xlane.f32.xlu0 %v191_v8 }
 0x168   :  { %v490_v11 = vsub.f32 %v121_v39, %v161_v7  ;;  %v182_v12 = vsel %vm129_vm3, %v172_v9, 0.0  ;;  %v178_v17 = vmul.f32 %v488_v10, %v488_v10 }
 0x169   :  { %183 = vadd.xlane.f32.xlu1 %v182_v12 }
 0x16a   :  { %v177_v14 = vmul.f32 %v490_v11, %v490_v11  ;;  %v200_v18 = vsel %vm129_vm3, %v178_v17, 0.0 }
 0x16c   :  { %v197_v16 = vsel %vm129_vm3, %v177_v14, 0.0 }
 0x16d   :  { %195 = vadd.xlane.f32.xlu1 %v194_v15  ;;  %198 = vadd.xlane.f32.xlu0 %v197_v16 }
 0x171   :  { %201 = vadd.xlane.f32.xlu1 %v200_v18 }
 0x1e8   :  { %v187_v19 = vpop.xlane.xlu0 %186 }
 0x1e9   :  { %v205_v20 = vmul.f32 0.03125, %v187_v19 }
 0x1eb   :  { %v213_v21 = vadd.f32 1e-05, %v205_v20 }
 0x1ec   :  { %v190_v22 = vpop.xlane.xlu1 %189  ;;  %v181_v23 = vpop.xlane.xlu0 %180 }
 0x1ed   :  { %357 = vrsqrt.f32 %v213_v21  ;;  %v206_v24 = vmul.f32 0.03125, %v190_v22  ;;  %v203_v25 = vmul.f32 0.03125, %v181_v23 }
 0x1ef   :  { %v214_v26 = vadd.f32 1e-05, %v206_v24  ;;  %v211_v27 = vadd.f32 1e-05, %v203_v25 }
 0x1f0   :  { %v193_v28 = vpop.xlane.xlu0 %192 }
 0x1f1   :  { %359 = vrsqrt.f32 %v214_v26  ;;  %v207_v29 = vmul.f32 0.03125, %v193_v28 }
 0x1f2   :  { %361 = vrsqrt.f32 %v211_v27  ;;  %v184_v30 = vpop.xlane.xlu1 %183 }
 0x1f3   :  { %v215_v31 = vadd.f32 1e-05, %v207_v29  ;;  %v204_v32 = vmul.f32 0.03125, %v184_v30 }
 0x1f5   :  { %363 = vrsqrt.f32 %v215_v31  ;;  %v212_v33 = vadd.f32 1e-05, %v204_v32 }
 0x1f6   :  { %v196_v34 = vpop.xlane.xlu1 %195  ;;  %v199_v35 = vpop.xlane.xlu0 %198 }
 0x1f7   :  { %365 = vrsqrt.f32 %v212_v33  ;;  %v208_v36 = vmul.f32 0.03125, %v196_v34  ;;  %v209_v37 = vmul.f32 0.03125, %v199_v35 }
 0x1f9   :  { %v216_v38 = vadd.f32 1e-05, %v208_v36  ;;  %v217_v39 = vadd.f32 1e-05, %v209_v37 }
 0x1fa   :  { %v358_v40 = vpop.eup %357  ;;  %v202_v42 = vpop.xlane.xlu1 %201 }
 0x1fb   :  { %v229_v43 = vmul.f32 %v358_v40, %v462_v46  ;;  %367 = vrsqrt.f32 %v216_v38  ;;  %v210_v44 = vmul.f32 0.03125, %v202_v42 }
 0x1fc   :  { %369 = vrsqrt.f32 %v217_v39 }
 0x1fd   :  { %v243_v47 = vmul.f32 %v321_v41, %v229_v43  ;;  %v218_v48 = vadd.f32 1e-05, %v210_v44 }
 0x1fe   :  { %v360_v50 = vpop.eup %359 }
 0x1ff   :  { %v362_v51 = vpop.eup %361  ;;  %v257_v52 = vadd.f32 %v322_v45, %v243_v47  ;;  %v230_v54 = vmul.f32 %v360_v50, %v468_v53  ;;  %371 = vrsqrt.f32 %v218_v48 }
 0x200   :  { %v227_v55 = vmul.f32 %v362_v51, %v464_v49 }
 0x201   :  { %373 = vtanh.f32 %v257_v52  ;;  %v244_v56 = vmul.f32 %v321_v41, %v230_v54 }
 0x202   :  { %v364_v46 = vpop.eup %363  ;;  %v241_v57 = vmul.f32 %v321_v41, %v227_v55 }
 0x203   :  { %v258_v59 = vadd.f32 %v322_v45, %v244_v56  ;;  %v231_v60 = vmul.f32 %v364_v46, %v473_v58 }
 0x204   :  { %v366_v61 = vpop.eup %365  ;;  %v255_v62 = vadd.f32 %v322_v45, %v241_v57 }
 0x205   :  { %375 = vtanh.f32 %v258_v59  ;;  %v245_v63 = vmul.f32 %v321_v41, %v231_v60  ;;  %v228_v0 = vmul.f32 %v366_v61, %v483_v4 }
 0x206   :  { %377 = vtanh.f32 %v255_v62 }
 0x207   :  { %v259_v1 = vadd.f32 %v322_v45, %v245_v63  ;;  %v242_v2 = vmul.f32 %v321_v41, %v228_v0 }
 0x208   :  { %v368_v53 = vpop.eup %367 }
 0x209   :  { %v370_v5 = vpop.eup %369  ;;  %379 = vtanh.f32 %v259_v1  ;;  %v256_v49 = vadd.f32 %v322_v45, %v242_v2  ;;  %v232_v6 = vmul.f32 %v368_v53, %v481_v3 }
 0x20a   :  { %v233_v7 = vmul.f32 %v370_v5, %v490_v11 }
 0x20b   :  { %381 = vtanh.f32 %v256_v49  ;;  %v246_v8 = vmul.f32 %v321_v41, %v232_v6 }
 0x20c   :  { %v372_v58 = vpop.eup %371  ;;  %v247_v9 = vmul.f32 %v321_v41, %v233_v7 }
 0x20d   :  { %v260_v12 = vadd.f32 %v322_v45, %v246_v8  ;;  %v234_v13 = vmul.f32 %v372_v58, %v488_v10 }
 0x20e   :  { %v374_v14 = vpop.eup %373  ;;  %v261_v4 = vadd.f32 %v322_v45, %v247_v9 }
 0x20f   :  { %v333_v15 = vpack.c.bf16 %v374_v14, %v374_v14  ;;  %383 = vtanh.f32 %v260_v12  ;;  %v248_v16 = vmul.f32 %v321_v41, %v234_v13 }
 0x210   :  { %385 = vtanh.f32 %v261_v4 }
 0x211   :  { %306 = vst.msk [vmem:[%s553_s5 + $0x8] sm:$0xf] %vm303_vm4, %v333_v15  ;;  %v262_v3 = vadd.f32 %v322_v45, %v248_v16 }
 0x212   :  { %v376_v11 = vpop.eup %375 }
 0x213   :  { %v378_v17 = vpop.eup %377  ;;  %v334_v18 = vpack.c.bf16 %v376_v11, %v376_v11  ;;  %387 = vtanh.f32 %v262_v3 }
 0x214   :  { %v331_v19 = vpack.c.bf16 %v378_v17, %v378_v17 }
 0x215   :  { %307 = vst.msk [vmem:[%s553_s5 + $0xc] sm:$0xf] %vm303_vm4, %v334_v18 }
 0x216   :  { %v380_v10 = vpop.eup %379  ;;  %304 = vst.msk [vmem:[%s553_s5] sm:$0xf] %vm303_vm4, %v331_v19 }
 0x217   :  { %v335_v20 = vpack.c.bf16 %v380_v10, %v380_v10 }
 0x218   :  { %v382_v21 = vpop.eup %381 }
 0x219   :  { %308 = vst.msk [vmem:[%s553_s5 + $0x10] sm:$0xf] %vm303_vm4, %v335_v20  ;;  %v332_v22 = vpack.c.bf16 %v382_v21, %v382_v21 }
 0x21b   :  { %305 = vst.msk [vmem:[%s553_s5 + $0x4] sm:$0xf] %vm303_vm4, %v332_v22 }
 0x21c   :  { %v384_v23 = vpop.eup %383 }
 0x21d   :  { %v386_v24 = vpop.eup %385  ;;  %v336_v25 = vpack.c.bf16 %v384_v23, %v384_v23 }
 0x21e   :  { %v337_v26 = vpack.c.bf16 %v386_v24, %v386_v24 }
 0x21f   :  { %309 = vst.msk [vmem:[%s553_s5 + $0x14] sm:$0xf] %vm303_vm4, %v336_v25 }
 0x220   :  { %v388_v27 = vpop.eup %387  ;;  %310 = vst.msk [vmem:[%s553_s5 + $0x18] sm:$0xf] %vm303_vm4, %v337_v26 }
 0x221   :  { %v338_v28 = vpack.c.bf16 %v388_v27, %v388_v27 }
 0x223   :  { %311 = vst.msk [vmem:[%s553_s5 + $0x1c] sm:$0xf] %vm303_vm4, %v338_v28 }

// kernel: _lambda_.12
= control target key start
LH: loop header
LB: loop body
LE: loop exit
PB: predicated region body
PF: predicated region fallthrough
CT: control target
= control target key end

     0   :  { %s1181_s24 = smov 64   ;;  %s1182_s25 = smov 32   ;;  %vm151_vm0 = vcmask 261120   ;;  %vm164_vm1 = vcmask 523264   ;;  %vm198_vm2 = vcmask 785408   ;;  %vm935_vm3 = vcmask 257024   ;;  %s1618_s2 = inlined_call_operand.vmem [shape: bf16[64,32], index: 2, kind: input, shape index: {}]   ;;  %s1619_s1 = inlined_call_operand.vmem [shape: bf16[64,32], index: 1, kind: input, shape index: {}]   ;;  %s1620_s3 = inlined_call_operand.vmem [shape: f32[96,32], index: 3, kind: input, shape index: {}]   ;;  %s1621_s0 = inlined_call_operand.vmem [shape: bf16[64,32], index: 0, kind: input, shape index: {}]   ;;  %s1622_s4 = inlined_call_operand.vmem [shape: f32[1,32], index: 4, kind: input, shape index: {}]   ;;  %s1623_s7 = inlined_call_operand.vmem [shape: f32[32,32], index: 7, kind: input, shape index: {}]   ;;  %s1624_s5 = inlined_call_operand.vmem [shape: f32[1,32], index: 5, kind: input, shape index: {}, may-alias: {5,9,13}]   ;;  %s1625_s6 = inlined_call_operand.vmem [shape: f32[1,32], index: 6, kind: input, shape index: {}, may-alias: {6,10,14}]   ;;  %s1626_s8 = inlined_call_operand.vmem [shape: f32[1,32], index: 8, kind: input, shape index: {}]   ;;  %s1627_s11 = inlined_call_operand.vmem [shape: f32[32,32], index: 11, kind: input, shape index: {}]   ;;  %s1628_s9 = inlined_call_operand.vmem [shape: f32[1,32], index: 9, kind: input, shape index: {}, may-alias: {5,9,13}]   ;;  %s1629_s10 = inlined_call_operand.vmem [shape: f32[1,32], index: 10, kind: input, shape index: {}, may-alias: {6,10,14}]   ;;  %s1630_s12 = inlined_call_operand.vmem [shape: f32[1,32], index: 12, kind: input, shape index: {}]   ;;  %s1631_s13 = inlined_call_operand.vmem [shape: f32[1,32], index: 13, kind: input, shape index: {}, may-alias: {5,9,13}]   ;;  %s1632_s14 = inlined_call_operand.vmem [shape: f32[1,32], index: 14, kind: input, shape index: {}, may-alias: {6,10,14}]   ;;  %s1633_s15 = inlined_call_operand.vmem [shape: bf16[64,32], index: 15, kind: output, shape index: {}]  }
   0x1   :  { %v67_v0 = vld [vmem:[%s1618_s2] sm:$0xff]   ;;  %v69_v2 = vld [vmem:[%s1618_s2 + $0x8] sm:$0xff]   ;;  %v183_v4 = vld [vmem:[%s1620_s3 + $0x50] sm:$0xff] }
   0x2   :  { %v1066_v1 = vld [vmem:[%s1619_s1] sm:$0xff]   ;;  %143 = vrot.lane.b32.xlu1 %v67_v0, %s1181_s24  ;;  %v1068_v3 = vld [vmem:[%s1619_s1 + $0x8] sm:$0xff]   ;;  %v184_v5 = vld [vmem:[%s1620_s3 + $0x58] sm:$0xff] }
   0x3   :  { %115 = vrot.lane.b32.xlu0 %v1066_v1, %s1182_s25  ;;  %v181_v6 = vld [vmem:[%s1620_s3 + $0x40] sm:$0xff]  ;;  %v182_v7 = vld [vmem:[%s1620_s3 + $0x48] sm:$0xff]  ;;  %v1069_v8 = vld [vmem:[%s1619_s1 + $0x18] sm:$0xff]   ;;  %v191_v10 = vpack.c.bf16 %v184_v5, %v183_v4 }
   0x4   :  { %v1070_v9 = vld [vmem:[%s1619_s1 + $0x10] sm:$0xff]   ;;  %v73_v11 = vld [vmem:[%s1618_s2 + $0x18] sm:$0xff]   ;;  %v190_v13 = vpack.c.bf16 %v182_v7, %v181_v6  ;;  %v177_v16 = vld [vmem:[%s1620_s3 + $0x20] sm:$0xff] }
   0x5   :  { %v71_v12 = vld [vmem:[%s1618_s2 + $0x10] sm:$0xff]   ;;  %1019 = vmatprep.subr.bf16.mxu0 %v191_v10  ;;  %v180_v15 = vld [vmem:[%s1620_s3 + $0x38] sm:$0xff]  ;;  %v178_v18 = vld [vmem:[%s1620_s3 + $0x28] sm:$0xff] }
   0x6   :  { %145 = vrot.lane.b32.xlu1 %v69_v2, %s1181_s24  ;;  %v179_v14 = vld [vmem:[%s1620_s3 + $0x30] sm:$0xff]  ;;  %1020 = vmatpush3.bf16.msra.mxu0 %v191_v10  ;;  %v188_v19 = vpack.c.bf16 %v178_v18, %v177_v16  ;;  %v176_v21 = vld [vmem:[%s1620_s3 + $0x18] sm:$0xff]  ;;  %v173_v23 = vld [vmem:[%s1620_s3] sm:$0xff] }
   0x7   :  { %117 = vrot.lane.b32.xlu0 %v1068_v3, %s1182_s25  ;;  %1021 = vmatprep.subr.bf16.mxu0 %v190_v13  ;;  %v189_v17 = vpack.c.bf16 %v180_v15, %v179_v14  ;;  %v175_v20 = vld [vmem:[%s1620_s3 + $0x10] sm:$0xff]  ;;  %v174_v24 = vld [vmem:[%s1620_s3 + $0x8] sm:$0xff]  ;;  %v1073_v26 = vld [vmem:[%s1621_s0] sm:$0xff]  }
   0x8   :  { %v187_v22 = vpack.c.bf16 %v176_v21, %v175_v20  ;;  %v186_v25 = vpack.c.bf16 %v174_v24, %v173_v23  ;;  %v1074_v30 = vld [vmem:[%s1621_s0 + $0x8] sm:$0xff]   ;;  %v1075_v37 = vld [vmem:[%s1621_s0 + $0x18] sm:$0xff]   ;;  %v1076_v39 = vld [vmem:[%s1621_s0 + $0x10] sm:$0xff]  }
   0x9   :  { %v960_v47 = vld [vmem:[%s1622_s4] ss:$0 sm:$0xff] }
   0xa   :  { %121 = vrot.lane.b32.xlu1 %v1069_v8, %s1182_s25  ;;  %1022 = vmatpush3.bf16.msra.mxu0 %v190_v13 }
   0xb   :  { %119 = vrot.lane.b32.xlu0 %v1070_v9, %s1182_s25  ;;  %1023 = vmatprep.subr.bf16.mxu0 %v189_v17 }
   0xe   :  { %149 = vrot.lane.b32.xlu1 %v73_v11, %s1181_s24  ;;  %1024 = vmatpush3.bf16.msra.mxu0 %v189_v17 }
   0xf   :  { %147 = vrot.lane.b32.xlu0 %v71_v12, %s1181_s24  ;;  %1025 = vmatprep.subr.bf16.mxu0 %v188_v19 }
  0x12   :  { %1026 = vmatpush3.bf16.msra.mxu0 %v188_v19 }
  0x13   :  { %1027 = vmatprep.subr.bf16.mxu0 %v187_v22 }
  0x16   :  { %1028 = vmatpush3.bf16.msra.mxu0 %v187_v22 }
  0x17   :  { %1029 = vmatprep.subr.bf16.mxu0 %v186_v25 }
  0x1a   :  { %1030 = vmatpush3.bf16.msra.mxu0 %v186_v25 }
  0x74   :  { %v144_v27 = vpop.permute.xlu1 %143 }
  0x75   :  { %v116_v28 = vpop.permute.xlu0 %115 }
  0x76   :  { %v154_v29 = vsel %vm151_vm0, %v1073_v26, %v116_v28 }
  0x77   :  { %v166_v31 = vsel %vm164_vm1, %v154_v29, %v144_v27 }
  0x78   :  { %1031 = vmatprep.mubr.msk.bf16.mxu0 %vm198_vm2, %v166_v31  ;;  %v146_v32 = vpop.permute.xlu1 %145 }
  0x79   :  { %v118_v33 = vpop.permute.xlu0 %117 }
  0x7a   :  { %v157_v34 = vsel %vm151_vm0, %v1074_v30, %v118_v33 }
  0x7b   :  { %v168_v35 = vsel %vm164_vm1, %v157_v34, %v146_v32 }
  0x7c   :  { %1032 = vmatmul.mubr.msk.bf16.vlgmr.msra.gmra.mxu0 %vm198_vm2, %v168_v35  ;;  %v122_v36 = vpop.permute.xlu1 %121 }
  0x7d   :  { %v120_v38 = vpop.permute.xlu0 %119  ;;  %v163_v40 = vsel %vm151_vm0, %v1075_v37, %v122_v36 }
  0x7e   :  { %v160_v41 = vsel %vm151_vm0, %v1076_v39, %v120_v38 }
  0x80   :  { %v150_v42 = vpop.permute.xlu1 %149 }
  0x81   :  { %v148_v43 = vpop.permute.xlu0 %147  ;;  %v172_v44 = vsel %vm164_vm1, %v163_v40, %v150_v42 }
  0x82   :  { %v170_v45 = vsel %vm164_vm1, %v160_v41, %v148_v43 }
  0x83   :  { %1035 = vmatprep.mubr.msk.bf16.mxu0 %vm198_vm2, %v170_v45 }
  0x84   :  { %1036 = vmatmul.mubr.msk.bf16.gmra.mxu0 %vm198_vm2, %v172_v44 }
 0x13c   :  { %v1033_v46 = vpop.f32.mrf.mxu0 }
 0x13d   :  { %v250_v51 = vadd.f32 %v1033_v46, %v960_v47 }
 0x13e   :  { %v241_v48 = vpop.f32.mrf.mxu0 }
 0x13f   :  { %v242_v49 = vadd.f32 %v960_v47, %v241_v48  ;;  %v280_v58 = vsel %vm151_vm0, %v250_v51, 0.0  ;;  %v418_v48 = vld [vmem:[%s1623_s7 + $0x18] sm:$0xff] }
 0x140   :  { %v1034_v50 = vpop.f32.mrf.mxu0 }
 0x141   :  { %v274_v52 = vsel %vm151_vm0, %v242_v49, 0.0  ;;  %v253_v56 = vadd.f32 %v1034_v50, %v960_v47  ;;  %v415_v50 = vld [vmem:[%s1623_s7] sm:$0xff] }
 0x142   :  { %v244_v53 = vpop.f32.mrf.mxu0  ;;  %275 = vadd.xlane.f32.xlu0 %v274_v52 }
 0x143   :  { %v245_v54 = vadd.f32 %v960_v47, %v244_v53  ;;  %v283_v0 = vsel %vm151_vm0, %v253_v56, 0.0 }
 0x144   :  { %v1037_v55 = vpop.f32.mrf.mxu0 }
 0x145   :  { %v277_v57 = vsel %vm151_vm0, %v245_v54, 0.0  ;;  %v266_v62 = vadd.f32 %v1037_v55, %v960_v47 }
 0x146   :  { %v257_v59 = vpop.f32.mrf.mxu0  ;;  %278 = vadd.xlane.f32.xlu1 %v277_v57  ;;  %281 = vadd.xlane.f32.xlu0 %v280_v58 }
 0x147   :  { %v258_v60 = vadd.f32 %v960_v47, %v257_v59  ;;  %v292_v4 = vsel %vm151_vm0, %v266_v62, 0.0 }
 0x148   :  { %v1038_v61 = vpop.f32.mrf.mxu0 }
 0x149   :  { %v286_v63 = vsel %vm151_vm0, %v258_v60, 0.0  ;;  %v269_v3 = vadd.f32 %v1038_v61, %v960_v47 }
 0x14a   :  { %v260_v1 = vpop.f32.mrf.mxu0  ;;  %287 = vadd.xlane.f32.xlu1 %v286_v63  ;;  %284 = vadd.xlane.f32.xlu0 %v283_v0 }
 0x14b   :  { %v261_v2 = vadd.f32 %v960_v47, %v260_v1  ;;  %v295_v6 = vsel %vm151_vm0, %v269_v3, 0.0  ;;  %v417_v47 = vld [vmem:[%s1623_s7 + $0x10] sm:$0xff] }
 0x14d   :  { %v289_v5 = vsel %vm151_vm0, %v261_v2, 0.0 }
 0x14e   :  { %293 = vadd.xlane.f32.xlu1 %v292_v4  ;;  %290 = vadd.xlane.f32.xlu0 %v289_v5 }
 0x152   :  { %296 = vadd.xlane.f32.xlu0 %v295_v6 }
 0x1cb   :  { %v276_v7 = vpop.xlane.xlu0 %275 }
 0x1cc   :  { %v299_v8 = vmul.f32 0.03125, %v276_v7 }
 0x1ce   :  { %v1358_v9 = vsub.f32 %v242_v49, %v299_v8  ;;  %v425_v49 = vpack.c.bf16 %v418_v48, %v417_v47 }
 0x1cf   :  { %v279_v10 = vpop.xlane.xlu1 %278  ;;  %v282_v11 = vpop.xlane.xlu0 %281 }
 0x1d0   :  { %v300_v12 = vmul.f32 0.03125, %v279_v10  ;;  %v301_v13 = vmul.f32 0.03125, %v282_v11  ;;  %v315_v14 = vmul.f32 %v1358_v9, %v1358_v9  ;;  %1039 = vmatprep.subr.bf16.mxu1 %v425_v49 }
 0x1d1   :  { %1040 = vmatpush3.bf16.msra.mxu1 %v425_v49 }
 0x1d2   :  { %v1362_v15 = vsub.f32 %v245_v54, %v300_v12  ;;  %v1364_v16 = vsub.f32 %v250_v51, %v301_v13  ;;  %v323_v17 = vsel %vm151_vm0, %v315_v14, 0.0  ;;  %v416_v51 = vld [vmem:[%s1623_s7 + $0x8] sm:$0xff]  ;;  %v965_v14 = vld [vmem:[%s1624_s5] ss:$0 sm:$0xff] }
 0x1d3   :  { %v288_v18 = vpop.xlane.xlu1 %287  ;;  %324 = vadd.xlane.f32.xlu1 %v323_v17  ;;  %v285_v19 = vpop.xlane.xlu0 %284  ;;  %v424_v52 = vpack.c.bf16 %v416_v51, %v415_v50 }
 0x1d4   :  { %v303_v20 = vmul.f32 0.03125, %v288_v18  ;;  %v302_v21 = vmul.f32 0.03125, %v285_v19  ;;  %v316_v22 = vmul.f32 %v1362_v15, %v1362_v15  ;;  %v317_v23 = vmul.f32 %v1364_v16, %v1364_v16 }
 0x1d5   :  { %1041 = vmatprep.subr.bf16.mxu1 %v424_v52 }
 0x1d6   :  { %v1371_v24 = vsub.f32 %v258_v60, %v303_v20  ;;  %v1373_v25 = vsub.f32 %v253_v56, %v302_v21  ;;  %v326_v26 = vsel %vm151_vm0, %v316_v22, 0.0  ;;  %v329_v27 = vsel %vm151_vm0, %v317_v23, 0.0  ;;  %1042 = vmatpush3.bf16.msra.mxu1 %v424_v52  ;;  %v966_v21 = vld [vmem:[%s1625_s6] ss:$0 sm:$0xff] }
 0x1d7   :  { %v294_v28 = vpop.xlane.xlu1 %293  ;;  %327 = vadd.xlane.f32.xlu0 %v326_v26  ;;  %330 = vadd.xlane.f32.xlu1 %v329_v27  ;;  %v291_v29 = vpop.xlane.xlu0 %290 }
 0x1d8   :  { %v305_v30 = vmul.f32 0.03125, %v294_v28  ;;  %v304_v31 = vmul.f32 0.03125, %v291_v29  ;;  %v319_v32 = vmul.f32 %v1371_v24, %v1371_v24  ;;  %v318_v33 = vmul.f32 %v1373_v25, %v1373_v25 }
 0x1da   :  { %v1381_v34 = vsub.f32 %v266_v62, %v305_v30  ;;  %v1383_v35 = vsub.f32 %v261_v2, %v304_v31  ;;  %v335_v36 = vsel %vm151_vm0, %v319_v32, 0.0  ;;  %v332_v37 = vsel %vm151_vm0, %v318_v33, 0.0 }
 0x1db   :  { %336 = vadd.xlane.f32.xlu1 %v335_v36  ;;  %333 = vadd.xlane.f32.xlu0 %v332_v37  ;;  %v297_v38 = vpop.xlane.xlu0 %296 }
 0x1dc   :  { %v306_v39 = vmul.f32 0.03125, %v297_v38  ;;  %v321_v40 = vmul.f32 %v1381_v34, %v1381_v34  ;;  %v320_v41 = vmul.f32 %v1383_v35, %v1383_v35 }
 0x1de   :  { %v1391_v42 = vsub.f32 %v269_v3, %v306_v39  ;;  %v341_v43 = vsel %vm151_vm0, %v321_v40, 0.0  ;;  %v338_v44 = vsel %vm151_vm0, %v320_v41, 0.0 }
 0x1df   :  { %342 = vadd.xlane.f32.xlu1 %v341_v43  ;;  %339 = vadd.xlane.f32.xlu0 %v338_v44 }
 0x1e0   :  { %v322_v45 = vmul.f32 %v1391_v42, %v1391_v42 }
 0x1e2   :  { %v344_v46 = vsel %vm151_vm0, %v322_v45, 0.0 }
 0x1e3   :  { %345 = vadd.xlane.f32.xlu0 %v344_v46 }
 0x25c   :  { %v325_v53 = vpop.xlane.xlu1 %324 }
 0x25d   :  { %v347_v54 = vmul.f32 0.03125, %v325_v53 }
 0x25f   :  { %v355_v55 = vadd.f32 1e-05, %v347_v54 }
 0x260   :  { %v331_v56 = vpop.xlane.xlu1 %330  ;;  %v328_v57 = vpop.xlane.xlu0 %327 }
 0x261   :  { %1081 = vrsqrt.f32 %v355_v55  ;;  %v349_v58 = vmul.f32 0.03125, %v331_v56  ;;  %v348_v59 = vmul.f32 0.03125, %v328_v57 }
 0x263   :  { %v357_v60 = vadd.f32 1e-05, %v349_v58  ;;  %v356_v61 = vadd.f32 1e-05, %v348_v59 }
 0x264   :  { %v337_v62 = vpop.xlane.xlu1 %336  ;;  %v334_v63 = vpop.xlane.xlu0 %333 }
 0x265   :  { %1083 = vrsqrt.f32 %v357_v60  ;;  %v351_v0 = vmul.f32 0.03125, %v337_v62  ;;  %v350_v1 = vmul.f32 0.03125, %v334_v63  ;;  %v967_v60 = vld [vmem:[%s1626_s8] ss:$0 sm:$0xff] }
 0x266   :  { %1085 = vrsqrt.f32 %v356_v61 }
 0x267   :  { %v359_v2 = vadd.f32 1e-05, %v351_v0  ;;  %v358_v3 = vadd.f32 1e-05, %v350_v1 }
 0x268   :  { %v343_v4 = vpop.xlane.xlu1 %342  ;;  %v340_v5 = vpop.xlane.xlu0 %339 }
 0x269   :  { %1087 = vrsqrt.f32 %v359_v2  ;;  %v353_v6 = vmul.f32 0.03125, %v343_v4  ;;  %v352_v7 = vmul.f32 0.03125, %v340_v5 }
 0x26a   :  { %1089 = vrsqrt.f32 %v358_v3 }
 0x26b   :  { %v361_v8 = vadd.f32 1e-05, %v353_v6  ;;  %v360_v10 = vadd.f32 1e-05, %v352_v7 }
 0x26c   :  { %v346_v11 = vpop.xlane.xlu0 %345 }
 0x26d   :  { %1091 = vrsqrt.f32 %v361_v8  ;;  %v354_v12 = vmul.f32 0.03125, %v346_v11 }
 0x26e   :  { %v1082_v13 = vpop.eup %1081  ;;  %1093 = vrsqrt.f32 %v360_v10 }
 0x26f   :  { %v371_v17 = vmul.f32 %v1082_v13, %v1358_v9  ;;  %v362_v18 = vadd.f32 1e-05, %v354_v12 }
 0x271   :  { %v385_v19 = vmul.f32 %v965_v14, %v371_v17  ;;  %1095 = vrsqrt.f32 %v362_v18 }
 0x272   :  { %v1084_v20 = vpop.eup %1083 }
 0x273   :  { %v1086_v22 = vpop.eup %1085  ;;  %v373_v23 = vmul.f32 %v1084_v20, %v1364_v16  ;;  %v399_v28 = vadd.f32 %v966_v21, %v385_v19 }
 0x274   :  { %v372_v26 = vmul.f32 %v1086_v22, %v1362_v15 }
 0x275   :  { %v387_v27 = vmul.f32 %v965_v14, %v373_v23  ;;  %1097 = vtanh.f32 %v399_v28 }
 0x276   :  { %v1088_v29 = vpop.eup %1087  ;;  %v386_v30 = vmul.f32 %v965_v14, %v372_v26 }
 0x277   :  { %v1090_v31 = vpop.eup %1089  ;;  %v375_v9 = vmul.f32 %v1088_v29, %v1371_v24  ;;  %v401_v36 = vadd.f32 %v966_v21, %v387_v27 }
 0x278   :  { %v374_v32 = vmul.f32 %v1090_v31, %v1373_v25  ;;  %v400_v33 = vadd.f32 %v966_v21, %v386_v30 }
 0x279   :  { %v389_v37 = vmul.f32 %v965_v14, %v375_v9 }
 0x27a   :  { %v1092_v38 = vpop.eup %1091  ;;  %v388_v39 = vmul.f32 %v965_v14, %v374_v32  ;;  %1099 = vtanh.f32 %v400_v33 }
 0x27b   :  { %v1094_v40 = vpop.eup %1093  ;;  %v377_v16 = vmul.f32 %v1092_v38, %v1381_v34  ;;  %1101 = vtanh.f32 %v401_v36  ;;  %v403_v43 = vadd.f32 %v966_v21, %v389_v37 }
 0x27c   :  { %v402_v15 = vadd.f32 %v966_v21, %v388_v39  ;;  %v376_v41 = vmul.f32 %v1094_v40, %v1383_v35 }
 0x27d   :  { %v391_v44 = vmul.f32 %v965_v14, %v377_v16 }
 0x27e   :  { %v1096_v45 = vpop.eup %1095  ;;  %1103 = vtanh.f32 %v402_v15  ;;  %v390_v24 = vmul.f32 %v965_v14, %v376_v41 }
 0x27f   :  { %v378_v25 = vmul.f32 %v1096_v45, %v1391_v42  ;;  %v405_v46 = vadd.f32 %v966_v21, %v391_v44  ;;  %1105 = vtanh.f32 %v403_v43 }
 0x280   :  { %v404_v47 = vadd.f32 %v966_v21, %v390_v24 }
 0x281   :  { %v392_v48 = vmul.f32 %v965_v14, %v378_v25 }
 0x282   :  { %1107 = vtanh.f32 %v404_v47  ;;  %v1098_v34 = vpop.eup %1097 }
 0x283   :  { %v406_v49 = vadd.f32 %v966_v21, %v392_v48  ;;  %1109 = vtanh.f32 %v405_v46 }
 0x285   :  { %1111 = vtanh.f32 %v406_v49 }
 0x287   :  { %v1100_v50 = vpop.eup %1099 }
 0x288   :  { %v420_v51 = vpack.c.bf16 %v1100_v50, %v1098_v34  ;;  %v1102_v35 = vpop.eup %1101 }
 0x28a   :  { %1043 = vmatprep.mubr.msk.bf16.mxu1 %vm151_vm0, %v420_v51 }
 0x28b   :  { %v1104_v52 = vpop.eup %1103 }
 0x28c   :  { %v421_v53 = vpack.c.bf16 %v1104_v52, %v1102_v35  ;;  %v1106_v54 = vpop.eup %1105 }
 0x28e   :  { %1044 = vmatmul.mubr.msk.bf16.vlgmr.msra.gmra.mxu1 %vm151_vm0, %v421_v53 }
 0x28f   :  { %v1108_v42 = vpop.eup %1107 }
 0x290   :  { %v422_v55 = vpack.c.bf16 %v1108_v42, %v1106_v54  ;;  %v1110_v56 = vpop.eup %1109 }
 0x292   :  { %v1112_v57 = vpop.eup %1111  ;;  %1047 = vmatprep.mubr.msk.bf16.mxu1 %vm151_vm0, %v422_v55 }
 0x293   :  { %v423_v58 = vpack.c.bf16 %v1112_v57, %v1110_v56 }
 0x296   :  { %1048 = vmatmul.mubr.msk.bf16.gmra.mxu1 %vm151_vm0, %v423_v58 }
 0x34e   :  { %v1045_v59 = vpop.f32.mrf.mxu1 }
 0x34f   :  { %v487_v0 = vadd.f32 %v1045_v59, %v967_v60 }
 0x350   :  { %v478_v61 = vpop.f32.mrf.mxu1 }
 0x351   :  { %v479_v62 = vadd.f32 %v967_v60, %v478_v61  ;;  %v517_v7 = vsel %vm151_vm0, %v487_v0, 0.0  ;;  %v654_v61 = vld [vmem:[%s1627_s11 + $0x18] sm:$0xff] }
 0x352   :  { %v1046_v63 = vpop.f32.mrf.mxu1 }
 0x353   :  { %v511_v1 = vsel %vm151_vm0, %v479_v62, 0.0  ;;  %v490_v5 = vadd.f32 %v1046_v63, %v967_v60  ;;  %v651_v63 = vld [vmem:[%s1627_s11] sm:$0xff] }
 0x354   :  { %v481_v2 = vpop.f32.mrf.mxu1  ;;  %512 = vadd.xlane.f32.xlu1 %v511_v1 }
 0x355   :  { %v482_v3 = vadd.f32 %v967_v60, %v481_v2  ;;  %v520_v13 = vsel %vm151_vm0, %v490_v5, 0.0 }
 0x356   :  { %v1049_v4 = vpop.f32.mrf.mxu1 }
 0x357   :  { %v514_v6 = vsel %vm151_vm0, %v482_v3, 0.0  ;;  %v503_v12 = vadd.f32 %v1049_v4, %v967_v60 }
 0x358   :  { %515 = vadd.xlane.f32.xlu0 %v514_v6  ;;  %518 = vadd.xlane.f32.xlu1 %v517_v7  ;;  %v494_v8 = vpop.f32.mrf.mxu1 }
 0x359   :  { %v495_v10 = vadd.f32 %v967_v60, %v494_v8  ;;  %v529_v21 = vsel %vm151_vm0, %v503_v12, 0.0 }
 0x35a   :  { %v1050_v11 = vpop.f32.mrf.mxu1 }
 0x35b   :  { %v523_v14 = vsel %vm151_vm0, %v495_v10, 0.0  ;;  %v506_v19 = vadd.f32 %v1050_v11, %v967_v60 }
 0x35c   :  { %521 = vadd.xlane.f32.xlu0 %v520_v13  ;;  %v497_v17 = vpop.f32.mrf.mxu1  ;;  %524 = vadd.xlane.f32.xlu1 %v523_v14 }
 0x35d   :  { %v498_v18 = vadd.f32 %v967_v60, %v497_v17  ;;  %v532_v22 = vsel %vm151_vm0, %v506_v19, 0.0  ;;  %v653_v60 = vld [vmem:[%s1627_s11 + $0x10] sm:$0xff] }
 0x35f   :  { %v526_v20 = vsel %vm151_vm0, %v498_v18, 0.0 }
 0x360   :  { %527 = vadd.xlane.f32.xlu0 %v526_v20  ;;  %530 = vadd.xlane.f32.xlu1 %v529_v21 }
 0x364   :  { %533 = vadd.xlane.f32.xlu0 %v532_v22 }
 0x3dd   :  { %v513_v23 = vpop.xlane.xlu1 %512 }
 0x3de   :  { %v535_v26 = vmul.f32 0.03125, %v513_v23 }
 0x3e0   :  { %v1439_v27 = vsub.f32 %v479_v62, %v535_v26  ;;  %v661_v62 = vpack.c.bf16 %v654_v61, %v653_v60 }
 0x3e1   :  { %v519_v28 = vpop.xlane.xlu1 %518  ;;  %v516_v29 = vpop.xlane.xlu0 %515 }
 0x3e2   :  { %v537_v30 = vmul.f32 0.03125, %v519_v28  ;;  %v536_v31 = vmul.f32 0.03125, %v516_v29  ;;  %v551_v9 = vmul.f32 %v1439_v27, %v1439_v27  ;;  %1051 = vmatprep.subr.bf16.mxu1 %v661_v62 }
 0x3e3   :  { %1052 = vmatpush3.bf16.msra.mxu1 %v661_v62 }
 0x3e4   :  { %v1443_v32 = vsub.f32 %v487_v0, %v537_v30  ;;  %v1445_v33 = vsub.f32 %v482_v3, %v536_v31  ;;  %v559_v36 = vsel %vm151_vm0, %v551_v9, 0.0  ;;  %v652_v0 = vld [vmem:[%s1627_s11 + $0x8] sm:$0xff]  ;;  %v972_v9 = vld [vmem:[%s1628_s9] ss:$0 sm:$0xff] }
 0x3e5   :  { %560 = vadd.xlane.f32.xlu1 %v559_v36  ;;  %v525_v37 = vpop.xlane.xlu1 %524  ;;  %v522_v38 = vpop.xlane.xlu0 %521  ;;  %v660_v1 = vpack.c.bf16 %v652_v0, %v651_v63 }
 0x3e6   :  { %v539_v39 = vmul.f32 0.03125, %v525_v37  ;;  %v538_v40 = vmul.f32 0.03125, %v522_v38  ;;  %v553_v16 = vmul.f32 %v1443_v32, %v1443_v32  ;;  %v552_v15 = vmul.f32 %v1445_v33, %v1445_v33 }
 0x3e7   :  { %1053 = vmatprep.subr.bf16.mxu1 %v660_v1 }
 0x3e8   :  { %v1452_v41 = vsub.f32 %v495_v10, %v539_v39  ;;  %v1454_v43 = vsub.f32 %v490_v5, %v538_v40  ;;  %v565_v44 = vsel %vm151_vm0, %v553_v16, 0.0  ;;  %v562_v45 = vsel %vm151_vm0, %v552_v15, 0.0  ;;  %1054 = vmatpush3.bf16.msra.mxu1 %v660_v1  ;;  %v973_v40 = vld [vmem:[%s1629_s10] ss:$0 sm:$0xff] }
 0x3e9   :  { %566 = vadd.xlane.f32.xlu1 %v565_v44  ;;  %v531_v24 = vpop.xlane.xlu1 %530  ;;  %563 = vadd.xlane.f32.xlu0 %v562_v45  ;;  %v528_v25 = vpop.xlane.xlu0 %527 }
 0x3ea   :  { %v541_v46 = vmul.f32 0.03125, %v531_v24  ;;  %v540_v47 = vmul.f32 0.03125, %v528_v25  ;;  %v555_v48 = vmul.f32 %v1452_v41, %v1452_v41  ;;  %v554_v49 = vmul.f32 %v1454_v43, %v1454_v43 }
 0x3ec   :  { %v1462_v34 = vsub.f32 %v503_v12, %v541_v46  ;;  %v1464_v50 = vsub.f32 %v498_v18, %v540_v47  ;;  %v571_v51 = vsel %vm151_vm0, %v555_v48, 0.0  ;;  %v568_v35 = vsel %vm151_vm0, %v554_v49, 0.0 }
 0x3ed   :  { %572 = vadd.xlane.f32.xlu1 %v571_v51  ;;  %569 = vadd.xlane.f32.xlu0 %v568_v35  ;;  %v534_v52 = vpop.xlane.xlu0 %533 }
 0x3ee   :  { %v542_v53 = vmul.f32 0.03125, %v534_v52  ;;  %v557_v54 = vmul.f32 %v1462_v34, %v1462_v34  ;;  %v556_v42 = vmul.f32 %v1464_v50, %v1464_v50 }
 0x3f0   :  { %v1472_v55 = vsub.f32 %v506_v19, %v542_v53  ;;  %v577_v56 = vsel %vm151_vm0, %v557_v54, 0.0  ;;  %v574_v57 = vsel %vm151_vm0, %v556_v42, 0.0 }
 0x3f1   :  { %578 = vadd.xlane.f32.xlu1 %v577_v56  ;;  %575 = vadd.xlane.f32.xlu0 %v574_v57 }
 0x3f2   :  { %v558_v58 = vmul.f32 %v1472_v55, %v1472_v55 }
 0x3f4   :  { %v580_v59 = vsel %vm151_vm0, %v558_v58, 0.0 }
 0x3f5   :  { %581 = vadd.xlane.f32.xlu0 %v580_v59 }
 0x46e   :  { %v561_v2 = vpop.xlane.xlu1 %560 }
 0x46f   :  { %v583_v3 = vmul.f32 0.03125, %v561_v2 }
 0x471   :  { %v591_v4 = vadd.f32 1e-05, %v583_v3 }
 0x472   :  { %v567_v5 = vpop.xlane.xlu1 %566  ;;  %v564_v6 = vpop.xlane.xlu0 %563 }
 0x473   :  { %1113 = vrsqrt.f32 %v591_v4  ;;  %v585_v7 = vmul.f32 0.03125, %v567_v5  ;;  %v584_v8 = vmul.f32 0.03125, %v564_v6 }
 0x475   :  { %v593_v10 = vadd.f32 1e-05, %v585_v7  ;;  %v592_v11 = vadd.f32 1e-05, %v584_v8  ;;  %v974_v8 = vld [vmem:[%s1630_s12] ss:$0 sm:$0xff] }
 0x476   :  { %v573_v12 = vpop.xlane.xlu1 %572  ;;  %v570_v13 = vpop.xlane.xlu0 %569 }
 0x477   :  { %1115 = vrsqrt.f32 %v593_v10  ;;  %v587_v14 = vmul.f32 0.03125, %v573_v12  ;;  %v586_v17 = vmul.f32 0.03125, %v570_v13 }
 0x478   :  { %1117 = vrsqrt.f32 %v592_v11 }
 0x479   :  { %v595_v18 = vadd.f32 1e-05, %v587_v14  ;;  %v594_v19 = vadd.f32 1e-05, %v586_v17 }
 0x47a   :  { %v579_v20 = vpop.xlane.xlu1 %578  ;;  %v576_v21 = vpop.xlane.xlu0 %575 }
 0x47b   :  { %1119 = vrsqrt.f32 %v595_v18  ;;  %v589_v22 = vmul.f32 0.03125, %v579_v20  ;;  %v588_v23 = vmul.f32 0.03125, %v576_v21 }
 0x47c   :  { %1121 = vrsqrt.f32 %v594_v19 }
 0x47d   :  { %v597_v26 = vadd.f32 1e-05, %v589_v22  ;;  %v596_v28 = vadd.f32 1e-05, %v588_v23 }
 0x47e   :  { %v582_v29 = vpop.xlane.xlu0 %581 }
 0x47f   :  { %1123 = vrsqrt.f32 %v597_v26  ;;  %v590_v30 = vmul.f32 0.03125, %v582_v29 }
 0x480   :  { %v1114_v31 = vpop.eup %1113  ;;  %1125 = vrsqrt.f32 %v596_v28 }
 0x481   :  { %v607_v36 = vmul.f32 %v1114_v31, %v1439_v27  ;;  %v598_v37 = vadd.f32 1e-05, %v590_v30 }
 0x483   :  { %v621_v38 = vmul.f32 %v972_v9, %v607_v36  ;;  %1127 = vrsqrt.f32 %v598_v37 }
 0x484   :  { %v1116_v39 = vpop.eup %1115 }
 0x485   :  { %v1118_v16 = vpop.eup %1117  ;;  %v609_v15 = vmul.f32 %v1116_v39, %v1443_v32  ;;  %v635_v45 = vadd.f32 %v973_v40, %v621_v38 }
 0x486   :  { %v608_v44 = vmul.f32 %v1118_v16, %v1445_v33 }
 0x487   :  { %v623_v24 = vmul.f32 %v972_v9, %v609_v15  ;;  %1129 = vtanh.f32 %v635_v45 }
 0x488   :  { %v1120_v25 = vpop.eup %1119  ;;  %v622_v46 = vmul.f32 %v972_v9, %v608_v44 }
 0x489   :  { %v1122_v47 = vpop.eup %1121  ;;  %v611_v27 = vmul.f32 %v1120_v25, %v1452_v41  ;;  %v637_v51 = vadd.f32 %v973_v40, %v623_v24 }
 0x48a   :  { %v636_v48 = vadd.f32 %v973_v40, %v622_v46  ;;  %v610_v49 = vmul.f32 %v1122_v47, %v1454_v43 }
 0x48b   :  { %v625_v35 = vmul.f32 %v972_v9, %v611_v27 }
 0x48c   :  { %v1124_v52 = vpop.eup %1123  ;;  %1131 = vtanh.f32 %v636_v48  ;;  %v624_v53 = vmul.f32 %v972_v9, %v610_v49 }
 0x48d   :  { %v1126_v54 = vpop.eup %1125  ;;  %v613_v32 = vmul.f32 %v1124_v52, %v1462_v34  ;;  %1133 = vtanh.f32 %v637_v51  ;;  %v639_v56 = vadd.f32 %v973_v40, %v625_v35 }
 0x48e   :  { %v638_v33 = vadd.f32 %v973_v40, %v624_v53  ;;  %v612_v42 = vmul.f32 %v1126_v54, %v1464_v50 }
 0x48f   :  { %v627_v57 = vmul.f32 %v972_v9, %v613_v32 }
 0x490   :  { %v1128_v58 = vpop.eup %1127  ;;  %1135 = vtanh.f32 %v638_v33  ;;  %v626_v41 = vmul.f32 %v972_v9, %v612_v42 }
 0x491   :  { %v614_v43 = vmul.f32 %v1128_v58, %v1472_v55  ;;  %v641_v59 = vadd.f32 %v973_v40, %v627_v57  ;;  %1137 = vtanh.f32 %v639_v56 }
 0x492   :  { %v640_v60 = vadd.f32 %v973_v40, %v626_v41 }
 0x493   :  { %v628_v61 = vmul.f32 %v972_v9, %v614_v43 }
 0x494   :  { %1139 = vtanh.f32 %v640_v60  ;;  %v1130_v34 = vpop.eup %1129 }
 0x495   :  { %v642_v62 = vadd.f32 %v973_v40, %v628_v61  ;;  %1141 = vtanh.f32 %v641_v59 }
 0x497   :  { %1143 = vtanh.f32 %v642_v62 }
 0x499   :  { %v1132_v63 = vpop.eup %1131 }
 0x49a   :  { %v656_v0 = vpack.c.bf16 %v1132_v63, %v1130_v34  ;;  %v1134_v50 = vpop.eup %1133 }
 0x49c   :  { %1055 = vmatprep.mubr.msk.bf16.mxu1 %vm151_vm0, %v656_v0 }
 0x49d   :  { %v1136_v1 = vpop.eup %1135 }
 0x49e   :  { %v657_v2 = vpack.c.bf16 %v1136_v1, %v1134_v50  ;;  %v1138_v3 = vpop.eup %1137 }
 0x4a0   :  { %1056 = vmatmul.mubr.msk.bf16.vlgmr.msra.gmra.mxu1 %vm151_vm0, %v657_v2 }
 0x4a1   :  { %v1140_v55 = vpop.eup %1139 }
 0x4a2   :  { %v658_v4 = vpack.c.bf16 %v1140_v55, %v1138_v3  ;;  %v1142_v5 = vpop.eup %1141 }
 0x4a4   :  { %v1144_v6 = vpop.eup %1143  ;;  %1059 = vmatprep.mubr.msk.bf16.mxu1 %vm151_vm0, %v658_v4 }
 0x4a5   :  { %v659_v7 = vpack.c.bf16 %v1144_v6, %v1142_v5 }
 0x4a8   :  { %1060 = vmatmul.mubr.msk.bf16.gmra.mxu1 %vm151_vm0, %v659_v7 }
 0x560   :  { %v1057_v10 = vpop.f32.mrf.mxu1 }
 0x561   :  { %v723_v11 = vadd.f32 %v1057_v10, %v974_v8 }
 0x562   :  { %v714_v12 = vpop.f32.mrf.mxu1 }
 0x563   :  { %v715_v13 = vadd.f32 %v974_v8, %v714_v12  ;;  %v753_v14 = vsel %vm151_vm0, %v723_v11, 0.0 }
 0x564   :  { %754 = vadd.xlane.f32.xlu1 %v753_v14  ;;  %v1058_v17 = vpop.f32.mrf.mxu1 }
 0x565   :  { %v726_v18 = vadd.f32 %v1058_v17, %v974_v8  ;;  %v747_v22 = vsel %vm151_vm0, %v715_v13, 0.0 }
 0x566   :  { %v717_v19 = vpop.f32.mrf.mxu1 }
 0x567   :  { %v718_v20 = vadd.f32 %v974_v8, %v717_v19  ;;  %v756_v21 = vsel %vm151_vm0, %v726_v18, 0.0 }
 0x568   :  { %757 = vadd.xlane.f32.xlu0 %v756_v21  ;;  %748 = vadd.xlane.f32.xlu1 %v747_v22  ;;  %v1061_v23 = vpop.f32.mrf.mxu1 }
 0x569   :  { %v750_v29 = vsel %vm151_vm0, %v718_v20, 0.0  ;;  %v739_v31 = vadd.f32 %v1061_v23, %v974_v8 }
 0x56a   :  { %v730_v26 = vpop.f32.mrf.mxu1 }
 0x56b   :  { %v731_v28 = vadd.f32 %v974_v8, %v730_v26  ;;  %v765_v40 = vsel %vm151_vm0, %v739_v31, 0.0 }
 0x56c   :  { %751 = vadd.xlane.f32.xlu0 %v750_v29  ;;  %v1062_v30 = vpop.f32.mrf.mxu1 }
 0x56d   :  { %v759_v9 = vsel %vm151_vm0, %v731_v28, 0.0  ;;  %v742_v38 = vadd.f32 %v1062_v30, %v974_v8 }
 0x56e   :  { %v733_v36 = vpop.f32.mrf.mxu1  ;;  %760 = vadd.xlane.f32.xlu1 %v759_v9 }
 0x56f   :  { %v734_v37 = vadd.f32 %v974_v8, %v733_v36  ;;  %v768_v16 = vsel %vm151_vm0, %v742_v38, 0.0 }
 0x571   :  { %v762_v39 = vsel %vm151_vm0, %v734_v37, 0.0 }
 0x572   :  { %763 = vadd.xlane.f32.xlu0 %v762_v39  ;;  %766 = vadd.xlane.f32.xlu1 %v765_v40  ;;  %v979_v40 = vld [vmem:[%s1631_s13] ss:$0 sm:$0xff] }
 0x576   :  { %769 = vadd.xlane.f32.xlu0 %v768_v16 }
 0x5ed   :  { %v755_v15 = vpop.xlane.xlu1 %754 }
 0x5ee   :  { %v773_v44 = vmul.f32 0.03125, %v755_v15 }
 0x5f0   :  { %v1520_v45 = vsub.f32 %v723_v11, %v773_v44 }
 0x5f1   :  { %v749_v24 = vpop.xlane.xlu1 %748  ;;  %v758_v25 = vpop.xlane.xlu0 %757 }
 0x5f2   :  { %v771_v46 = vmul.f32 0.03125, %v749_v24  ;;  %v774_v47 = vmul.f32 0.03125, %v758_v25  ;;  %v789_v27 = vmul.f32 %v1520_v45, %v1520_v45  ;;  %v980_v24 = vld [vmem:[%s1632_s14] ss:$0 sm:$0xff] }
 0x5f4   :  { %v1524_v48 = vsub.f32 %v715_v13, %v771_v46  ;;  %v1526_v49 = vsub.f32 %v726_v18, %v774_v47  ;;  %v801_v51 = vsel %vm151_vm0, %v789_v27, 0.0 }
 0x5f5   :  { %802 = vadd.xlane.f32.xlu1 %v801_v51  ;;  %v752_v35 = vpop.xlane.xlu0 %751 }
 0x5f6   :  { %v772_v52 = vmul.f32 0.03125, %v752_v35  ;;  %v787_v53 = vmul.f32 %v1524_v48, %v1524_v48  ;;  %v790_v54 = vmul.f32 %v1526_v49, %v1526_v49 }
 0x5f7   :  { %v761_v32 = vpop.xlane.xlu1 %760 }
 0x5f8   :  { %v1533_v33 = vsub.f32 %v718_v20, %v772_v52  ;;  %v775_v42 = vmul.f32 0.03125, %v761_v32  ;;  %v795_v56 = vsel %vm151_vm0, %v787_v53, 0.0  ;;  %v804_v57 = vsel %vm151_vm0, %v790_v54, 0.0 }
 0x5f9   :  { %796 = vadd.xlane.f32.xlu1 %v795_v56  ;;  %805 = vadd.xlane.f32.xlu0 %v804_v57 }
 0x5fa   :  { %v1537_v58 = vsub.f32 %v731_v28, %v775_v42  ;;  %v788_v41 = vmul.f32 %v1533_v33, %v1533_v33 }
 0x5fb   :  { %v767_v43 = vpop.xlane.xlu1 %766  ;;  %v764_v59 = vpop.xlane.xlu0 %763 }
 0x5fc   :  { %v777_v60 = vmul.f32 0.03125, %v767_v43  ;;  %v776_v61 = vmul.f32 0.03125, %v764_v59  ;;  %v798_v62 = vsel %vm151_vm0, %v788_v41, 0.0  ;;  %v791_v34 = vmul.f32 %v1537_v58, %v1537_v58 }
 0x5fd   :  { %799 = vadd.xlane.f32.xlu0 %v798_v62 }
 0x5fe   :  { %v1544_v63 = vsub.f32 %v739_v31, %v777_v60  ;;  %v1546_v0 = vsub.f32 %v734_v37, %v776_v61  ;;  %v807_v50 = vsel %vm151_vm0, %v791_v34, 0.0 }
 0x5ff   :  { %808 = vadd.xlane.f32.xlu1 %v807_v50  ;;  %v770_v1 = vpop.xlane.xlu0 %769 }
 0x600   :  { %v778_v2 = vmul.f32 0.03125, %v770_v1  ;;  %v793_v3 = vmul.f32 %v1544_v63, %v1544_v63  ;;  %v792_v55 = vmul.f32 %v1546_v0, %v1546_v0 }
 0x602   :  { %v1553_v4 = vsub.f32 %v742_v38, %v778_v2  ;;  %v813_v5 = vsel %vm151_vm0, %v793_v3, 0.0  ;;  %v810_v6 = vsel %vm151_vm0, %v792_v55, 0.0 }
 0x603   :  { %814 = vadd.xlane.f32.xlu1 %v813_v5  ;;  %811 = vadd.xlane.f32.xlu0 %v810_v6 }
 0x604   :  { %v794_v7 = vmul.f32 %v1553_v4, %v1553_v4 }
 0x606   :  { %v816_v8 = vsel %vm151_vm0, %v794_v7, 0.0 }
 0x607   :  { %817 = vadd.xlane.f32.xlu0 %v816_v8 }
 0x67e   :  { %v803_v10 = vpop.xlane.xlu1 %802 }
 0x67f   :  { %v821_v11 = vmul.f32 0.03125, %v803_v10 }
 0x681   :  { %v829_v12 = vadd.f32 1e-05, %v821_v11 }
 0x682   :  { %v797_v13 = vpop.xlane.xlu1 %796  ;;  %v806_v14 = vpop.xlane.xlu0 %805 }
 0x683   :  { %1145 = vrsqrt.f32 %v829_v12  ;;  %v819_v17 = vmul.f32 0.03125, %v797_v13  ;;  %v822_v18 = vmul.f32 0.03125, %v806_v14 }
 0x685   :  { %v827_v19 = vadd.f32 1e-05, %v819_v17  ;;  %v830_v20 = vadd.f32 1e-05, %v822_v18 }
 0x686   :  { %v800_v21 = vpop.xlane.xlu0 %799 }
 0x687   :  { %1147 = vrsqrt.f32 %v827_v19  ;;  %v820_v22 = vmul.f32 0.03125, %v800_v21  ;;  %v1179_v19 = vld [vmem:[%s1618_s2 + $0x10] sm:$0xff]  }
 0x688   :  { %1149 = vrsqrt.f32 %v830_v20  ;;  %v809_v23 = vpop.xlane.xlu1 %808  ;;  %v891_v20 = vunpack.c.l.bf16 %v1179_v19 }
 0x689   :  { %v828_v26 = vadd.f32 1e-05, %v820_v22  ;;  %v823_v28 = vmul.f32 0.03125, %v809_v23 }
 0x68b   :  { %1151 = vrsqrt.f32 %v828_v26  ;;  %v831_v29 = vadd.f32 1e-05, %v823_v28 }
 0x68c   :  { %v815_v30 = vpop.xlane.xlu1 %814  ;;  %v812_v31 = vpop.xlane.xlu0 %811 }
 0x68d   :  { %1153 = vrsqrt.f32 %v831_v29  ;;  %v825_v9 = vmul.f32 0.03125, %v815_v30  ;;  %v824_v36 = vmul.f32 0.03125, %v812_v31  ;;  %v1180_v29 = vld [vmem:[%s1618_s2 + $0x18] sm:$0xff]  }
 0x68e   :  { %v893_v30 = vunpack.c.l.bf16 %v1180_v29 }
 0x68f   :  { %v833_v37 = vadd.f32 1e-05, %v825_v9  ;;  %v832_v38 = vadd.f32 1e-05, %v824_v36  ;;  %v892_v36 = vunpack.c.h.bf16 %v1179_v19 }
 0x690   :  { %v1146_v39 = vpop.eup %1145  ;;  %v818_v16 = vpop.xlane.xlu0 %817 }
 0x691   :  { %v845_v15 = vmul.f32 %v1146_v39, %v1520_v45  ;;  %1155 = vrsqrt.f32 %v833_v37  ;;  %v826_v44 = vmul.f32 0.03125, %v818_v16 }
 0x692   :  { %1157 = vrsqrt.f32 %v832_v38 }
 0x693   :  { %v859_v25 = vmul.f32 %v979_v40, %v845_v15  ;;  %v834_v46 = vadd.f32 1e-05, %v826_v44 }
 0x694   :  { %v1148_v47 = vpop.eup %1147 }
 0x695   :  { %v1150_v27 = vpop.eup %1149  ;;  %v873_v51 = vadd.f32 %v980_v24, %v859_v25  ;;  %v843_v35 = vmul.f32 %v1148_v47, %v1524_v48  ;;  %1159 = vrsqrt.f32 %v834_v46 }
 0x696   :  { %v846_v52 = vmul.f32 %v1150_v27, %v1526_v49 }
 0x697   :  { %1161 = vtanh.f32 %v873_v51  ;;  %v857_v53 = vmul.f32 %v979_v40, %v843_v35 }
 0x698   :  { %v1152_v45 = vpop.eup %1151  ;;  %v860_v54 = vmul.f32 %v979_v40, %v846_v52 }
 0x699   :  { %v871_v32 = vadd.f32 %v980_v24, %v857_v53  ;;  %v844_v42 = vmul.f32 %v1152_v45, %v1533_v33  ;;  %v1177_v33 = vld [vmem:[%s1618_s2 + $0x8] sm:$0xff]  }
 0x69a   :  { %v1154_v56 = vpop.eup %1153  ;;  %v874_v57 = vadd.f32 %v980_v24, %v860_v54  ;;  %v889_v50 = vunpack.c.l.bf16 %v1177_v33  ;;  %v890_v10 = vunpack.c.h.bf16 %v1177_v33 }
 0x69b   :  { %1163 = vtanh.f32 %v871_v32  ;;  %v858_v41 = vmul.f32 %v979_v40, %v844_v42  ;;  %v847_v43 = vmul.f32 %v1154_v56, %v1537_v58 }
 0x69c   :  { %1165 = vtanh.f32 %v874_v57 }
 0x69d   :  { %v872_v59 = vadd.f32 %v980_v24, %v858_v41  ;;  %v861_v60 = vmul.f32 %v979_v40, %v847_v43 }
 0x69e   :  { %v1156_v48 = vpop.eup %1155 }
 0x69f   :  { %v1158_v61 = vpop.eup %1157  ;;  %1167 = vtanh.f32 %v872_v59  ;;  %v875_v49 = vadd.f32 %v980_v24, %v861_v60  ;;  %v849_v62 = vmul.f32 %v1156_v48, %v1544_v63  ;;  %v1178_v63 = vld [vmem:[%s1618_s2] sm:$0xff]  }
 0x6a0   :  { %v848_v34 = vmul.f32 %v1158_v61, %v1546_v0  ;;  %v887_v7 = vunpack.c.l.bf16 %v1178_v63  ;;  %v888_v17 = vunpack.c.h.bf16 %v1178_v63 }
 0x6a1   :  { %1169 = vtanh.f32 %v875_v49  ;;  %v863_v1 = vmul.f32 %v979_v40, %v849_v62 }
 0x6a2   :  { %v1160_v2 = vpop.eup %1159  ;;  %v862_v58 = vmul.f32 %v979_v40, %v848_v34 }
 0x6a3   :  { %v877_v3 = vadd.f32 %v980_v24, %v863_v1  ;;  %v850_v55 = vmul.f32 %v1160_v2, %v1553_v4 }
 0x6a4   :  { %v1162_v5 = vpop.eup %1161  ;;  %v876_v6 = vadd.f32 %v980_v24, %v862_v58 }
 0x6a5   :  { %v897_v0 = vadd.f32 %v1162_v5, %v889_v50  ;;  %1171 = vtanh.f32 %v877_v3  ;;  %v864_v8 = vmul.f32 %v979_v40, %v850_v55  ;;  %v894_v40 = vunpack.c.h.bf16 %v1180_v29 }
 0x6a6   :  { %1173 = vtanh.f32 %v876_v6 }
 0x6a7   :  { %v991_v11 = vpack.c.bf16 %v897_v0, %v897_v0  ;;  %v878_v12 = vadd.f32 %v980_v24, %v864_v8 }
 0x6a8   :  { %v1164_v13 = vpop.eup %1163 }
 0x6a9   :  { %v1166_v14 = vpop.eup %1165  ;;  %938 = vst.msk [vmem:[%s1633_s15 + $0x8] sm:$0xf] %vm935_vm3, %v991_v11  ;;  %v895_v4 = vadd.f32 %v1164_v13, %v887_v7  ;;  %1175 = vtanh.f32 %v878_v12 }
 0x6aa   :  { %v898_v18 = vadd.f32 %v1166_v14, %v890_v10 }
 0x6ab   :  { %v989_v21 = vpack.c.bf16 %v895_v4, %v895_v4 }
 0x6ac   :  { %v1168_v22 = vpop.eup %1167  ;;  %v992_v23 = vpack.c.bf16 %v898_v18, %v898_v18 }
 0x6ad   :  { %936 = vst.msk [vmem:[%s1633_s15] sm:$0xf] %vm935_vm3, %v989_v21  ;;  %v896_v26 = vadd.f32 %v1168_v22, %v888_v17 }
 0x6ae   :  { %v1170_v28 = vpop.eup %1169  ;;  %939 = vst.msk [vmem:[%s1633_s15 + $0xc] sm:$0xf] %vm935_vm3, %v992_v23 }
 0x6af   :  { %v990_v31 = vpack.c.bf16 %v896_v26, %v896_v26  ;;  %v899_v9 = vadd.f32 %v1170_v28, %v891_v20 }
 0x6b1   :  { %937 = vst.msk [vmem:[%s1633_s15 + $0x4] sm:$0xf] %vm935_vm3, %v990_v31  ;;  %v993_v37 = vpack.c.bf16 %v899_v9, %v899_v9 }
 0x6b2   :  { %v1172_v38 = vpop.eup %1171 }
 0x6b3   :  { %v1174_v39 = vpop.eup %1173  ;;  %940 = vst.msk [vmem:[%s1633_s15 + $0x10] sm:$0xf] %vm935_vm3, %v993_v37  ;;  %v901_v16 = vadd.f32 %v1172_v38, %v893_v30 }
 0x6b4   :  { %v900_v15 = vadd.f32 %v1174_v39, %v892_v36 }
 0x6b5   :  { %v995_v44 = vpack.c.bf16 %v901_v16, %v901_v16 }
 0x6b6   :  { %v1176_v24 = vpop.eup %1175  ;;  %v994_v25 = vpack.c.bf16 %v900_v15, %v900_v15 }
 0x6b7   :  { %942 = vst.msk [vmem:[%s1633_s15 + $0x18] sm:$0xf] %vm935_vm3, %v995_v44  ;;  %v902_v46 = vadd.f32 %v1176_v24, %v894_v40 }
 0x6b8   :  { %941 = vst.msk [vmem:[%s1633_s15 + $0x14] sm:$0xf] %vm935_vm3, %v994_v25 }
 0x6b9   :  { %v996_v47 = vpack.c.bf16 %v902_v46, %v902_v46 }
 0x6bb   :  { %943 = vst.msk [vmem:[%s1633_s15 + $0x1c] sm:$0xf] %vm935_vm3, %v996_v47 }

// kernel: _lambda_.10
= control target key start
LH: loop header
LB: loop body
LE: loop exit
PB: predicated region body
PF: predicated region fallthrough
CT: control target
= control target key end

     0   :  { %s1948_s18 = smov 32   ;;  %vm174_vm0 = vcmask 261120   ;;  %vm218_vm1 = vcmask 523264   ;;  %vm1381_vm2 = vcmask 257024   ;;  %s2816_s1 = inlined_call_operand.vmem [shape: bf16[128,32], index: 1, kind: input, shape index: {}]   ;;  %s2817_s2 = inlined_call_operand.vmem [shape: f32[64,32], index: 2, kind: input, shape index: {}]   ;;  %s2818_s0 = inlined_call_operand.vmem [shape: bf16[128,32], index: 0, kind: input, shape index: {}]   ;;  %s2819_s3 = inlined_call_operand.vmem [shape: f32[1,32], index: 3, kind: input, shape index: {}]   ;;  %s2820_s6 = inlined_call_operand.vmem [shape: f32[32,32], index: 6, kind: input, shape index: {}]   ;;  %s2821_s4 = inlined_call_operand.vmem [shape: f32[1,32], index: 4, kind: input, shape index: {}, may-alias: {4,8}]   ;;  %s2822_s5 = inlined_call_operand.vmem [shape: f32[1,32], index: 5, kind: input, shape index: {}, may-alias: {5,9}]   ;;  %s2823_s7 = inlined_call_operand.vmem [shape: f32[1,32], index: 7, kind: input, shape index: {}]   ;;  %s2824_s11 = inlined_call_operand.<no memory space> [shape: f32[1,1], index: 11, kind: input, shape index: {}]   ;;  %s2825_s8 = inlined_call_operand.vmem [shape: f32[1,32], index: 8, kind: input, shape index: {}, may-alias: {4,8}]   ;;  %s2826_s9 = inlined_call_operand.vmem [shape: f32[1,32], index: 9, kind: input, shape index: {}, may-alias: {5,9}]   ;;  %s2827_s10 = inlined_call_operand.vmem [shape: f32[1,32], index: 10, kind: input, shape index: {}]   ;;  %s2828_s12 = inlined_call_operand.vmem [shape: bf16[128,32], index: 12, kind: output, shape index: {0}]   ;;  %s2829_s13 = inlined_call_operand.vmem [shape: bf16[128,32], index: 13, kind: output, shape index: {1}]  }
   0x1   :  { %v62_v0 = vld [vmem:[%s2816_s1] sm:$0xff]   ;;  %v64_v1 = vld [vmem:[%s2816_s1 + $0x8] sm:$0xff]   ;;  %v66_v2 = vld [vmem:[%s2816_s1 + $0x10] sm:$0xff]  }
   0x2   :  { %v68_v3 = vld [vmem:[%s2816_s1 + $0x18] sm:$0xff]   ;;  %v205_v4 = vld [vmem:[%s2817_s2 + $0x30] sm:$0xff]  ;;  %158 = vrot.lane.b32.xlu0 %v62_v0, %s1948_s18  ;;  %v203_v6 = vld [vmem:[%s2817_s2 + $0x20] sm:$0xff] }
   0x3   :  { %v206_v5 = vld [vmem:[%s2817_s2 + $0x38] sm:$0xff]  ;;  %v204_v7 = vld [vmem:[%s2817_s2 + $0x28] sm:$0xff]  ;;  %162 = vrot.lane.b32.xlu1 %v66_v2, %s1948_s18  ;;  %v70_v8 = vld [vmem:[%s2816_s1 + $0x20] sm:$0xff]  }
   0x4   :  { %v211_v9 = vpack.c.bf16 %v206_v5, %v205_v4  ;;  %v210_v10 = vpack.c.bf16 %v204_v7, %v203_v6  ;;  %v72_v11 = vld [vmem:[%s2816_s1 + $0x28] sm:$0xff]   ;;  %v201_v12 = vld [vmem:[%s2817_s2 + $0x10] sm:$0xff]  ;;  %v202_v13 = vld [vmem:[%s2817_s2 + $0x18] sm:$0xff] }
   0x5   :  { %v74_v14 = vld [vmem:[%s2816_s1 + $0x30] sm:$0xff]   ;;  %v209_v15 = vpack.c.bf16 %v202_v13, %v201_v12  ;;  %v76_v16 = vld [vmem:[%s2816_s1 + $0x38] sm:$0xff]   ;;  %v199_v17 = vld [vmem:[%s2817_s2] sm:$0xff] }
   0x6   :  { %1660 = vmatprep.subr.bf16.mxu0 %v211_v9  ;;  %160 = vrot.lane.b32.xlu0 %v64_v1, %s1948_s18  ;;  %v200_v18 = vld [vmem:[%s2817_s2 + $0x8] sm:$0xff]  ;;  %v46_v20 = vld [vmem:[%s2818_s0] sm:$0xff]   ;;  %v50_v21 = vld [vmem:[%s2818_s0 + $0x10] sm:$0xff]  }
   0x7   :  { %1661 = vmatpush3.bf16.msra.mxu0 %v211_v9  ;;  %164 = vrot.lane.b32.xlu1 %v68_v3, %s1948_s18  ;;  %v208_v19 = vpack.c.bf16 %v200_v18, %v199_v17  ;;  %v48_v22 = vld [vmem:[%s2818_s0 + $0x8] sm:$0xff]   ;;  %v52_v28 = vld [vmem:[%s2818_s0 + $0x18] sm:$0xff]   ;;  %v54_v30 = vld [vmem:[%s2818_s0 + $0x20] sm:$0xff]  }
   0x8   :  { %1662 = vmatprep.subr.bf16.mxu0 %v210_v10  ;;  %v56_v35 = vld [vmem:[%s2818_s0 + $0x28] sm:$0xff]   ;;  %v58_v36 = vld [vmem:[%s2818_s0 + $0x30] sm:$0xff]   ;;  %v60_v41 = vld [vmem:[%s2818_s0 + $0x38] sm:$0xff]  }
   0x9   :  { %v1534_v45 = vld [vmem:[%s2819_s3] ss:$0 sm:$0xff] }
   0xa   :  { %166 = vrot.lane.b32.xlu0 %v70_v8, %s1948_s18 }
   0xb   :  { %1663 = vmatpush3.bf16.msra.mxu0 %v210_v10  ;;  %168 = vrot.lane.b32.xlu1 %v72_v11, %s1948_s18 }
   0xc   :  { %1664 = vmatprep.subr.bf16.mxu0 %v209_v15 }
   0xe   :  { %170 = vrot.lane.b32.xlu0 %v74_v14, %s1948_s18 }
   0xf   :  { %1665 = vmatpush3.bf16.msra.mxu0 %v209_v15  ;;  %172 = vrot.lane.b32.xlu1 %v76_v16, %s1948_s18 }
  0x10   :  { %1666 = vmatprep.subr.bf16.mxu0 %v208_v19 }
  0x13   :  { %1667 = vmatpush3.bf16.msra.mxu0 %v208_v19 }
  0x74   :  { %v159_v23 = vpop.permute.xlu0 %158 }
  0x75   :  { %v177_v24 = vsel %vm174_vm0, %v46_v20, %v159_v23  ;;  %v163_v25 = vpop.permute.xlu1 %162 }
  0x76   :  { %1668 = vmatprep.mubr.msk.bf16.mxu0 %vm218_vm1, %v177_v24  ;;  %v183_v27 = vsel %vm174_vm0, %v50_v21, %v163_v25 }
  0x78   :  { %v161_v26 = vpop.permute.xlu0 %160 }
  0x79   :  { %v180_v29 = vsel %vm174_vm0, %v48_v22, %v161_v26  ;;  %v165_v31 = vpop.permute.xlu1 %164 }
  0x7a   :  { %1669 = vmatmul.mubr.msk.bf16.vlgmr.msra.gmra.mxu0 %vm218_vm1, %v180_v29  ;;  %v186_v33 = vsel %vm174_vm0, %v52_v28, %v165_v31 }
  0x7b   :  { %1672 = vmatprep.mubr.msk.bf16.mxu0 %vm218_vm1, %v183_v27 }
  0x7c   :  { %v167_v32 = vpop.permute.xlu0 %166 }
  0x7d   :  { %v189_v34 = vsel %vm174_vm0, %v54_v30, %v167_v32  ;;  %v169_v37 = vpop.permute.xlu1 %168 }
  0x7e   :  { %v192_v39 = vsel %vm174_vm0, %v56_v35, %v169_v37 }
  0x80   :  { %v171_v38 = vpop.permute.xlu0 %170 }
  0x81   :  { %v195_v40 = vsel %vm174_vm0, %v58_v36, %v171_v38  ;;  %v173_v42 = vpop.permute.xlu1 %172 }
  0x82   :  { %1673 = vmatmul.mubr.msk.bf16.gmra.mxu0 %vm218_vm1, %v186_v33  ;;  %v198_v43 = vsel %vm174_vm0, %v60_v41, %v173_v42 }
  0x83   :  { %1676 = vmatprep.mubr.msk.bf16.mxu0 %vm218_vm1, %v189_v34 }
  0x8a   :  { %1677 = vmatmul.mubr.msk.bf16.gmra.mxu0 %vm218_vm1, %v192_v39 }
  0x8b   :  { %1680 = vmatprep.mubr.msk.bf16.mxu0 %vm218_vm1, %v195_v40 }
  0x92   :  { %1681 = vmatmul.mubr.msk.bf16.gmra.mxu0 %vm218_vm1, %v198_v43 }
 0x13a   :  { %v1670_v44 = vpop.f32.mrf.mxu0 }
 0x13b   :  { %v2113_v49 = vadd.f32 %v1670_v44, %v1534_v45 }
 0x13c   :  { %v269_v46 = vpop.f32.mrf.mxu0 }
 0x13d   :  { %v2111_v47 = vadd.f32 %v1534_v45, %v269_v46  ;;  %v340_v56 = vsel %vm174_vm0, %v2113_v49, 0.0 }
 0x13e   :  { %v1671_v48 = vpop.f32.mrf.mxu0 }
 0x13f   :  { %v334_v50 = vsel %vm174_vm0, %v2111_v47, 0.0  ;;  %v2119_v54 = vadd.f32 %v1671_v48, %v1534_v45 }
 0x140   :  { %v272_v51 = vpop.f32.mrf.mxu0  ;;  %335 = vadd.xlane.f32.xlu0 %v334_v50 }
 0x141   :  { %v2117_v52 = vadd.f32 %v1534_v45, %v272_v51  ;;  %v343_v62 = vsel %vm174_vm0, %v2119_v54, 0.0 }
 0x142   :  { %v1674_v53 = vpop.f32.mrf.mxu0 }
 0x143   :  { %v337_v55 = vsel %vm174_vm0, %v2117_v52, 0.0  ;;  %v2127_v60 = vadd.f32 %v1674_v53, %v1534_v45 }
 0x144   :  { %v285_v57 = vpop.f32.mrf.mxu0  ;;  %338 = vadd.xlane.f32.xlu1 %v337_v55  ;;  %341 = vadd.xlane.f32.xlu0 %v340_v56 }
 0x145   :  { %v2125_v58 = vadd.f32 %v1534_v45, %v285_v57  ;;  %v352_v3 = vsel %vm174_vm0, %v2127_v60, 0.0 }
 0x146   :  { %v1675_v59 = vpop.f32.mrf.mxu0 }
 0x147   :  { %v346_v61 = vsel %vm174_vm0, %v2125_v58, 0.0  ;;  %v2135_v2 = vadd.f32 %v1675_v59, %v1534_v45 }
 0x148   :  { %v288_v63 = vpop.f32.mrf.mxu0  ;;  %347 = vadd.xlane.f32.xlu1 %v346_v61  ;;  %344 = vadd.xlane.f32.xlu0 %v343_v62 }
 0x149   :  { %v2133_v0 = vadd.f32 %v1534_v45, %v288_v63  ;;  %v355_v10 = vsel %vm174_vm0, %v2135_v2, 0.0 }
 0x14a   :  { %v1678_v1 = vpop.f32.mrf.mxu0 }
 0x14b   :  { %v349_v4 = vsel %vm174_vm0, %v2133_v0, 0.0  ;;  %v2141_v6 = vadd.f32 %v1678_v1, %v1534_v45 }
 0x14c   :  { %v301_v5 = vpop.f32.mrf.mxu0  ;;  %353 = vadd.xlane.f32.xlu1 %v352_v3  ;;  %350 = vadd.xlane.f32.xlu0 %v349_v4 }
 0x14d   :  { %v2143_v7 = vadd.f32 %v1534_v45, %v301_v5  ;;  %v364_v13 = vsel %vm174_vm0, %v2141_v6, 0.0 }
 0x14e   :  { %v1679_v8 = vpop.f32.mrf.mxu0 }
 0x14f   :  { %v358_v9 = vsel %vm174_vm0, %v2143_v7, 0.0  ;;  %v2153_v15 = vadd.f32 %v1679_v8, %v1534_v45 }
 0x150   :  { %v304_v11 = vpop.f32.mrf.mxu0  ;;  %359 = vadd.xlane.f32.xlu1 %v358_v9  ;;  %356 = vadd.xlane.f32.xlu0 %v355_v10 }
 0x151   :  { %v2149_v12 = vadd.f32 %v1534_v45, %v304_v11  ;;  %v367_v22 = vsel %vm174_vm0, %v2153_v15, 0.0 }
 0x152   :  { %v1682_v14 = vpop.f32.mrf.mxu0 }
 0x153   :  { %v361_v16 = vsel %vm174_vm0, %v2149_v12, 0.0  ;;  %v2157_v18 = vadd.f32 %v1682_v14, %v1534_v45 }
 0x154   :  { %v317_v17 = vpop.f32.mrf.mxu0  ;;  %365 = vadd.xlane.f32.xlu1 %v364_v13  ;;  %362 = vadd.xlane.f32.xlu0 %v361_v16 }
 0x155   :  { %v2159_v19 = vadd.f32 %v1534_v45, %v317_v17  ;;  %v376_v26 = vsel %vm174_vm0, %v2157_v18, 0.0 }
 0x156   :  { %v1683_v20 = vpop.f32.mrf.mxu0 }
 0x157   :  { %v370_v21 = vsel %vm174_vm0, %v2159_v19, 0.0  ;;  %v2165_v24 = vadd.f32 %v1683_v20, %v1534_v45 }
 0x158   :  { %v320_v23 = vpop.f32.mrf.mxu0  ;;  %371 = vadd.xlane.f32.xlu1 %v370_v21  ;;  %368 = vadd.xlane.f32.xlu0 %v367_v22 }
 0x159   :  { %v2167_v25 = vadd.f32 %v1534_v45, %v320_v23  ;;  %v379_v28 = vsel %vm174_vm0, %v2165_v24, 0.0 }
 0x15b   :  { %v373_v27 = vsel %vm174_vm0, %v2167_v25, 0.0 }
 0x15c   :  { %377 = vadd.xlane.f32.xlu1 %v376_v26  ;;  %374 = vadd.xlane.f32.xlu0 %v373_v27 }
 0x160   :  { %380 = vadd.xlane.f32.xlu0 %v379_v28 }
 0x1c9   :  { %v336_v29 = vpop.xlane.xlu0 %335 }
 0x1ca   :  { %v383_v30 = vmul.f32 0.03125, %v336_v29 }
 0x1cc   :  { %v2176_v31 = vsub.f32 %v2111_v47, %v383_v30 }
 0x1cd   :  { %v339_v32 = vpop.xlane.xlu1 %338  ;;  %v342_v33 = vpop.xlane.xlu0 %341 }
 0x1ce   :  { %v384_v34 = vmul.f32 0.03125, %v339_v32  ;;  %v385_v35 = vmul.f32 0.03125, %v342_v33  ;;  %v415_v36 = vmul.f32 %v2176_v31, %v2176_v31 }
 0x1d0   :  { %v2181_v37 = vsub.f32 %v2117_v52, %v384_v34  ;;  %v2184_v38 = vsub.f32 %v2113_v49, %v385_v35  ;;  %v431_v39 = vsel %vm174_vm0, %v415_v36, 0.0 }
 0x1d1   :  { %v348_v40 = vpop.xlane.xlu1 %347  ;;  %432 = vadd.xlane.f32.xlu1 %v431_v39  ;;  %v345_v41 = vpop.xlane.xlu0 %344 }
 0x1d2   :  { %v387_v42 = vmul.f32 0.03125, %v348_v40  ;;  %v386_v43 = vmul.f32 0.03125, %v345_v41  ;;  %v416_v44 = vmul.f32 %v2181_v37, %v2181_v37  ;;  %v417_v45 = vmul.f32 %v2184_v38, %v2184_v38 }
 0x1d4   :  { %v2192_v46 = vsub.f32 %v2125_v58, %v387_v42  ;;  %v2195_v47 = vsub.f32 %v2119_v54, %v386_v43  ;;  %v434_v48 = vsel %vm174_vm0, %v416_v44, 0.0  ;;  %v437_v49 = vsel %vm174_vm0, %v417_v45, 0.0 }
 0x1d5   :  { %v354_v50 = vpop.xlane.xlu1 %353  ;;  %435 = vadd.xlane.f32.xlu0 %v434_v48  ;;  %438 = vadd.xlane.f32.xlu1 %v437_v49  ;;  %v351_v51 = vpop.xlane.xlu0 %350 }
 0x1d6   :  { %v389_v52 = vmul.f32 0.03125, %v354_v50  ;;  %v388_v53 = vmul.f32 0.03125, %v351_v51  ;;  %v419_v55 = vmul.f32 %v2192_v46, %v2192_v46  ;;  %v418_v56 = vmul.f32 %v2195_v47, %v2195_v47  ;;  %v605_v51 = vld [vmem:[%s2820_s6 + $0x10] sm:$0xff] }
 0x1d8   :  { %v2204_v57 = vsub.f32 %v2127_v60, %v389_v52  ;;  %v2207_v54 = vsub.f32 %v2133_v0, %v388_v53  ;;  %v443_v58 = vsel %vm174_vm0, %v419_v55, 0.0  ;;  %v440_v59 = vsel %vm174_vm0, %v418_v56, 0.0  ;;  %v603_v53 = vld [vmem:[%s2820_s6] sm:$0xff]  ;;  %v604_v55 = vld [vmem:[%s2820_s6 + $0x8] sm:$0xff] }
 0x1d9   :  { %v360_v61 = vpop.xlane.xlu1 %359  ;;  %444 = vadd.xlane.f32.xlu1 %v443_v58  ;;  %441 = vadd.xlane.f32.xlu0 %v440_v59  ;;  %v357_v62 = vpop.xlane.xlu0 %356  ;;  %v616_v56 = vpack.c.bf16 %v604_v55, %v603_v53 }
 0x1da   :  { %v391_v63 = vmul.f32 0.03125, %v360_v61  ;;  %v390_v1 = vmul.f32 0.03125, %v357_v62  ;;  %v421_v3 = vmul.f32 %v2204_v57, %v2204_v57  ;;  %v420_v60 = vmul.f32 %v2207_v54, %v2207_v54 }
 0x1dc   :  { %v2216_v4 = vsub.f32 %v2143_v7, %v391_v63  ;;  %v2219_v0 = vsub.f32 %v2135_v2, %v390_v1  ;;  %v449_v5 = vsel %vm174_vm0, %v421_v3, 0.0  ;;  %v446_v8 = vsel %vm174_vm0, %v420_v60, 0.0 }
 0x1dd   :  { %v366_v9 = vpop.xlane.xlu1 %365  ;;  %450 = vadd.xlane.f32.xlu1 %v449_v5  ;;  %447 = vadd.xlane.f32.xlu0 %v446_v8  ;;  %v363_v10 = vpop.xlane.xlu0 %362 }
 0x1de   :  { %v393_v11 = vmul.f32 0.03125, %v366_v9  ;;  %v392_v13 = vmul.f32 0.03125, %v363_v10  ;;  %v423_v14 = vmul.f32 %v2216_v4, %v2216_v4  ;;  %v422_v7 = vmul.f32 %v2219_v0, %v2219_v0 }
 0x1e0   :  { %v2228_v16 = vsub.f32 %v2141_v6, %v393_v11  ;;  %v2231_v2 = vsub.f32 %v2149_v12, %v392_v13  ;;  %v455_v17 = vsel %vm174_vm0, %v423_v14, 0.0  ;;  %v452_v20 = vsel %vm174_vm0, %v422_v7, 0.0 }
 0x1e1   :  { %v372_v21 = vpop.xlane.xlu1 %371  ;;  %456 = vadd.xlane.f32.xlu1 %v455_v17  ;;  %453 = vadd.xlane.f32.xlu0 %v452_v20  ;;  %v369_v22 = vpop.xlane.xlu0 %368 }
 0x1e2   :  { %v395_v23 = vmul.f32 0.03125, %v372_v21  ;;  %v394_v26 = vmul.f32 0.03125, %v369_v22  ;;  %v425_v27 = vmul.f32 %v2228_v16, %v2228_v16  ;;  %v424_v6 = vmul.f32 %v2231_v2, %v2231_v2 }
 0x1e4   :  { %v2240_v28 = vsub.f32 %v2159_v19, %v395_v23  ;;  %v2243_v12 = vsub.f32 %v2153_v15, %v394_v26  ;;  %v461_v29 = vsel %vm174_vm0, %v425_v27, 0.0  ;;  %v458_v30 = vsel %vm174_vm0, %v424_v6, 0.0 }
 0x1e5   :  { %v378_v32 = vpop.xlane.xlu1 %377  ;;  %462 = vadd.xlane.f32.xlu1 %v461_v29  ;;  %459 = vadd.xlane.f32.xlu0 %v458_v30  ;;  %v375_v33 = vpop.xlane.xlu0 %374 }
 0x1e6   :  { %v397_v34 = vmul.f32 0.03125, %v378_v32  ;;  %v396_v35 = vmul.f32 0.03125, %v375_v33  ;;  %v427_v36 = vmul.f32 %v2240_v28, %v2240_v28  ;;  %v426_v19 = vmul.f32 %v2243_v12, %v2243_v12  ;;  %v2286_v32 = vld [vmem:[%s2821_s4] ss:$0 sm:$0xff] }
 0x1e8   :  { %v2252_v39 = vsub.f32 %v2157_v18, %v397_v34  ;;  %v2255_v15 = vsub.f32 %v2167_v25, %v396_v35  ;;  %v467_v40 = vsel %vm174_vm0, %v427_v36, 0.0  ;;  %v464_v41 = vsel %vm174_vm0, %v426_v19, 0.0 }
 0x1e9   :  { %468 = vadd.xlane.f32.xlu1 %v467_v40  ;;  %465 = vadd.xlane.f32.xlu0 %v464_v41  ;;  %v381_v42 = vpop.xlane.xlu0 %380  ;;  %v2293_v41 = vld [vmem:[%s2822_s5] ss:$0 sm:$0xff] }
 0x1ea   :  { %v398_v43 = vmul.f32 0.03125, %v381_v42  ;;  %v429_v44 = vmul.f32 %v2252_v39, %v2252_v39  ;;  %v428_v45 = vmul.f32 %v2255_v15, %v2255_v15 }
 0x1ec   :  { %v2264_v18 = vsub.f32 %v2165_v24, %v398_v43  ;;  %v473_v25 = vsel %vm174_vm0, %v429_v44, 0.0  ;;  %v470_v48 = vsel %vm174_vm0, %v428_v45, 0.0  ;;  %v606_v24 = vld [vmem:[%s2820_s6 + $0x18] sm:$0xff] }
 0x1ed   :  { %474 = vadd.xlane.f32.xlu1 %v473_v25  ;;  %471 = vadd.xlane.f32.xlu0 %v470_v48  ;;  %v617_v52 = vpack.c.bf16 %v606_v24, %v605_v51 }
 0x1ee   :  { %v430_v49 = vmul.f32 %v2264_v18, %v2264_v18 }
 0x1ef   :  { %1684 = vmatprep.subr.bf16.mxu1 %v617_v52 }
 0x1f0   :  { %v476_v50 = vsel %vm174_vm0, %v430_v49, 0.0  ;;  %1685 = vmatpush3.bf16.msra.mxu1 %v617_v52 }
 0x1f1   :  { %477 = vadd.xlane.f32.xlu0 %v476_v50  ;;  %1686 = vmatprep.subr.bf16.mxu1 %v616_v56 }
 0x1f4   :  { %1687 = vmatpush3.bf16.msra.mxu1 %v616_v56 }
 0x25a   :  { %v433_v58 = vpop.xlane.xlu1 %432 }
 0x25b   :  { %v479_v59 = vmul.f32 0.03125, %v433_v58 }
 0x25d   :  { %v495_v61 = vadd.f32 1e-05, %v479_v59 }
 0x25e   :  { %v439_v62 = vpop.xlane.xlu1 %438  ;;  %v436_v63 = vpop.xlane.xlu0 %435 }
 0x25f   :  { %1740 = vrsqrt.f32 %v495_v61  ;;  %v481_v1 = vmul.f32 0.03125, %v439_v62  ;;  %v480_v3 = vmul.f32 0.03125, %v436_v63 }
 0x261   :  { %v497_v60 = vadd.f32 1e-05, %v481_v1  ;;  %v496_v5 = vadd.f32 1e-05, %v480_v3 }
 0x262   :  { %v445_v8 = vpop.xlane.xlu1 %444  ;;  %v442_v9 = vpop.xlane.xlu0 %441 }
 0x263   :  { %1742 = vrsqrt.f32 %v497_v60  ;;  %v483_v10 = vmul.f32 0.03125, %v445_v8  ;;  %v482_v11 = vmul.f32 0.03125, %v442_v9 }
 0x264   :  { %1744 = vrsqrt.f32 %v496_v5 }
 0x265   :  { %v499_v13 = vadd.f32 1e-05, %v483_v10  ;;  %v498_v14 = vadd.f32 1e-05, %v482_v11 }
 0x266   :  { %v451_v7 = vpop.xlane.xlu1 %450  ;;  %v448_v17 = vpop.xlane.xlu0 %447 }
 0x267   :  { %1746 = vrsqrt.f32 %v499_v13  ;;  %v485_v20 = vmul.f32 0.03125, %v451_v7  ;;  %v484_v21 = vmul.f32 0.03125, %v448_v17 }
 0x268   :  { %1748 = vrsqrt.f32 %v498_v14 }
 0x269   :  { %v501_v22 = vadd.f32 1e-05, %v485_v20  ;;  %v500_v23 = vadd.f32 1e-05, %v484_v21 }
 0x26a   :  { %v457_v26 = vpop.xlane.xlu1 %456  ;;  %v454_v27 = vpop.xlane.xlu0 %453 }
 0x26b   :  { %1750 = vrsqrt.f32 %v501_v22  ;;  %v487_v6 = vmul.f32 0.03125, %v457_v26  ;;  %v486_v29 = vmul.f32 0.03125, %v454_v27 }
 0x26c   :  { %v1741_v30 = vpop.eup %1740  ;;  %1752 = vrsqrt.f32 %v500_v23 }
 0x26d   :  { %v527_v33 = vmul.f32 %v1741_v30, %v2176_v31  ;;  %v503_v34 = vadd.f32 1e-05, %v487_v6  ;;  %v502_v35 = vadd.f32 1e-05, %v486_v29 }
 0x26e   :  { %v463_v36 = vpop.xlane.xlu1 %462  ;;  %v460_v19 = vpop.xlane.xlu0 %459 }
 0x26f   :  { %v549_v40 = vmul.f32 %v2286_v32, %v527_v33  ;;  %1754 = vrsqrt.f32 %v503_v34  ;;  %v489_v42 = vmul.f32 0.03125, %v463_v36  ;;  %v488_v43 = vmul.f32 0.03125, %v460_v19 }
 0x270   :  { %v1743_v44 = vpop.eup %1742  ;;  %1756 = vrsqrt.f32 %v502_v35 }
 0x271   :  { %v1745_v45 = vpop.eup %1744  ;;  %v529_v25 = vmul.f32 %v1743_v44, %v2184_v38  ;;  %v505_v31 = vadd.f32 1e-05, %v489_v42  ;;  %v504_v48 = vadd.f32 1e-05, %v488_v43  ;;  %v571_v24 = vadd.f32 %v2293_v41, %v549_v40 }
 0x272   :  { %v528_v49 = vmul.f32 %v1745_v45, %v2181_v37  ;;  %v469_v50 = vpop.xlane.xlu1 %468  ;;  %v466_v51 = vpop.xlane.xlu0 %465 }
 0x273   :  { %v551_v52 = vmul.f32 %v2286_v32, %v529_v25  ;;  %1758 = vrsqrt.f32 %v505_v31  ;;  %v491_v53 = vmul.f32 0.03125, %v469_v50  ;;  %v490_v55 = vmul.f32 0.03125, %v466_v51 }
 0x274   :  { %v1747_v56 = vpop.eup %1746  ;;  %v550_v58 = vmul.f32 %v2286_v32, %v528_v49  ;;  %1760 = vrsqrt.f32 %v504_v48 }
 0x275   :  { %v1749_v59 = vpop.eup %1748  ;;  %v531_v38 = vmul.f32 %v1747_v56, %v2192_v46  ;;  %v507_v61 = vadd.f32 1e-05, %v491_v53  ;;  %v506_v62 = vadd.f32 1e-05, %v490_v55  ;;  %v573_v37 = vadd.f32 %v2293_v41, %v551_v52 }
 0x276   :  { %v530_v63 = vmul.f32 %v1749_v59, %v2195_v47  ;;  %v475_v1 = vpop.xlane.xlu1 %474  ;;  %v472_v3 = vpop.xlane.xlu0 %471  ;;  %v572_v60 = vadd.f32 %v2293_v41, %v550_v58  ;;  %1762 = vtanh.f32 %v571_v24 }
 0x277   :  { %v553_v5 = vmul.f32 %v2286_v32, %v531_v38  ;;  %v493_v8 = vmul.f32 0.03125, %v475_v1  ;;  %v492_v9 = vmul.f32 0.03125, %v472_v3  ;;  %1764 = vrsqrt.f32 %v507_v61 }
 0x278   :  { %v1751_v10 = vpop.eup %1750  ;;  %v552_v11 = vmul.f32 %v2286_v32, %v530_v63  ;;  %1766 = vrsqrt.f32 %v506_v62 }
 0x279   :  { %v1753_v46 = vpop.eup %1752  ;;  %v533_v13 = vmul.f32 %v1751_v10, %v2204_v57  ;;  %v509_v14 = vadd.f32 1e-05, %v493_v8  ;;  %v508_v17 = vadd.f32 1e-05, %v492_v9  ;;  %1768 = vtanh.f32 %v572_v60 }
 0x27a   :  { %v574_v47 = vadd.f32 %v2293_v41, %v552_v11  ;;  %v532_v7 = vmul.f32 %v1753_v46, %v2207_v54  ;;  %v478_v20 = vpop.xlane.xlu0 %477  ;;  %1770 = vtanh.f32 %v573_v37  ;;  %v575_v21 = vadd.f32 %v2293_v41, %v553_v5 }
 0x27b   :  { %v555_v22 = vmul.f32 %v2286_v32, %v533_v13  ;;  %v494_v23 = vmul.f32 0.03125, %v478_v20 }
 0x27c   :  { %v1755_v26 = vpop.eup %1754  ;;  %1772 = vtanh.f32 %v574_v47  ;;  %v554_v27 = vmul.f32 %v2286_v32, %v532_v7 }
 0x27d   :  { %v1757_v57 = vpop.eup %1756  ;;  %v535_v6 = vmul.f32 %v1755_v26, %v2216_v4  ;;  %1774 = vrsqrt.f32 %v509_v14  ;;  %v510_v29 = vadd.f32 1e-05, %v494_v23  ;;  %v577_v33 = vadd.f32 %v2293_v41, %v555_v22  ;;  %v1545_v26 = vld [vmem:[%s2823_s7] ss:$0 sm:$0xff] }
 0x27e   :  { %v576_v54 = vadd.f32 %v2293_v41, %v554_v27  ;;  %v534_v30 = vmul.f32 %v1757_v57, %v2219_v0  ;;  %1776 = vrsqrt.f32 %v508_v17 }
 0x27f   :  { %1778 = vtanh.f32 %v575_v21  ;;  %v557_v34 = vmul.f32 %v2286_v32, %v535_v6 }
 0x280   :  { %v1759_v35 = vpop.eup %1758  ;;  %1780 = vtanh.f32 %v576_v54  ;;  %v556_v36 = vmul.f32 %v2286_v32, %v534_v30 }
 0x281   :  { %v1761_v19 = vpop.eup %1760  ;;  %v537_v40 = vmul.f32 %v1759_v35, %v2228_v16  ;;  %1782 = vrsqrt.f32 %v510_v29  ;;  %v579_v0 = vadd.f32 %v2293_v41, %v557_v34 }
 0x282   :  { %v578_v4 = vadd.f32 %v2293_v41, %v556_v36  ;;  %v536_v42 = vmul.f32 %v1761_v19, %v2231_v2  ;;  %1784 = vtanh.f32 %v577_v33 }
 0x283   :  { %v1763_v43 = vpop.eup %1762  ;;  %v559_v44 = vmul.f32 %v2286_v32, %v537_v40 }
 0x284   :  { %1786 = vtanh.f32 %v578_v4  ;;  %v558_v45 = vmul.f32 %v2286_v32, %v536_v42  ;;  %v1765_v25 = vpop.eup %1764 }
 0x285   :  { %v1767_v31 = vpop.eup %1766  ;;  %v539_v16 = vmul.f32 %v1765_v25, %v2240_v28  ;;  %1788 = vtanh.f32 %v579_v0  ;;  %v581_v51 = vadd.f32 %v2293_v41, %v559_v44 }
 0x286   :  { %v580_v48 = vadd.f32 %v2293_v41, %v558_v45  ;;  %v1769_v49 = vpop.eup %1768  ;;  %v538_v50 = vmul.f32 %v1767_v31, %v2243_v12 }
 0x287   :  { %v1771_v2 = vpop.eup %1770  ;;  %v608_v24 = vpack.c.bf16 %v1769_v49, %v1763_v43  ;;  %v561_v53 = vmul.f32 %v2286_v32, %v539_v16 }
 0x288   :  { %1790 = vtanh.f32 %v580_v48  ;;  %v560_v55 = vmul.f32 %v2286_v32, %v538_v50 }
 0x289   :  { %v1773_v52 = vpop.eup %1772  ;;  %1688 = vmatprep.mubr.msk.bf16.mxu1 %vm174_vm0, %v608_v24  ;;  %1792 = vtanh.f32 %v581_v51  ;;  %v583_v37 = vadd.f32 %v2293_v41, %v561_v53 }
 0x28a   :  { %v1775_v56 = vpop.eup %1774  ;;  %v609_v58 = vpack.c.bf16 %v1773_v52, %v1771_v2  ;;  %v582_v28 = vadd.f32 %v2293_v41, %v560_v55 }
 0x28b   :  { %v1777_v59 = vpop.eup %1776  ;;  %v541_v38 = vmul.f32 %v1775_v56, %v2252_v39 }
 0x28c   :  { %v1779_v12 = vpop.eup %1778  ;;  %v540_v61 = vmul.f32 %v1777_v59, %v2255_v15  ;;  %1689 = vmatmul.mubr.msk.bf16.vlgmr.msra.gmra.mxu1 %vm174_vm0, %v609_v58  ;;  %1794 = vtanh.f32 %v582_v28 }
 0x28d   :  { %v1781_v62 = vpop.eup %1780  ;;  %v563_v63 = vmul.f32 %v2286_v32, %v541_v38  ;;  %1796 = vtanh.f32 %v583_v37 }
 0x28e   :  { %v1783_v1 = vpop.eup %1782  ;;  %v562_v3 = vmul.f32 %v2286_v32, %v540_v61  ;;  %v610_v60 = vpack.c.bf16 %v1781_v62, %v1779_v12 }
 0x28f   :  { %v542_v5 = vmul.f32 %v1783_v1, %v2264_v18  ;;  %v1785_v8 = vpop.eup %1784  ;;  %v585_v39 = vadd.f32 %v2293_v41, %v563_v63 }
 0x290   :  { %v584_v9 = vadd.f32 %v2293_v41, %v562_v3  ;;  %1692 = vmatprep.mubr.msk.bf16.mxu1 %vm174_vm0, %v610_v60 }
 0x291   :  { %v1787_v15 = vpop.eup %1786  ;;  %v564_v10 = vmul.f32 %v2286_v32, %v542_v5 }
 0x292   :  { %1798 = vtanh.f32 %v584_v9  ;;  %v611_v11 = vpack.c.bf16 %v1787_v15, %v1785_v8  ;;  %v1789_v13 = vpop.eup %1788 }
 0x293   :  { %v586_v46 = vadd.f32 %v2293_v41, %v564_v10  ;;  %1800 = vtanh.f32 %v585_v39 }
 0x294   :  { %1693 = vmatmul.mubr.msk.bf16.gmra.mxu1 %vm174_vm0, %v611_v11 }
 0x295   :  { %v1791_v18 = vpop.eup %1790  ;;  %1802 = vtanh.f32 %v586_v46 }
 0x296   :  { %v612_v14 = vpack.c.bf16 %v1791_v18, %v1789_v13  ;;  %v1793_v47 = vpop.eup %1792 }
 0x298   :  { %1696 = vmatprep.mubr.msk.bf16.mxu1 %vm174_vm0, %v612_v14 }
 0x299   :  { %v1795_v7 = vpop.eup %1794 }
 0x29a   :  { %v613_v17 = vpack.c.bf16 %v1795_v7, %v1793_v47  ;;  %v1797_v20 = vpop.eup %1796 }
 0x29c   :  { %1697 = vmatmul.mubr.msk.bf16.gmra.mxu1 %vm174_vm0, %v613_v17 }
 0x29f   :  { %v1799_v32 = vpop.eup %1798 }
 0x2a0   :  { %v614_v21 = vpack.c.bf16 %v1799_v32, %v1797_v20  ;;  %v1801_v22 = vpop.eup %1800 }
 0x2a2   :  { %v1803_v23 = vpop.eup %1802  ;;  %1700 = vmatprep.mubr.msk.bf16.mxu1 %vm174_vm0, %v614_v21 }
 0x2a3   :  { %v615_v41 = vpack.c.bf16 %v1803_v23, %v1801_v22 }
 0x2a5   :  { %1701 = vmatmul.mubr.msk.bf16.gmra.mxu1 %vm174_vm0, %v615_v41 }
 0x34c   :  { %v1690_v27 = vpop.f32.mrf.mxu1 }
 0x34d   :  { %v2352_v57 = vadd.f32 %v1690_v27, %v1545_v26 }
 0x34e   :  { %v682_v6 = vpop.f32.mrf.mxu1 }
 0x34f   :  { %v2354_v29 = vadd.f32 %v1545_v26, %v682_v6  ;;  %v753_v54 = vsel %vm174_vm0, %v2352_v57, 0.0 }
 0x350   :  { %754 = vadd.xlane.f32.xlu1 %v753_v54  ;;  %v1691_v30 = vpop.f32.mrf.mxu1 }
 0x351   :  { %v2358_v33 = vadd.f32 %v1691_v30, %v1545_v26  ;;  %v747_v19 = vsel %vm174_vm0, %v2354_v29, 0.0 }
 0x352   :  { %v685_v34 = vpop.f32.mrf.mxu1 }
 0x353   :  { %v2360_v35 = vadd.f32 %v1545_v26, %v685_v34  ;;  %v756_v36 = vsel %vm174_vm0, %v2358_v33, 0.0 }
 0x354   :  { %757 = vadd.xlane.f32.xlu0 %v756_v36  ;;  %748 = vadd.xlane.f32.xlu1 %v747_v19  ;;  %v1694_v40 = vpop.f32.mrf.mxu1 }
 0x355   :  { %v2366_v4 = vadd.f32 %v1694_v40, %v1545_v26  ;;  %v750_v43 = vsel %vm174_vm0, %v2360_v35, 0.0 }
 0x356   :  { %v698_v42 = vpop.f32.mrf.mxu1 }
 0x357   :  { %v2368_v0 = vadd.f32 %v1545_v26, %v698_v42  ;;  %v765_v44 = vsel %vm174_vm0, %v2366_v4, 0.0 }
 0x358   :  { %751 = vadd.xlane.f32.xlu0 %v750_v43  ;;  %766 = vadd.xlane.f32.xlu1 %v765_v44  ;;  %v1695_v45 = vpop.f32.mrf.mxu1 }
 0x359   :  { %v2374_v25 = vadd.f32 %v1695_v45, %v1545_v26  ;;  %v759_v49 = vsel %vm174_vm0, %v2368_v0, 0.0 }
 0x35a   :  { %v701_v31 = vpop.f32.mrf.mxu1 }
 0x35b   :  { %v2376_v48 = vadd.f32 %v1545_v26, %v701_v31  ;;  %v768_v16 = vsel %vm174_vm0, %v2374_v25, 0.0 }
 0x35c   :  { %769 = vadd.xlane.f32.xlu0 %v768_v16  ;;  %760 = vadd.xlane.f32.xlu1 %v759_v49  ;;  %v1698_v50 = vpop.f32.mrf.mxu1 }
 0x35d   :  { %v2382_v2 = vadd.f32 %v1698_v50, %v1545_v26  ;;  %v762_v24 = vsel %vm174_vm0, %v2376_v48, 0.0 }
 0x35e   :  { %v714_v51 = vpop.f32.mrf.mxu1 }
 0x35f   :  { %v2386_v52 = vadd.f32 %v1545_v26, %v714_v51  ;;  %v777_v53 = vsel %vm174_vm0, %v2382_v2, 0.0 }
 0x360   :  { %763 = vadd.xlane.f32.xlu0 %v762_v24  ;;  %778 = vadd.xlane.f32.xlu1 %v777_v53  ;;  %v1699_v55 = vpop.f32.mrf.mxu1 }
 0x361   :  { %v2390_v56 = vadd.f32 %v1699_v55, %v1545_v26  ;;  %v771_v38 = vsel %vm174_vm0, %v2386_v52, 0.0 }
 0x362   :  { %v717_v58 = vpop.f32.mrf.mxu1 }
 0x363   :  { %v2392_v59 = vadd.f32 %v1545_v26, %v717_v58  ;;  %v780_v28 = vsel %vm174_vm0, %v2390_v56, 0.0 }
 0x364   :  { %781 = vadd.xlane.f32.xlu0 %v780_v28  ;;  %772 = vadd.xlane.f32.xlu1 %v771_v38 }
 0x365   :  { %v1702_v12 = vpop.f32.mrf.mxu1  ;;  %v774_v37 = vsel %vm174_vm0, %v2392_v59, 0.0 }
 0x366   :  { %v2402_v1 = vadd.f32 %v1702_v12, %v1545_v26 }
 0x367   :  { %v730_v61 = vpop.f32.mrf.mxu1 }
 0x368   :  { %v2398_v62 = vadd.f32 %v1545_v26, %v730_v61  ;;  %775 = vadd.xlane.f32.xlu0 %v774_v37  ;;  %v789_v9 = vsel %vm174_vm0, %v2402_v1, 0.0 }
 0x369   :  { %v1703_v63 = vpop.f32.mrf.mxu1 }
 0x36a   :  { %v783_v3 = vsel %vm174_vm0, %v2398_v62, 0.0  ;;  %v2408_v8 = vadd.f32 %v1703_v63, %v1545_v26 }
 0x36b   :  { %v733_v60 = vpop.f32.mrf.mxu1  ;;  %784 = vadd.xlane.f32.xlu1 %v783_v3 }
 0x36c   :  { %v2406_v5 = vadd.f32 %v1545_v26, %v733_v60  ;;  %v792_v15 = vsel %vm174_vm0, %v2408_v8, 0.0 }
 0x36e   :  { %v786_v39 = vsel %vm174_vm0, %v2406_v5, 0.0 }
 0x36f   :  { %787 = vadd.xlane.f32.xlu0 %v786_v39  ;;  %790 = vadd.xlane.f32.xlu1 %v789_v9 }
 0x373   :  { %793 = vadd.xlane.f32.xlu0 %v792_v15 }
 0x3d9   :  { %v755_v10 = vpop.xlane.xlu1 %754 }
 0x3da   :  { %v797_v11 = vmul.f32 0.03125, %v755_v10 }
 0x3dc   :  { %v2417_v46 = vsub.f32 %v2352_v57, %v797_v11 }
 0x3dd   :  { %v749_v13 = vpop.xlane.xlu1 %748  ;;  %v758_v18 = vpop.xlane.xlu0 %757 }
 0x3de   :  { %v795_v14 = vmul.f32 0.03125, %v749_v13  ;;  %v798_v47 = vmul.f32 0.03125, %v758_v18  ;;  %v829_v7 = vmul.f32 %v2417_v46, %v2417_v46 }
 0x3e0   :  { %v2422_v17 = vsub.f32 %v2354_v29, %v795_v14  ;;  %v2425_v20 = vsub.f32 %v2358_v33, %v798_v47  ;;  %v849_v32 = vsel %vm174_vm0, %v829_v7, 0.0 }
 0x3e1   :  { %v767_v21 = vpop.xlane.xlu1 %766  ;;  %850 = vadd.xlane.f32.xlu1 %v849_v32  ;;  %v752_v22 = vpop.xlane.xlu0 %751 }
 0x3e2   :  { %v801_v23 = vmul.f32 0.03125, %v767_v21  ;;  %v796_v41 = vmul.f32 0.03125, %v752_v22  ;;  %v827_v26 = vmul.f32 %v2422_v17, %v2422_v17  ;;  %v830_v27 = vmul.f32 %v2425_v20, %v2425_v20 }
 0x3e4   :  { %v2433_v57 = vsub.f32 %v2366_v4, %v801_v23  ;;  %v2436_v6 = vsub.f32 %v2360_v35, %v796_v41  ;;  %v843_v29 = vsel %vm174_vm0, %v827_v26, 0.0  ;;  %v852_v54 = vsel %vm174_vm0, %v830_v27, 0.0 }
 0x3e5   :  { %v761_v30 = vpop.xlane.xlu1 %760  ;;  %844 = vadd.xlane.f32.xlu1 %v843_v29  ;;  %853 = vadd.xlane.f32.xlu0 %v852_v54  ;;  %v770_v33 = vpop.xlane.xlu0 %769 }
 0x3e6   :  { %v799_v34 = vmul.f32 0.03125, %v761_v30  ;;  %v802_v36 = vmul.f32 0.03125, %v770_v33  ;;  %v833_v19 = vmul.f32 %v2433_v57, %v2433_v57  ;;  %v828_v40 = vmul.f32 %v2436_v6, %v2436_v6 }
 0x3e7   :  { %v19_v33 = vstv %s2824_s11 }
 0x3e8   :  { %v2445_v4 = vsub.f32 %v2368_v0, %v799_v34  ;;  %v2448_v35 = vsub.f32 %v2374_v25, %v802_v36  ;;  %v861_v42 = vsel %vm174_vm0, %v833_v19, 0.0  ;;  %v846_v43 = vsel %vm174_vm0, %v828_v40, 0.0  ;;  %20 = vst [vmem:[#allocation2] sm:$0x1] %v19_v33 }
 0x3e9   :  { %862 = vadd.xlane.f32.xlu1 %v861_v42  ;;  %847 = vadd.xlane.f32.xlu0 %v846_v43  ;;  %v764_v44 = vpop.xlane.xlu0 %763  ;;  %v779_v45 = vpop.xlane.xlu1 %778 }
 0x3ea   :  { %v800_v31 = vmul.f32 0.03125, %v764_v44  ;;  %v831_v16 = vmul.f32 %v2445_v4, %v2445_v4  ;;  %v834_v49 = vmul.f32 %v2448_v35, %v2448_v35  ;;  %v805_v0 = vmul.f32 0.03125, %v779_v45 }
 0x3ec   :  { %v2457_v50 = vsub.f32 %v2376_v48, %v800_v31  ;;  %v855_v25 = vsel %vm174_vm0, %v831_v16, 0.0  ;;  %v864_v51 = vsel %vm174_vm0, %v834_v49, 0.0  ;;  %v2462_v24 = vsub.f32 %v2382_v2, %v805_v0 }
 0x3ed   :  { %856 = vadd.xlane.f32.xlu1 %v855_v25  ;;  %865 = vadd.xlane.f32.xlu0 %v864_v51  ;;  %v773_v53 = vpop.xlane.xlu1 %772  ;;  %v782_v55 = vpop.xlane.xlu0 %781 }
 0x3ee   :  { %v832_v58 = vmul.f32 %v2457_v50, %v2457_v50  ;;  %v803_v28 = vmul.f32 0.03125, %v773_v53  ;;  %v806_v38 = vmul.f32 0.03125, %v782_v55  ;;  %v837_v48 = vmul.f32 %v2462_v24, %v2462_v24 }
 0x3f0   :  { %v858_v12 = vsel %vm174_vm0, %v832_v58, 0.0  ;;  %v2470_v61 = vsub.f32 %v2386_v52, %v803_v28  ;;  %v2473_v2 = vsub.f32 %v2390_v56, %v806_v38  ;;  %v873_v37 = vsel %vm174_vm0, %v837_v48, 0.0 }
 0x3f1   :  { %859 = vadd.xlane.f32.xlu0 %v858_v12  ;;  %874 = vadd.xlane.f32.xlu1 %v873_v37  ;;  %v776_v63 = vpop.xlane.xlu0 %775 }
 0x3f2   :  { %v804_v3 = vmul.f32 0.03125, %v776_v63  ;;  %v835_v60 = vmul.f32 %v2470_v61, %v2470_v61  ;;  %v838_v39 = vmul.f32 %v2473_v2, %v2473_v2 }
 0x3f4   :  { %v785_v9 = vpop.xlane.xlu1 %784  ;;  %v2481_v15 = vsub.f32 %v2392_v59, %v804_v3  ;;  %v867_v56 = vsel %vm174_vm0, %v835_v60, 0.0  ;;  %v876_v10 = vsel %vm174_vm0, %v838_v39, 0.0  ;;  %v2518_v60 = vld [vmem:[%s2825_s8] ss:$0 sm:$0xff] }
 0x3f5   :  { %v807_v52 = vmul.f32 0.03125, %v785_v9  ;;  %868 = vadd.xlane.f32.xlu1 %v867_v56  ;;  %877 = vadd.xlane.f32.xlu0 %v876_v10  ;;  %v2524_v10 = vld [vmem:[%s2826_s9] ss:$0 sm:$0xff] }
 0x3f6   :  { %v836_v13 = vmul.f32 %v2481_v15, %v2481_v15 }
 0x3f7   :  { %v2486_v11 = vsub.f32 %v2398_v62, %v807_v52 }
 0x3f8   :  { %v791_v18 = vpop.xlane.xlu1 %790  ;;  %v788_v14 = vpop.xlane.xlu0 %787  ;;  %v870_v59 = vsel %vm174_vm0, %v836_v13, 0.0 }
 0x3f9   :  { %v809_v47 = vmul.f32 0.03125, %v791_v18  ;;  %v808_v7 = vmul.f32 0.03125, %v788_v14  ;;  %v839_v32 = vmul.f32 %v2486_v11, %v2486_v11  ;;  %871 = vadd.xlane.f32.xlu0 %v870_v59 }
 0x3fb   :  { %v2494_v21 = vsub.f32 %v2402_v1, %v809_v47  ;;  %v2497_v22 = vsub.f32 %v2406_v5, %v808_v7  ;;  %v879_v62 = vsel %vm174_vm0, %v839_v32, 0.0 }
 0x3fc   :  { %880 = vadd.xlane.f32.xlu1 %v879_v62  ;;  %v794_v23 = vpop.xlane.xlu0 %793 }
 0x3fd   :  { %v810_v41 = vmul.f32 0.03125, %v794_v23  ;;  %v841_v26 = vmul.f32 %v2494_v21, %v2494_v21  ;;  %v840_v27 = vmul.f32 %v2497_v22, %v2497_v22 }
 0x3ff   :  { %v2505_v29 = vsub.f32 %v2408_v8, %v810_v41  ;;  %v885_v1 = vsel %vm174_vm0, %v841_v26, 0.0  ;;  %v882_v54 = vsel %vm174_vm0, %v840_v27, 0.0 }
 0x400   :  { %886 = vadd.xlane.f32.xlu1 %v885_v1  ;;  %883 = vadd.xlane.f32.xlu0 %v882_v54 }
 0x401   :  { %v842_v5 = vmul.f32 %v2505_v29, %v2505_v29 }
 0x403   :  { %v888_v30 = vsel %vm174_vm0, %v842_v5, 0.0 }
 0x404   :  { %889 = vadd.xlane.f32.xlu0 %v888_v30 }
 0x46a   :  { %v851_v34 = vpop.xlane.xlu1 %850 }
 0x46b   :  { %v893_v8 = vmul.f32 0.03125, %v851_v34 }
 0x46d   :  { %v909_v36 = vadd.f32 1e-05, %v893_v8 }
 0x46e   :  { %v845_v19 = vpop.xlane.xlu1 %844  ;;  %v854_v40 = vpop.xlane.xlu0 %853 }
 0x46f   :  { %1804 = vrsqrt.f32 %v909_v36  ;;  %v891_v42 = vmul.f32 0.03125, %v845_v19  ;;  %v894_v43 = vmul.f32 0.03125, %v854_v40 }
 0x471   :  { %v907_v44 = vadd.f32 1e-05, %v891_v42  ;;  %v910_v45 = vadd.f32 1e-05, %v894_v43 }
 0x472   :  { %v863_v31 = vpop.xlane.xlu1 %862  ;;  %v848_v16 = vpop.xlane.xlu0 %847 }
 0x473   :  { %1806 = vrsqrt.f32 %v907_v44  ;;  %v897_v49 = vmul.f32 0.03125, %v863_v31  ;;  %v892_v0 = vmul.f32 0.03125, %v848_v16 }
 0x474   :  { %1808 = vrsqrt.f32 %v910_v45 }
 0x475   :  { %v913_v25 = vadd.f32 1e-05, %v897_v49  ;;  %v908_v51 = vadd.f32 1e-05, %v892_v0 }
 0x476   :  { %v857_v53 = vpop.xlane.xlu1 %856  ;;  %v866_v55 = vpop.xlane.xlu0 %865 }
 0x477   :  { %1810 = vrsqrt.f32 %v913_v25  ;;  %v895_v58 = vmul.f32 0.03125, %v857_v53  ;;  %v898_v28 = vmul.f32 0.03125, %v866_v55 }
 0x478   :  { %1812 = vrsqrt.f32 %v908_v51 }
 0x479   :  { %v911_v38 = vadd.f32 1e-05, %v895_v58  ;;  %v914_v48 = vadd.f32 1e-05, %v898_v28 }
 0x47a   :  { %v860_v12 = vpop.xlane.xlu0 %859  ;;  %v875_v37 = vpop.xlane.xlu1 %874 }
 0x47b   :  { %1814 = vrsqrt.f32 %v911_v38  ;;  %v896_v63 = vmul.f32 0.03125, %v860_v12  ;;  %v901_v39 = vmul.f32 0.03125, %v875_v37 }
 0x47c   :  { %v1805_v3 = vpop.eup %1804  ;;  %1816 = vrsqrt.f32 %v914_v48 }
 0x47d   :  { %v941_v9 = vmul.f32 %v1805_v3, %v2417_v46  ;;  %v912_v52 = vadd.f32 1e-05, %v896_v63  ;;  %v917_v56 = vadd.f32 1e-05, %v901_v39  ;;  %v2550_v39 = vld [vmem:[%s2827_s10] ss:$0 sm:$0xff] }
 0x47e   :  { %v869_v18 = vpop.xlane.xlu1 %868  ;;  %v878_v14 = vpop.xlane.xlu0 %877 }
 0x47f   :  { %v963_v13 = vmul.f32 %v2518_v60, %v941_v9  ;;  %1818 = vrsqrt.f32 %v912_v52  ;;  %v899_v7 = vmul.f32 0.03125, %v869_v18  ;;  %v902_v59 = vmul.f32 0.03125, %v878_v14 }
 0x480   :  { %v1807_v47 = vpop.eup %1806  ;;  %1820 = vrsqrt.f32 %v917_v56 }
 0x481   :  { %v1809_v32 = vpop.eup %1808  ;;  %v939_v62 = vmul.f32 %v1807_v47, %v2422_v17  ;;  %v985_v46 = vadd.f32 %v2524_v10, %v963_v13  ;;  %v915_v41 = vadd.f32 1e-05, %v899_v7  ;;  %v918_v26 = vadd.f32 1e-05, %v902_v59 }
 0x482   :  { %v942_v23 = vmul.f32 %v1809_v32, %v2425_v20  ;;  %v872_v1 = vpop.xlane.xlu0 %871 }
 0x483   :  { %v961_v27 = vmul.f32 %v2518_v60, %v939_v62  ;;  %1822 = vtanh.f32 %v985_v46  ;;  %v900_v30 = vmul.f32 0.03125, %v872_v1 }
 0x484   :  { %v1811_v54 = vpop.eup %1810  ;;  %v964_v5 = vmul.f32 %v2518_v60, %v942_v23  ;;  %1824 = vrsqrt.f32 %v915_v41 }
 0x485   :  { %v1813_v33 = vpop.eup %1812  ;;  %v945_v34 = vmul.f32 %v1811_v54, %v2433_v57  ;;  %1826 = vrsqrt.f32 %v918_v26  ;;  %v881_v17 = vpop.xlane.xlu1 %880  ;;  %v983_v8 = vadd.f32 %v2524_v10, %v961_v27  ;;  %v916_v36 = vadd.f32 1e-05, %v900_v30 }
 0x486   :  { %v940_v20 = vmul.f32 %v1813_v33, %v2436_v6  ;;  %v903_v19 = vmul.f32 0.03125, %v881_v17  ;;  %v986_v40 = vadd.f32 %v2524_v10, %v964_v5 }
 0x487   :  { %v967_v42 = vmul.f32 %v2518_v60, %v945_v34  ;;  %1828 = vtanh.f32 %v983_v8 }
 0x488   :  { %v1815_v43 = vpop.eup %1814  ;;  %v962_v44 = vmul.f32 %v2518_v60, %v940_v20  ;;  %1830 = vrsqrt.f32 %v916_v36  ;;  %v919_v45 = vadd.f32 1e-05, %v903_v19 }
 0x489   :  { %v1817_v31 = vpop.eup %1816  ;;  %v943_v57 = vmul.f32 %v1815_v43, %v2445_v4  ;;  %v887_v16 = vpop.xlane.xlu1 %886  ;;  %1832 = vtanh.f32 %v986_v40  ;;  %v989_v6 = vadd.f32 %v2524_v10, %v967_v42 }
 0x48a   :  { %v884_v49 = vpop.xlane.xlu0 %883  ;;  %v946_v0 = vmul.f32 %v1817_v31, %v2448_v35  ;;  %1834 = vrsqrt.f32 %v919_v45  ;;  %v905_v25 = vmul.f32 0.03125, %v887_v16  ;;  %v984_v55 = vadd.f32 %v2524_v10, %v962_v44 }
 0x48b   :  { %v904_v51 = vmul.f32 0.03125, %v884_v49  ;;  %v965_v53 = vmul.f32 %v2518_v60, %v943_v57  ;;  %1836 = vtanh.f32 %v989_v6 }
 0x48c   :  { %v1819_v58 = vpop.eup %1818  ;;  %v968_v28 = vmul.f32 %v2518_v60, %v946_v0  ;;  %v921_v38 = vadd.f32 1e-05, %v905_v25  ;;  %1838 = vtanh.f32 %v984_v55 }
 0x48d   :  { %v920_v4 = vadd.f32 1e-05, %v904_v51  ;;  %v1821_v48 = vpop.eup %1820  ;;  %v944_v12 = vmul.f32 %v1819_v58, %v2457_v50  ;;  %v987_v35 = vadd.f32 %v2524_v10, %v965_v53 }
 0x48e   :  { %v890_v37 = vpop.xlane.xlu0 %889  ;;  %v949_v63 = vmul.f32 %v1821_v48, %v2462_v24  ;;  %1840 = vrsqrt.f32 %v921_v38  ;;  %v990_v9 = vadd.f32 %v2524_v10, %v968_v28 }
 0x48f   :  { %v906_v3 = vmul.f32 0.03125, %v890_v37  ;;  %v966_v52 = vmul.f32 %v2518_v60, %v944_v12  ;;  %1842 = vrsqrt.f32 %v920_v4 }
 0x490   :  { %v1823_v56 = vpop.eup %1822  ;;  %v971_v50 = vmul.f32 %v2518_v60, %v949_v63  ;;  %1844 = vtanh.f32 %v987_v35 }
 0x491   :  { %v922_v13 = vadd.f32 1e-05, %v906_v3  ;;  %v1825_v18 = vpop.eup %1824  ;;  %v1025_v24 = vmul.f32 %v1823_v56, %v2550_v39  ;;  %1846 = vtanh.f32 %v990_v9  ;;  %v988_v14 = vadd.f32 %v2524_v10, %v966_v52 }
 0x492   :  { %v1827_v47 = vpop.eup %1826  ;;  %v947_v7 = vmul.f32 %v1825_v18, %v2470_v61  ;;  %v993_v59 = vadd.f32 %v2524_v10, %v971_v50 }
 0x493   :  { %1848 = vrsqrt.f32 %v922_v13  ;;  %v950_v32 = vmul.f32 %v1827_v47, %v2473_v2  ;;  %v1045_v62 = vsel %vm174_vm0, %v1025_v24, 0.0 }
 0x494   :  { %1850 = vtanh.f32 %v988_v14  ;;  %v1829_v46 = vpop.eup %1828  ;;  %v969_v23 = vmul.f32 %v2518_v60, %v947_v7  ;;  %1046 = vadd.xlane.f32.xlu1 %v1045_v62 }
 0x495   :  { %1852 = vtanh.f32 %v993_v59  ;;  %v1831_v41 = vpop.eup %1830  ;;  %v972_v26 = vmul.f32 %v2518_v60, %v950_v32  ;;  %v1023_v27 = vmul.f32 %v1829_v46, %v2550_v39 }
 0x496   :  { %v1833_v1 = vpop.eup %1832  ;;  %v948_v61 = vmul.f32 %v1831_v41, %v2481_v15  ;;  %v991_v54 = vadd.f32 %v2524_v10, %v969_v23 }
 0x497   :  { %v1835_v5 = vpop.eup %1834  ;;  %v1039_v2 = vsel %vm174_vm0, %v1023_v27, 0.0  ;;  %v1026_v30 = vmul.f32 %v1833_v1, %v2550_v39  ;;  %v994_v33 = vadd.f32 %v2524_v10, %v972_v26 }
 0x498   :  { %v1837_v34 = vpop.eup %1836  ;;  %v970_v17 = vmul.f32 %v2518_v60, %v948_v61  ;;  %v951_v8 = vmul.f32 %v1835_v5, %v2486_v11  ;;  %1040 = vadd.xlane.f32.xlu1 %v1039_v2  ;;  %1854 = vtanh.f32 %v991_v54  ;;  %v1949_v61 = vmov 0   ;;  %v2610_v54 = vld [vmem:[#allocation2] ss:$0 sm:$0xff] }
 0x499   :  { %v1048_v20 = vsel %vm174_vm0, %v1026_v30, 0.0  ;;  %v1029_v15 = vmul.f32 %v1837_v34, %v2550_v39  ;;  %1856 = vtanh.f32 %v994_v33  ;;  %v1839_v36 = vpop.eup %1838  ;;  %1706 = vset.pattern.permute.xlu1 %v1949_v61  ;;  %1707 = vset.pattern.permute.xlu0 %v1949_v61 }
 0x49a   :  { %v973_v19 = vmul.f32 %v2518_v60, %v951_v8  ;;  %1049 = vadd.xlane.f32.xlu0 %v1048_v20  ;;  %v992_v40 = vadd.f32 %v2524_v10, %v970_v17  ;;  %v1024_v44 = vmul.f32 %v1839_v36, %v2550_v39 }
 0x49b   :  { %v1841_v42 = vpop.eup %1840  ;;  %v1057_v43 = vsel %vm174_vm0, %v1029_v15, 0.0 }
 0x49c   :  { %v1843_v45 = vpop.eup %1842  ;;  %v953_v11 = vmul.f32 %v1841_v42, %v2494_v21  ;;  %1058 = vadd.xlane.f32.xlu1 %v1057_v43  ;;  %1858 = vtanh.f32 %v992_v40  ;;  %v995_v31 = vadd.f32 %v2524_v10, %v973_v19  ;;  %v1042_v49 = vsel %vm174_vm0, %v1024_v44, 0.0 }
 0x49d   :  { %v1845_v57 = vpop.eup %1844  ;;  %v952_v16 = vmul.f32 %v1843_v45, %v2497_v22 }
 0x49e   :  { %v1847_v6 = vpop.eup %1846  ;;  %v975_v0 = vmul.f32 %v2518_v60, %v953_v11  ;;  %1043 = vadd.xlane.f32.xlu0 %v1042_v49  ;;  %v1027_v25 = vmul.f32 %v1845_v57, %v2550_v39  ;;  %1860 = vtanh.f32 %v995_v31 }
 0x49f   :  { %v974_v53 = vmul.f32 %v2518_v60, %v952_v16  ;;  %v1030_v21 = vmul.f32 %v1847_v6, %v2550_v39 }
 0x4a0   :  { %v1849_v51 = vpop.eup %1848  ;;  %v1051_v28 = vsel %vm174_vm0, %v1027_v25, 0.0  ;;  %v997_v22 = vadd.f32 %v2524_v10, %v975_v0 }
 0x4a1   :  { %v1851_v55 = vpop.eup %1850  ;;  %v954_v58 = vmul.f32 %v1849_v51, %v2505_v29  ;;  %1052 = vadd.xlane.f32.xlu1 %v1051_v28  ;;  %v1060_v4 = vsel %vm174_vm0, %v1030_v21, 0.0  ;;  %v996_v12 = vadd.f32 %v2524_v10, %v974_v53 }
 0x4a2   :  { %v1853_v38 = vpop.eup %1852  ;;  %v1028_v48 = vmul.f32 %v1851_v55, %v2550_v39  ;;  %1061 = vadd.xlane.f32.xlu0 %v1060_v4  ;;  %1862 = vtanh.f32 %v997_v22 }
 0x4a3   :  { %v976_v37 = vmul.f32 %v2518_v60, %v954_v58  ;;  %v1033_v35 = vmul.f32 %v1853_v38, %v2550_v39  ;;  %1864 = vtanh.f32 %v996_v12 }
 0x4a4   :  { %v1054_v29 = vsel %vm174_vm0, %v1028_v48, 0.0 }
 0x4a5   :  { %v1069_v63 = vsel %vm174_vm0, %v1033_v35, 0.0  ;;  %v998_v3 = vadd.f32 %v2524_v10, %v976_v37  ;;  %v1855_v9 = vpop.eup %1854 }
 0x4a6   :  { %1070 = vadd.xlane.f32.xlu1 %v1069_v63  ;;  %v1857_v52 = vpop.eup %1856  ;;  %1055 = vadd.xlane.f32.xlu0 %v1054_v29  ;;  %v1031_v56 = vmul.f32 %v1855_v9, %v2550_v39 }
 0x4a7   :  { %1866 = vtanh.f32 %v998_v3  ;;  %v1034_v60 = vmul.f32 %v1857_v52, %v2550_v39 }
 0x4a8   :  { %v1063_v50 = vsel %vm174_vm0, %v1031_v56, 0.0 }
 0x4a9   :  { %v1859_v13 = vpop.eup %1858  ;;  %v1072_v18 = vsel %vm174_vm0, %v1034_v60, 0.0 }
 0x4aa   :  { %1064 = vadd.xlane.f32.xlu1 %v1063_v50  ;;  %1073 = vadd.xlane.f32.xlu0 %v1072_v18  ;;  %v1032_v24 = vmul.f32 %v1859_v13, %v2550_v39 }
 0x4ab   :  { %v1861_v14 = vpop.eup %1860 }
 0x4ac   :  { %v1066_v10 = vsel %vm174_vm0, %v1032_v24, 0.0  ;;  %v1035_v47 = vmul.f32 %v1861_v14, %v2550_v39 }
 0x4ae   :  { %1067 = vadd.xlane.f32.xlu0 %v1066_v10  ;;  %v1075_v7 = vsel %vm174_vm0, %v1035_v47, 0.0 }
 0x4af   :  { %v1863_v59 = vpop.eup %1862  ;;  %1076 = vadd.xlane.f32.xlu1 %v1075_v7 }
 0x4b0   :  { %v1865_v32 = vpop.eup %1864  ;;  %v1037_v62 = vmul.f32 %v1863_v59, %v2550_v39 }
 0x4b1   :  { %v1036_v46 = vmul.f32 %v1865_v32, %v2550_v39 }
 0x4b2   :  { %v1081_v23 = vsel %vm174_vm0, %v1037_v62, 0.0 }
 0x4b3   :  { %1082 = vadd.xlane.f32.xlu1 %v1081_v23  ;;  %v1078_v26 = vsel %vm174_vm0, %v1036_v46, 0.0 }
 0x4b4   :  { %v1867_v41 = vpop.eup %1866  ;;  %1079 = vadd.xlane.f32.xlu0 %v1078_v26 }
 0x4b5   :  { %v1038_v27 = vmul.f32 %v1867_v41, %v2550_v39 }
 0x4b7   :  { %v1084_v1 = vsel %vm174_vm0, %v1038_v27, 0.0 }
 0x4b8   :  { %1085 = vadd.xlane.f32.xlu0 %v1084_v1 }
 0x51d   :  { %v1047_v5 = vpop.xlane.xlu1 %1046 }
 0x51e   :  { %v1095_v2 = vadd.f32 %v2610_v54, %v1047_v5 }
 0x520   :  { %v1560_v30 = vmul.f32 -1.442695, %v1095_v2 }
 0x521   :  { %v1041_v33 = vpop.xlane.xlu1 %1040 }
 0x522   :  { %1868 = vpow2.f32 %v1560_v30  ;;  %v1093_v34 = vadd.f32 %v2610_v54, %v1041_v33 }
 0x523   :  { %v1050_v17 = vpop.xlane.xlu0 %1049 }
 0x524   :  { %v1558_v8 = vmul.f32 -1.442695, %v1093_v34  ;;  %v1096_v39 = vadd.f32 %v2610_v54, %v1050_v17 }
 0x525   :  { %v1059_v20 = vpop.xlane.xlu1 %1058 }
 0x526   :  { %1870 = vpow2.f32 %v1558_v8  ;;  %v1561_v15 = vmul.f32 -1.442695, %v1096_v39  ;;  %v1099_v36 = vadd.f32 %v2610_v54, %v1059_v20 }
 0x527   :  { %v1044_v19 = vpop.xlane.xlu0 %1043 }
 0x528   :  { %1872 = vpow2.f32 %v1561_v15  ;;  %v1564_v40 = vmul.f32 -1.442695, %v1099_v36  ;;  %v1094_v42 = vadd.f32 %v2610_v54, %v1044_v19 }
 0x52a   :  { %1874 = vpow2.f32 %v1564_v40  ;;  %v1559_v43 = vmul.f32 -1.442695, %v1094_v42  ;;  %v1053_v44 = vpop.xlane.xlu1 %1052 }
 0x52b   :  { %v1097_v45 = vadd.f32 %v2610_v54, %v1053_v44  ;;  %v1062_v11 = vpop.xlane.xlu0 %1061 }
 0x52c   :  { %1876 = vpow2.f32 %v1559_v43  ;;  %v1100_v31 = vadd.f32 %v2610_v54, %v1062_v11 }
 0x52d   :  { %v1562_v57 = vmul.f32 -1.442695, %v1097_v45 }
 0x52e   :  { %v1565_v16 = vmul.f32 -1.442695, %v1100_v31 }
 0x52f   :  { %v1071_v49 = vpop.xlane.xlu1 %1070  ;;  %v1869_v6 = vpop.eup %1868  ;;  %1878 = vpow2.f32 %v1562_v57 }
 0x530   :  { %v1103_v0 = vadd.f32 %v2610_v54, %v1071_v49  ;;  %v1056_v25 = vpop.xlane.xlu0 %1055  ;;  %v1159_v51 = vadd.f32 1.0, %v1869_v6  ;;  %1880 = vpow2.f32 %v1565_v16 }
 0x531   :  { %v1098_v53 = vadd.f32 %v2610_v54, %v1056_v25 }
 0x532   :  { %v1568_v21 = vmul.f32 -1.442695, %v1103_v0  ;;  %1882 = vrcp.f32 %v1159_v51 }
 0x533   :  { %v1563_v55 = vmul.f32 -1.442695, %v1098_v53  ;;  %v1065_v58 = vpop.xlane.xlu1 %1064  ;;  %v1871_v28 = vpop.eup %1870 }
 0x534   :  { %1884 = vpow2.f32 %v1568_v21  ;;  %v1101_v22 = vadd.f32 %v2610_v54, %v1065_v58  ;;  %v1074_v38 = vpop.xlane.xlu0 %1073  ;;  %v1157_v4 = vadd.f32 1.0, %v1871_v28 }
 0x535   :  { %v1104_v48 = vadd.f32 %v2610_v54, %v1074_v38  ;;  %v1873_v12 = vpop.eup %1872  ;;  %1886 = vpow2.f32 %v1563_v55  ;;  %v1932_v38 = vld [vmem:[%s2818_s0 + $0x8] sm:$0xff]  }
 0x536   :  { %v1566_v37 = vmul.f32 -1.442695, %v1101_v22  ;;  %1888 = vrcp.f32 %v1157_v4  ;;  %v1160_v35 = vadd.f32 1.0, %v1873_v12  ;;  %v1207_v4 = vunpack.c.l.bf16 %v1932_v38 }
 0x537   :  { %v1875_v29 = vpop.eup %1874  ;;  %v1569_v63 = vmul.f32 -1.442695, %v1104_v48  ;;  %v1933_v48 = vld [vmem:[%s2816_s1 + $0x8] sm:$0xff]  }
 0x538   :  { %v1068_v3 = vpop.xlane.xlu0 %1067  ;;  %v1077_v52 = vpop.xlane.xlu1 %1076  ;;  %v1163_v60 = vadd.f32 1.0, %v1875_v29  ;;  %1890 = vpow2.f32 %v1566_v37  ;;  %v1400_v12 = vunpack.c.l.bf16 %v1933_v48 }
 0x539   :  { %v1102_v9 = vadd.f32 %v2610_v54, %v1068_v3  ;;  %v1877_v56 = vpop.eup %1876  ;;  %v1105_v50 = vadd.f32 %v2610_v54, %v1077_v52  ;;  %1892 = vrcp.f32 %v1160_v35  ;;  %v1934_v35 = vld [vmem:[%s2816_s1] sm:$0xff]  }
 0x53a   :  { %v1158_v13 = vadd.f32 1.0, %v1877_v56  ;;  %1894 = vpow2.f32 %v1569_v63  ;;  %v1398_v29 = vunpack.c.l.bf16 %v1934_v35 }
 0x53b   :  { %v1570_v18 = vmul.f32 -1.442695, %v1105_v50  ;;  %v1567_v14 = vmul.f32 -1.442695, %v1102_v9  ;;  %v1935_v9 = vld [vmem:[%s2818_s0] sm:$0xff]  }
 0x53c   :  { %v1879_v24 = vpop.eup %1878  ;;  %1896 = vrcp.f32 %v1158_v13  ;;  %v1083_v10 = vpop.xlane.xlu1 %1082  ;;  %v1205_v52 = vunpack.c.l.bf16 %v1935_v9 }
 0x53d   :  { %1898 = vrcp.f32 %v1163_v60  ;;  %v1107_v47 = vadd.f32 %v2610_v54, %v1083_v10  ;;  %v1080_v7 = vpop.xlane.xlu0 %1079  ;;  %v1881_v59 = vpop.eup %1880  ;;  %v1161_v32 = vadd.f32 1.0, %v1879_v24  ;;  %v1208_v24 = vunpack.c.h.bf16 %v1932_v38 }
 0x53e   :  { %1900 = vpow2.f32 %v1570_v18  ;;  %v1106_v62 = vadd.f32 %v2610_v54, %v1080_v7  ;;  %v1164_v26 = vadd.f32 1.0, %v1881_v59  ;;  %v1399_v10 = vunpack.c.h.bf16 %v1934_v35  ;;  %v2723_v35 = vld [vmem:[%s2818_s0 + $0x30] sm:$0xff]  }
 0x53f   :  { %v1883_v46 = vpop.eup %1882  ;;  %v1572_v23 = vmul.f32 -1.442695, %v1107_v47  ;;  %1902 = vpow2.f32 %v1567_v14  ;;  %v1401_v14 = vunpack.c.h.bf16 %v1933_v48  ;;  %v1206_v59 = vunpack.c.h.bf16 %v1935_v9 }
 0x540   :  { %1233 = vperm.xlu1 %1706, %v1883_v46   ;;  %v1571_v5 = vmul.f32 -1.442695, %v1106_v62 }
 0x541   :  { %v1885_v41 = vpop.eup %1884  ;;  %1904 = vpow2.f32 %v1572_v23  ;;  %v1086_v1 = vpop.xlane.xlu0 %1085  ;;  %v1936_v23 = vld [vmem:[%s2818_s0 + $0x18] sm:$0xff]  }
 0x542   :  { %v1167_v27 = vadd.f32 1.0, %v1885_v41  ;;  %v1887_v61 = vpop.eup %1886  ;;  %1906 = vrcp.f32 %v1161_v32  ;;  %v1108_v2 = vadd.f32 %v2610_v54, %v1086_v1  ;;  %v1211_v41 = vunpack.c.l.bf16 %v1936_v23 }
 0x543   :  { %v1889_v30 = vpop.eup %1888  ;;  %v1162_v33 = vadd.f32 1.0, %v1887_v61 }
 0x544   :  { %1908 = vrcp.f32 %v1167_v27  ;;  %1223 = vperm.xlu1 %1706, %v1889_v30   ;;  %v1573_v17 = vmul.f32 -1.442695, %v1108_v2 }
 0x545   :  { %1910 = vrcp.f32 %v1164_v26  ;;  %v1891_v34 = vpop.eup %1890  ;;  %v1937_v26 = vld [vmem:[%s2816_s1 + $0x18] sm:$0xff]  }
 0x546   :  { %1912 = vpow2.f32 %v1571_v5  ;;  %v1893_v8 = vpop.eup %1892  ;;  %v1165_v15 = vadd.f32 1.0, %v1891_v34  ;;  %v1404_v27 = vunpack.c.l.bf16 %v1937_v26 }
 0x547   :  { %v1895_v39 = vpop.eup %1894  ;;  %1914 = vrcp.f32 %v1162_v33  ;;  %v1938_v33 = vld [vmem:[%s2816_s1 + $0x10] sm:$0xff]  }
 0x548   :  { %1238 = vperm.xlu1 %1706, %v1893_v8   ;;  %1916 = vpow2.f32 %v1573_v17  ;;  %v1168_v43 = vadd.f32 1.0, %v1895_v39  ;;  %v1402_v34 = vunpack.c.l.bf16 %v1938_v33  ;;  %v1939_v8 = vld [vmem:[%s2818_s0 + $0x10] sm:$0xff]  }
 0x549   :  { %v1897_v20 = vpop.eup %1896  ;;  %1918 = vrcp.f32 %v1165_v15  ;;  %v1209_v39 = vunpack.c.l.bf16 %v1939_v8 }
 0x54a   :  { %v1899_v36 = vpop.eup %1898  ;;  %1228 = vperm.xlu0 %1707, %v1897_v20  }
 0x54b   :  { %v1901_v19 = vpop.eup %1900 }
 0x54c   :  { %v1169_v40 = vadd.f32 1.0, %v1901_v19  ;;  %1253 = vperm.xlu1 %1706, %v1899_v36   ;;  %v1903_v54 = vpop.eup %1902 }
 0x54d   :  { %v1166_v57 = vadd.f32 1.0, %v1903_v54 }
 0x54e   :  { %v1905_v42 = vpop.eup %1904  ;;  %1920 = vrcp.f32 %v1169_v40  ;;  %v2679_v40 = vld [vmem:[%s2818_s0 + $0x28] sm:$0xff]  }
 0x54f   :  { %v1907_v44 = vpop.eup %1906  ;;  %v1171_v45 = vadd.f32 1.0, %v1905_v42  ;;  %v1215_v54 = vunpack.c.l.bf16 %v2679_v40  ;;  %v2685_v42 = vld [vmem:[%s2816_s1 + $0x28] sm:$0xff]  }
 0x550   :  { %1243 = vperm.xlu1 %1706, %v1907_v44  }
 0x551   :  { %v1909_v11 = vpop.eup %1908  ;;  %1922 = vrcp.f32 %v1171_v45 }
 0x552   :  { %1273 = vperm.xlu0 %1707, %v1909_v11   ;;  %v1911_v31 = vpop.eup %1910  ;;  %1924 = vrcp.f32 %v1168_v43  ;;  %v1408_v43 = vunpack.c.l.bf16 %v2685_v42 }
 0x553   :  { %v1913_v16 = vpop.eup %1912  ;;  %1926 = vrcp.f32 %v1166_v57 }
 0x554   :  { %1258 = vperm.xlu1 %1706, %v1911_v31   ;;  %v1915_v49 = vpop.eup %1914  ;;  %v1170_v6 = vadd.f32 1.0, %v1913_v16 }
 0x555   :  { %v1917_v0 = vpop.eup %1916 }
 0x556   :  { %v1919_v25 = vpop.eup %1918  ;;  %1928 = vrcp.f32 %v1170_v6  ;;  %v1172_v51 = vadd.f32 1.0, %v1917_v0  ;;  %v1405_v6 = vunpack.c.h.bf16 %v1937_v26 }
 0x558   :  { %1248 = vperm.xlu1 %1706, %v1915_v49   ;;  %1930 = vrcp.f32 %v1172_v51  ;;  %v1212_v49 = vunpack.c.h.bf16 %v1936_v23 }
 0x55b   :  { %v1921_v53 = vpop.eup %1920 }
 0x55c   :  { %1283 = vperm.xlu0 %1707, %v1921_v53   ;;  %1263 = vperm.xlu1 %1706, %v1919_v25  }
 0x55e   :  { %v1923_v21 = vpop.eup %1922 }
 0x55f   :  { %v1925_v55 = vpop.eup %1924 }
 0x560   :  { %1293 = vperm.xlu0 %1707, %v1923_v21   ;;  %1278 = vperm.xlu1 %1706, %v1925_v55   ;;  %v1927_v58 = vpop.eup %1926 }
 0x563   :  { %v1929_v28 = vpop.eup %1928 }
 0x564   :  { %1268 = vperm.xlu1 %1706, %v1927_v58  }
 0x565   :  { %v1931_v22 = vpop.eup %1930 }
 0x568   :  { %1288 = vperm.xlu1 %1706, %v1929_v28   ;;  %v1403_v28 = vunpack.c.h.bf16 %v1938_v33 }
 0x56c   :  { %1298 = vperm.xlu1 %1706, %v1931_v22  }
 0x5bb   :  { %v1234_v37 = vpop.permute.xlu1 %1233 }
 0x5bc   :  { %v1303_v63 = vmul.f32 %v1234_v37, %v1207_v4  ;;  %v1416_v3 = vmul.f32 %v1400_v12, %v1234_v37  ;;  %v1210_v4 = vunpack.c.h.bf16 %v1939_v8 }
 0x5be   :  { %v1608_v56 = vpack.c.bf16 %v1303_v63, %v1303_v63  ;;  %v1624_v60 = vpack.c.bf16 %v1416_v3, %v1416_v3  ;;  %v1943_v63 = vld [vmem:[%s2816_s1 + $0x30] sm:$0xff]  }
 0x5bf   :  { %v1224_v50 = vpop.permute.xlu1 %1223  ;;  %v1410_v3 = vunpack.c.l.bf16 %v1943_v63 }
 0x5c0   :  { %1384 = vst.msk [vmem:[%s2828_s12 + $0x8] sm:$0xf] %vm1381_vm2, %v1608_v56  ;;  %1496 = vst.msk [vmem:[%s2829_s13 + $0x8] sm:$0xf] %vm1381_vm2, %v1624_v60  ;;  %v1301_v13 = vmul.f32 %v1224_v50, %v1205_v52  ;;  %v1414_v18 = vmul.f32 %v1398_v29, %v1224_v50  ;;  %v1217_v29 = vunpack.c.l.bf16 %v2723_v35  ;;  %v1944_v56 = vld [vmem:[%s2818_s0 + $0x20] sm:$0xff]  }
 0x5c1   :  { %v1213_v60 = vunpack.c.l.bf16 %v1944_v56  ;;  %v1945_v50 = vld [vmem:[%s2816_s1 + $0x20] sm:$0xff]  }
 0x5c2   :  { %v1606_v47 = vpack.c.bf16 %v1301_v13, %v1301_v13  ;;  %v1622_v7 = vpack.c.bf16 %v1414_v18, %v1414_v18  ;;  %v1406_v13 = vunpack.c.l.bf16 %v1945_v50 }
 0x5c3   :  { %v1239_v32 = vpop.permute.xlu1 %1238 }
 0x5c4   :  { %1382 = vst.msk [vmem:[%s2828_s12] sm:$0xf] %vm1381_vm2, %v1606_v47  ;;  %1494 = vst.msk [vmem:[%s2829_s13] sm:$0xf] %vm1381_vm2, %v1622_v7  ;;  %v1304_v62 = vmul.f32 %v1239_v32, %v1208_v24  ;;  %v1417_v46 = vmul.f32 %v1401_v14, %v1239_v32  ;;  %v1946_v47 = vld [vmem:[%s2818_s0 + $0x38] sm:$0xff]  }
 0x5c5   :  { %v1229_v1 = vpop.permute.xlu0 %1228  ;;  %v1219_v7 = vunpack.c.l.bf16 %v1946_v47 }
 0x5c6   :  { %v1609_v61 = vpack.c.bf16 %v1304_v62, %v1304_v62  ;;  %v1625_v5 = vpack.c.bf16 %v1417_v46, %v1417_v46  ;;  %v1302_v2 = vmul.f32 %v1229_v1, %v1206_v59  ;;  %v1415_v30 = vmul.f32 %v1399_v10, %v1229_v1  ;;  %v1947_v59 = vld [vmem:[%s2816_s1 + $0x38] sm:$0xff]  }
 0x5c7   :  { %v1254_v17 = vpop.permute.xlu1 %1253  ;;  %v1412_v32 = vunpack.c.l.bf16 %v1947_v59  ;;  %v1216_v62 = vunpack.c.h.bf16 %v2679_v40  ;;  %v1409_v46 = vunpack.c.h.bf16 %v2685_v42 }
 0x5c8   :  { %1385 = vst.msk [vmem:[%s2828_s12 + $0xc] sm:$0xf] %vm1381_vm2, %v1609_v61  ;;  %1497 = vst.msk [vmem:[%s2829_s13 + $0xc] sm:$0xf] %vm1381_vm2, %v1625_v5  ;;  %v1607_v20 = vpack.c.bf16 %v1302_v2, %v1302_v2  ;;  %v1623_v15 = vpack.c.bf16 %v1415_v30, %v1415_v30  ;;  %v1307_v36 = vmul.f32 %v1254_v17, %v1211_v41 }
 0x5c9   :  { %v1420_v19 = vmul.f32 %v1404_v27, %v1254_v17  ;;  %v1407_v17 = vunpack.c.h.bf16 %v1945_v50 }
 0x5ca   :  { %1383 = vst.msk [vmem:[%s2828_s12 + $0x4] sm:$0xf] %vm1381_vm2, %v1607_v20  ;;  %1495 = vst.msk [vmem:[%s2829_s13 + $0x4] sm:$0xf] %vm1381_vm2, %v1623_v15  ;;  %v1612_v44 = vpack.c.bf16 %v1307_v36, %v1307_v36 }
 0x5cb   :  { %v1628_v45 = vpack.c.bf16 %v1420_v19, %v1420_v19  ;;  %v1244_v11 = vpop.permute.xlu1 %1243 }
 0x5cc   :  { %1388 = vst.msk [vmem:[%s2828_s12 + $0x18] sm:$0xf] %vm1381_vm2, %v1612_v44  ;;  %v1305_v31 = vmul.f32 %v1244_v11, %v1209_v39  ;;  %v1418_v57 = vmul.f32 %v1402_v34, %v1244_v11  ;;  %v1214_v34 = vunpack.c.h.bf16 %v1944_v56  ;;  %v1411_v11 = vunpack.c.h.bf16 %v1943_v63 }
 0x5cd   :  { %1500 = vst.msk [vmem:[%s2829_s13 + $0x18] sm:$0xf] %vm1381_vm2, %v1628_v45  ;;  %v1274_v16 = vpop.permute.xlu0 %1273  ;;  %v1218_v45 = vunpack.c.h.bf16 %v2723_v35 }
 0x5ce   :  { %v1311_v0 = vmul.f32 %v1274_v16, %v1215_v54  ;;  %v1424_v25 = vmul.f32 %v1408_v43, %v1274_v16  ;;  %v1610_v51 = vpack.c.bf16 %v1305_v31, %v1305_v31  ;;  %v1626_v53 = vpack.c.bf16 %v1418_v57, %v1418_v57 }
 0x5cf   :  { %v1259_v58 = vpop.permute.xlu1 %1258 }
 0x5d0   :  { %v1616_v21 = vpack.c.bf16 %v1311_v0, %v1311_v0  ;;  %v1632_v55 = vpack.c.bf16 %v1424_v25, %v1424_v25  ;;  %1386 = vst.msk [vmem:[%s2828_s12 + $0x10] sm:$0xf] %vm1381_vm2, %v1610_v51  ;;  %1498 = vst.msk [vmem:[%s2829_s13 + $0x10] sm:$0xf] %vm1381_vm2, %v1626_v53  ;;  %v1308_v22 = vmul.f32 %v1259_v58, %v1212_v49  ;;  %v1220_v0 = vunpack.c.h.bf16 %v1946_v47 }
 0x5d1   :  { %v1421_v38 = vmul.f32 %v1405_v6, %v1259_v58  ;;  %v1413_v25 = vunpack.c.h.bf16 %v1947_v59 }
 0x5d2   :  { %1392 = vst.msk [vmem:[%s2828_s12 + $0x28] sm:$0xf] %vm1381_vm2, %v1616_v21  ;;  %1504 = vst.msk [vmem:[%s2829_s13 + $0x28] sm:$0xf] %vm1381_vm2, %v1632_v55  ;;  %v1613_v48 = vpack.c.bf16 %v1308_v22, %v1308_v22 }
 0x5d3   :  { %v1629_v12 = vpack.c.bf16 %v1421_v38, %v1421_v38  ;;  %v1249_v37 = vpop.permute.xlu1 %1248 }
 0x5d4   :  { %1389 = vst.msk [vmem:[%s2828_s12 + $0x1c] sm:$0xf] %vm1381_vm2, %v1613_v48  ;;  %v1306_v9 = vmul.f32 %v1249_v37, %v1210_v4  ;;  %v1419_v52 = vmul.f32 %v1403_v28, %v1249_v37 }
 0x5d5   :  { %1501 = vst.msk [vmem:[%s2829_s13 + $0x1c] sm:$0xf] %vm1381_vm2, %v1629_v12 }
 0x5d6   :  { %v1611_v18 = vpack.c.bf16 %v1306_v9, %v1306_v9  ;;  %v1627_v24 = vpack.c.bf16 %v1419_v52, %v1419_v52 }
 0x5d7   :  { %v1284_v14 = vpop.permute.xlu0 %1283  ;;  %v1264_v10 = vpop.permute.xlu1 %1263 }
 0x5d8   :  { %1387 = vst.msk [vmem:[%s2828_s12 + $0x14] sm:$0xf] %vm1381_vm2, %v1611_v18  ;;  %1499 = vst.msk [vmem:[%s2829_s13 + $0x14] sm:$0xf] %vm1381_vm2, %v1627_v24  ;;  %v1313_v23 = vmul.f32 %v1284_v14, %v1217_v29  ;;  %v1426_v41 = vmul.f32 %v1410_v3, %v1284_v14  ;;  %v1309_v26 = vmul.f32 %v1264_v10, %v1213_v60 }
 0x5d9   :  { %v1422_v27 = vmul.f32 %v1406_v13, %v1264_v10 }
 0x5da   :  { %v1618_v1 = vpack.c.bf16 %v1313_v23, %v1313_v23  ;;  %v1634_v61 = vpack.c.bf16 %v1426_v41, %v1426_v41  ;;  %v1614_v5 = vpack.c.bf16 %v1309_v26, %v1309_v26 }
 0x5db   :  { %v1630_v2 = vpack.c.bf16 %v1422_v27, %v1422_v27  ;;  %v1294_v30 = vpop.permute.xlu0 %1293  ;;  %v1279_v33 = vpop.permute.xlu1 %1278 }
 0x5dc   :  { %1394 = vst.msk [vmem:[%s2828_s12 + $0x30] sm:$0xf] %vm1381_vm2, %v1618_v1  ;;  %1506 = vst.msk [vmem:[%s2829_s13 + $0x30] sm:$0xf] %vm1381_vm2, %v1634_v61  ;;  %v1315_v8 = vmul.f32 %v1294_v30, %v1219_v7  ;;  %v1428_v39 = vmul.f32 %v1412_v32, %v1294_v30  ;;  %v1312_v20 = vmul.f32 %v1279_v33, %v1216_v62 }
 0x5dd   :  { %1390 = vst.msk [vmem:[%s2828_s12 + $0x20] sm:$0xf] %vm1381_vm2, %v1614_v5  ;;  %1502 = vst.msk [vmem:[%s2829_s13 + $0x20] sm:$0xf] %vm1381_vm2, %v1630_v2  ;;  %v1425_v15 = vmul.f32 %v1409_v46, %v1279_v33 }
 0x5de   :  { %v1620_v36 = vpack.c.bf16 %v1315_v8, %v1315_v8  ;;  %v1636_v19 = vpack.c.bf16 %v1428_v39, %v1428_v39  ;;  %v1617_v40 = vpack.c.bf16 %v1312_v20, %v1312_v20 }
 0x5df   :  { %v1633_v54 = vpack.c.bf16 %v1425_v15, %v1425_v15  ;;  %v1269_v42 = vpop.permute.xlu1 %1268 }
 0x5e0   :  { %1396 = vst.msk [vmem:[%s2828_s12 + $0x38] sm:$0xf] %vm1381_vm2, %v1620_v36  ;;  %1508 = vst.msk [vmem:[%s2829_s13 + $0x38] sm:$0xf] %vm1381_vm2, %v1636_v19  ;;  %v1310_v43 = vmul.f32 %v1269_v42, %v1214_v34  ;;  %v1423_v44 = vmul.f32 %v1407_v17, %v1269_v42 }
 0x5e1   :  { %1393 = vst.msk [vmem:[%s2828_s12 + $0x2c] sm:$0xf] %vm1381_vm2, %v1617_v40  ;;  %1505 = vst.msk [vmem:[%s2829_s13 + $0x2c] sm:$0xf] %vm1381_vm2, %v1633_v54 }
 0x5e2   :  { %v1615_v31 = vpack.c.bf16 %v1310_v43, %v1310_v43  ;;  %v1631_v57 = vpack.c.bf16 %v1423_v44, %v1423_v44 }
 0x5e3   :  { %v1289_v16 = vpop.permute.xlu1 %1288 }
 0x5e4   :  { %1391 = vst.msk [vmem:[%s2828_s12 + $0x24] sm:$0xf] %vm1381_vm2, %v1615_v31  ;;  %1503 = vst.msk [vmem:[%s2829_s13 + $0x24] sm:$0xf] %vm1381_vm2, %v1631_v57  ;;  %v1314_v49 = vmul.f32 %v1289_v16, %v1218_v45  ;;  %v1427_v6 = vmul.f32 %v1411_v11, %v1289_v16 }
 0x5e6   :  { %v1619_v51 = vpack.c.bf16 %v1314_v49, %v1314_v49  ;;  %v1635_v53 = vpack.c.bf16 %v1427_v6, %v1427_v6 }
 0x5e7   :  { %v1299_v21 = vpop.permute.xlu1 %1298 }
 0x5e8   :  { %1395 = vst.msk [vmem:[%s2828_s12 + $0x34] sm:$0xf] %vm1381_vm2, %v1619_v51  ;;  %1507 = vst.msk [vmem:[%s2829_s13 + $0x34] sm:$0xf] %vm1381_vm2, %v1635_v53  ;;  %v1316_v55 = vmul.f32 %v1299_v21, %v1220_v0  ;;  %v1429_v58 = vmul.f32 %v1413_v25, %v1299_v21 }
 0x5ea   :  { %v1621_v28 = vpack.c.bf16 %v1316_v55, %v1316_v55  ;;  %v1637_v22 = vpack.c.bf16 %v1429_v58, %v1429_v58 }
 0x5ec   :  { %1397 = vst.msk [vmem:[%s2828_s12 + $0x3c] sm:$0xf] %vm1381_vm2, %v1621_v28  ;;  %1509 = vst.msk [vmem:[%s2829_s13 + $0x3c] sm:$0xf] %vm1381_vm2, %v1637_v22 }

// kernel: _lambda_.11
= control target key start
LH: loop header
LB: loop body
LE: loop exit
PB: predicated region body
PF: predicated region fallthrough
CT: control target
= control target key end

     0   :  { %v42_v20 = vlaneseq  ;;  %v1697_v50 = vmov 1.0|1.0   ;;  %s2242_s2 = inlined_call_operand.vmem [shape: bf16[512,32], index: 2, kind: input, shape index: {}]   ;;  %s2243_s0 = inlined_call_operand.vmem [shape: s32[1,512], index: 0, kind: input, shape index: {}]   ;;  %s2244_s3 = inlined_call_operand.vmem [shape: bf16[512,32], index: 3, kind: input, shape index: {}]   ;;  %s2245_s1 = inlined_call_operand.vmem [shape: s32[1,512], index: 1, kind: input, shape index: {}]   ;;  %s2246_s4 = inlined_call_operand.vmem [shape: bf16[64,32], index: 4, kind: output, shape index: {0}]   ;;  %s2247_s5 = inlined_call_operand.vmem [shape: bf16[64,32], index: 5, kind: output, shape index: {1}]  }
   0x1   :  { %v1633_v0 = vld [vmem:[%s2242_s2 + $0x78] sm:$0xff]   ;;  %v1637_v4 = vld [vmem:[%s2242_s2 + $0x70] sm:$0xff]   ;;  %v1641_v8 = vld [vmem:[%s2242_s2 + $0x68] sm:$0xff]  }
   0x2   :  { %v1634_v1 = vld [vmem:[%s2242_s2 + $0xf8] sm:$0xff]   ;;  %1471 = vmatprep.subr.bf16.mxu0 %v1633_v0  ;;  %v1638_v5 = vld [vmem:[%s2242_s2 + $0xf0] sm:$0xff]   ;;  %v1642_v9 = vld [vmem:[%s2242_s2 + $0xe8] sm:$0xff]   ;;  %v1801_v25 = vshrl.u32 %v42_v20, 7 }
   0x3   :  { %v1635_v2 = vld [vmem:[%s2242_s2 + $0x38] sm:$0xff]   ;;  %1511 = vmatprep.subr.bf16.mxu1 %v1634_v1  ;;  %v1639_v6 = vld [vmem:[%s2242_s2 + $0x30] sm:$0xff]   ;;  %v1643_v10 = vld [vmem:[%s2242_s2 + $0x28] sm:$0xff]  }
   0x4   :  { %v1636_v3 = vld [vmem:[%s2242_s2 + $0xb8] sm:$0xff]   ;;  %1472 = vmatpush3.bf16.msra.mxu0 %v1635_v2  ;;  %v1640_v7 = vld [vmem:[%s2242_s2 + $0xb0] sm:$0xff]   ;;  %v1644_v11 = vld [vmem:[%s2242_s2 + $0xa8] sm:$0xff]   ;;  %v68_v30 = vsub.s32 1, %v1801_v25  ;;  %v76_v32 = vsub.s32 3, %v1801_v25  ;;  %v64_v34 = vsub.s32 0, %v1801_v25 }
   0x5   :  { %1512 = vmatpush3.bf16.msra.mxu1 %v1636_v3  ;;  %1473 = vmatprep.subr.bf16.mxu0 %v1637_v4  ;;  %v1645_v12 = vld [vmem:[%s2242_s2 + $0x60] sm:$0xff]   ;;  %v1649_v16 = vld [vmem:[%s2242_s2 + $0x58] sm:$0xff]   ;;  %v1653_v21 = vld [vmem:[%s2242_s2 + $0x50] sm:$0xff]   ;;  %v72_v36 = vsub.s32 2, %v1801_v25  ;;  %v1832_v38 = vadd.s32 8, %v1801_v25  ;;  %v1853_v44 = vadd.s32 16, %v1801_v25 }
   0x6   :  { %1513 = vmatprep.subr.bf16.mxu1 %v1638_v5  ;;  %v1646_v13 = vld [vmem:[%s2242_s2 + $0xe0] sm:$0xff]   ;;  %v1650_v17 = vld [vmem:[%s2242_s2 + $0xd8] sm:$0xff]   ;;  %v1654_v22 = vld [vmem:[%s2242_s2 + $0xd0] sm:$0xff]   ;;  %v1863_v47 = vadd.s32 24, %v1801_v25  ;;  %v1928_v57 = vadd.s32 32, %v1801_v25  ;;  %v1931_v58 = vadd.s32 40, %v1801_v25 }
   0x7   :  { %v1647_v14 = vld [vmem:[%s2242_s2 + $0x20] sm:$0xff]   ;;  %v1651_v18 = vld [vmem:[%s2242_s2 + $0x18] sm:$0xff]   ;;  %v1655_v23 = vld [vmem:[%s2242_s2 + $0x10] sm:$0xff]   ;;  %v1975_v2 = vadd.s32 48, %v1801_v25  ;;  %v1978_v3 = vadd.s32 56, %v1801_v25 }
   0x8   :  { %1474 = vmatpush3.bf16.msra.mxu0 %v1639_v6  ;;  %v1648_v15 = vld [vmem:[%s2242_s2 + $0xa0] sm:$0xff]   ;;  %v1652_v19 = vld [vmem:[%s2242_s2 + $0x98] sm:$0xff]   ;;  %v1656_v24 = vld [vmem:[%s2242_s2 + $0x90] sm:$0xff]  }
   0x9   :  { %1514 = vmatpush3.bf16.msra.mxu1 %v1640_v7  ;;  %1475 = vmatprep.subr.bf16.mxu0 %v1641_v8  ;;  %v1657_v26 = vld [vmem:[%s2242_s2 + $0x48] sm:$0xff]   ;;  %v1661_v31 = vld [vmem:[%s2242_s2 + $0x40] sm:$0xff]   ;;  %v1665_v43 = vld [vmem:[%s2244_s3 + $0x78] sm:$0xff]  }
   0xa   :  { %1515 = vmatprep.subr.bf16.mxu1 %v1642_v9  ;;  %v1658_v27 = vld [vmem:[%s2242_s2 + $0xc8] sm:$0xff]   ;;  %v1662_v33 = vld [vmem:[%s2242_s2 + $0xc0] sm:$0xff]   ;;  %v1666_v46 = vld [vmem:[%s2244_s3 + $0xf8] sm:$0xff]  }
   0xb   :  { %v1659_v28 = vld [vmem:[%s2242_s2 + $0x8] sm:$0xff]   ;;  %v1663_v35 = vld [vmem:[%s2242_s2] sm:$0xff]   ;;  %v1667_v48 = vld [vmem:[%s2244_s3 + $0x38] sm:$0xff]  }
   0xc   :  { %1476 = vmatpush3.bf16.msra.mxu0 %v1643_v10  ;;  %v1660_v29 = vld [vmem:[%s2242_s2 + $0x88] sm:$0xff]   ;;  %v1664_v37 = vld [vmem:[%s2242_s2 + $0x80] sm:$0xff]   ;;  %v1668_v49 = vld [vmem:[%s2244_s3 + $0xb8] sm:$0xff]  }
   0xd   :  { %1516 = vmatpush3.bf16.msra.mxu1 %v1644_v11  ;;  %1477 = vmatprep.subr.bf16.mxu0 %v1645_v12  ;;  %v60_v39 = vld [vmem:[%s2243_s0] sm:$0xf]  ;;  %v1669_v51 = vld [vmem:[%s2244_s3 + $0x70] sm:$0xff]   ;;  %v1673_v55 = vld [vmem:[%s2244_s3 + $0x68] sm:$0xff]  }
   0xe   :  { %1517 = vmatprep.subr.bf16.mxu1 %v1646_v13  ;;  %v1839_v40 = vrot.slane %v60_v39, %v68_v30  ;;  %v1843_v41 = vrot.slane %v60_v39, %v76_v32  ;;  %v1847_v42 = vrot.slane %v60_v39, %v64_v34  ;;  %v1857_v45 = vrot.slane %v60_v39, %v72_v36  ;;  %v1670_v52 = vld [vmem:[%s2244_s3 + $0xf0] sm:$0xff]   ;;  %v1674_v56 = vld [vmem:[%s2244_s3 + $0xe8] sm:$0xff]   ;;  %v1677_v61 = vld [vmem:[%s2244_s3 + $0x60] sm:$0xff]  }
   0xf   :  { %v1671_v53 = vld [vmem:[%s2244_s3 + $0x30] sm:$0xff]   ;;  %v1675_v59 = vld [vmem:[%s2244_s3 + $0x28] sm:$0xff]   ;;  %v1678_v62 = vld [vmem:[%s2244_s3 + $0xe0] sm:$0xff]  }
  0x10   :  { %1478 = vmatpush3.bf16.msra.mxu0 %v1647_v14  ;;  %vm79_vm0 = vcmp.eq.s32.totalorder %v1801_v25, %v1839_v40  ;;  %vm83_vm1 = vcmp.eq.s32.totalorder %v1832_v38, %v1839_v40  ;;  %vm81_vm2 = vcmp.eq.s32.totalorder %v1801_v25, %v1843_v41  ;;  %vm85_vm3 = vcmp.eq.s32.totalorder %v1832_v38, %v1843_v41  ;;  %v1672_v54 = vld [vmem:[%s2244_s3 + $0xb0] sm:$0xff]   ;;  %v1676_v60 = vld [vmem:[%s2244_s3 + $0xa8] sm:$0xff]   ;;  %v1679_v63 = vld [vmem:[%s2244_s3 + $0x20] sm:$0xff]  }
  0x11   :  { %1518 = vmatpush3.bf16.msra.mxu1 %v1648_v15  ;;  %1479 = vmatprep.subr.bf16.mxu0 %v1649_v16  ;;  %vm1343_vm4 = vmpackc.low %vm83_vm1, %vm79_vm0  ;;  %vm78_vm5 = vcmp.eq.s32.totalorder %v1801_v25, %v1847_v42  ;;  %vm82_vm6 = vcmp.eq.s32.totalorder %v1832_v38, %v1847_v42  ;;  %vm80_vm7 = vcmp.eq.s32.totalorder %v1801_v25, %v1857_v45  ;;  %v1680_v0 = vld [vmem:[%s2244_s3 + $0xa0] sm:$0xff]   ;;  %v1681_v1 = vld [vmem:[%s2244_s3 + $0x58] sm:$0xff]  }
  0x12   :  { %1519 = vmatprep.subr.bf16.mxu1 %v1650_v17  ;;  %vm84_vm8 = vcmp.eq.s32.totalorder %v1832_v38, %v1857_v45  ;;  %1344 = vmatprep.mubr.msk.bf16.mxu0 %vm1343_vm4, %v1697_v50  ;;  %vm1359_vm9 = vmpackc.low %vm85_vm3, %vm81_vm2  ;;  %vm87_vm12 = vcmp.eq.s32.totalorder %v1853_v44, %v1839_v40  ;;  %vm91_vm13 = vcmp.eq.s32.totalorder %v1863_v47, %v1839_v40  ;;  %v1682_v4 = vld [vmem:[%s2244_s3 + $0xd8] sm:$0xff]   ;;  %v1685_v7 = vld [vmem:[%s2244_s3 + $0x50] sm:$0xff]  }
  0x13   :  { %1360 = vmatprep.mubr.msk.bf16.mxu1 %vm1359_vm9, %v1697_v50  ;;  %vm1345_vm10 = vmpackc.low %vm82_vm6, %vm78_vm5  ;;  %vm89_vm14 = vcmp.eq.s32.totalorder %v1853_v44, %v1843_v41  ;;  %vm93_vm15 = vcmp.eq.s32.totalorder %v1863_v47, %v1843_v41  ;;  %vm86_vm0 = vcmp.eq.s32.totalorder %v1853_v44, %v1847_v42  ;;  %vm90_vm1 = vcmp.eq.s32.totalorder %v1863_v47, %v1847_v42  ;;  %v1683_v5 = vld [vmem:[%s2244_s3 + $0x18] sm:$0xff]   ;;  %v61_v8 = vld [vmem:[%s2245_s1] sm:$0xf] }
  0x14   :  { %1480 = vmatpush3.bf16.msra.mxu0 %v1651_v18  ;;  %vm1361_vm11 = vmpackc.low %vm84_vm8, %vm80_vm7  ;;  %vm88_vm3 = vcmp.eq.s32.totalorder %v1853_v44, %v1857_v45  ;;  %vm92_vm4 = vcmp.eq.s32.totalorder %v1863_v47, %v1857_v45  ;;  %vm95_vm8 = vcmp.eq.s32.totalorder %v1928_v57, %v1839_v40  ;;  %vm99_vm9 = vcmp.eq.s32.totalorder %v1931_v58, %v1839_v40  ;;  %v1684_v6 = vld [vmem:[%s2244_s3 + $0x98] sm:$0xff]   ;;  %v1686_v9 = vld [vmem:[%s2244_s3 + $0xd0] sm:$0xff]  }
  0x15   :  { %1520 = vmatpush3.bf16.msra.mxu1 %v1652_v19  ;;  %1481 = vmatprep.subr.bf16.mxu0 %v1653_v21  ;;  %vm1347_vm2 = vmpackc.low %vm91_vm13, %vm87_vm12  ;;  %vm94_vm12 = vcmp.eq.s32.totalorder %v1928_v57, %v1847_v42  ;;  %vm98_vm13 = vcmp.eq.s32.totalorder %v1931_v58, %v1847_v42  ;;  %v1687_v10 = vld [vmem:[%s2244_s3 + $0x10] sm:$0xff]   ;;  %v1689_v12 = vld [vmem:[%s2244_s3 + $0x48] sm:$0xff]   ;;  %v2033_v14 = vrot.slane %v61_v8, %v68_v30 }
  0x16   :  { %1521 = vmatprep.subr.bf16.mxu1 %v1654_v22  ;;  %vm1363_vm5 = vmpackc.low %vm93_vm15, %vm89_vm14  ;;  %vm96_vm15 = vcmp.eq.s32.totalorder %v1928_v57, %v1857_v45  ;;  %v1688_v11 = vld [vmem:[%s2244_s3 + $0x90] sm:$0xff]   ;;  %v1690_v13 = vld [vmem:[%s2244_s3 + $0xc8] sm:$0xff]   ;;  %v2041_v16 = vrot.slane %v61_v8, %v76_v32  ;;  %v2045_v17 = vrot.slane %v61_v8, %v64_v34  ;;  %v2052_v19 = vrot.slane %v61_v8, %v72_v36 }
  0x17   :  { %vm1349_vm6 = vmpackc.low %vm90_vm1, %vm86_vm0  ;;  %vm100_vm0 = vcmp.eq.s32.totalorder %v1931_v58, %v1857_v45  ;;  %v1691_v15 = vld [vmem:[%s2244_s3 + $0x8] sm:$0xff]   ;;  %v1693_v20 = vld [vmem:[%s2244_s3 + $0x40] sm:$0xff]  }
  0x18   :  { %1482 = vmatpush3.bf16.msra.mxu0 %v1655_v23  ;;  %vm1365_vm7 = vmpackc.low %vm92_vm4, %vm88_vm3  ;;  %vm103_vm4 = vcmp.eq.s32.totalorder %v1975_v2, %v1839_v40  ;;  %v1692_v18 = vld [vmem:[%s2244_s3 + $0x88] sm:$0xff]   ;;  %v1694_v21 = vld [vmem:[%s2244_s3 + $0xc0] sm:$0xff]  }
  0x19   :  { %1522 = vmatpush3.bf16.msra.mxu1 %v1656_v24  ;;  %1483 = vmatprep.subr.bf16.mxu0 %v1657_v26  ;;  %vm1351_vm14 = vmpackc.low %vm99_vm9, %vm95_vm8  ;;  %vm102_vm8 = vcmp.eq.s32.totalorder %v1975_v2, %v1847_v42  ;;  %vm106_vm9 = vcmp.eq.s32.totalorder %v1978_v3, %v1847_v42  ;;  %v1695_v22 = vld [vmem:[%s2244_s3] sm:$0xff]   ;;  %v1698_v24 = vmov 0.0  }
  0x1a   :  { %1523 = vmatprep.subr.bf16.mxu1 %v1658_v27  ;;  %vm1369_vm3 = vmpackc.low %vm100_vm0, %vm96_vm15  ;;  %vm207_vm0 = vcmp.eq.s32.totalorder %v1801_v25, %v2033_v14  ;;  %v1696_v23 = vld [vmem:[%s2244_s3 + $0x80] sm:$0xff]  }
  0x1c   :  { %1484 = vmatpush3.bf16.msra.mxu0 %v1659_v28 }
  0x1d   :  { %1524 = vmatpush3.bf16.msra.mxu1 %v1660_v29  ;;  %1485 = vmatprep.subr.bf16.mxu0 %v1661_v31 }
  0x1e   :  { %1525 = vmatprep.subr.bf16.mxu1 %v1662_v33 }
  0x20   :  { %1486 = vmatpush3.bf16.msra.mxu0 %v1663_v35 }
  0x21   :  { %1526 = vmatpush3.bf16.msra.mxu1 %v1664_v37  ;;  %1551 = vmatprep.subr.bf16.mxu0 %v1665_v43 }
  0x22   :  { %1591 = vmatprep.subr.bf16.mxu1 %v1666_v46 }
  0x23   :  { %1346 = vmatmul.mubr.msk.bf16.vlgmr.msra.gmra.mxu0 %vm1345_vm10, %v1697_v50  ;;  %vm97_vm10 = vcmp.eq.s32.totalorder %v1928_v57, %v1843_v41 }
  0x24   :  { %1362 = vmatmul.mubr.msk.bf16.vlgmr.msra.gmra.mxu1 %vm1361_vm11, %v1697_v50  ;;  %1552 = vmatpush3.bf16.msra.mxu0 %v1667_v48  ;;  %vm101_vm11 = vcmp.eq.s32.totalorder %v1931_v58, %v1843_v41 }
  0x25   :  { %1592 = vmatpush3.bf16.msra.mxu1 %v1668_v49  ;;  %1553 = vmatprep.subr.bf16.mxu0 %v1669_v51  ;;  %vm1367_vm1 = vmpackc.low %vm101_vm11, %vm97_vm10  ;;  %vm104_vm11 = vcmp.eq.s32.totalorder %v1975_v2, %v1857_v45 }
  0x26   :  { %1593 = vmatprep.subr.bf16.mxu1 %v1670_v52  ;;  %1348 = vmatprep.mubr.msk.bf16.mxu0 %vm1347_vm2, %v1697_v50  ;;  %vm1353_vm2 = vmpackc.low %vm98_vm13, %vm94_vm12  ;;  %vm108_vm12 = vcmp.eq.s32.totalorder %v1978_v3, %v1857_v45 }
  0x27   :  { %1364 = vmatprep.mubr.msk.bf16.mxu1 %vm1363_vm5, %v1697_v50  ;;  %vm107_vm5 = vcmp.eq.s32.totalorder %v1978_v3, %v1839_v40  ;;  %vm1373_vm15 = vmpackc.low %vm108_vm12, %vm104_vm11  ;;  %vm219_vm11 = vcmp.eq.s32.totalorder %v1863_v47, %v2033_v14 }
  0x28   :  { %1554 = vmatpush3.bf16.msra.mxu0 %v1671_v53  ;;  %vm1355_vm10 = vmpackc.low %vm107_vm5, %vm103_vm4  ;;  %vm206_vm4 = vcmp.eq.s32.totalorder %v1801_v25, %v2045_v17  ;;  %vm210_vm5 = vcmp.eq.s32.totalorder %v1832_v38, %v2045_v17 }
  0x29   :  { %1594 = vmatpush3.bf16.msra.mxu1 %v1672_v54  ;;  %1555 = vmatprep.subr.bf16.mxu0 %v1673_v55  ;;  %vm1409_vm12 = vmpackc.low %vm210_vm5, %vm206_vm4  ;;  %vm216_vm4 = vcmp.eq.s32.totalorder %v1853_v44, %v2052_v19  ;;  %vm220_vm5 = vcmp.eq.s32.totalorder %v1863_v47, %v2052_v19 }
  0x2a   :  { %1595 = vmatprep.subr.bf16.mxu1 %v1674_v56 }
  0x2b   :  { %1350 = vmatmul.mubr.msk.bf16.gmra.mxu0 %vm1349_vm6, %v1697_v50  ;;  %vm105_vm6 = vcmp.eq.s32.totalorder %v1975_v2, %v1843_v41 }
  0x2c   :  { %1366 = vmatmul.mubr.msk.bf16.gmra.mxu1 %vm1365_vm7, %v1697_v50  ;;  %1556 = vmatpush3.bf16.msra.mxu0 %v1675_v59  ;;  %vm109_vm7 = vcmp.eq.s32.totalorder %v1978_v3, %v1843_v41 }
  0x2d   :  { %1596 = vmatpush3.bf16.msra.mxu1 %v1676_v60  ;;  %1557 = vmatprep.subr.bf16.mxu0 %v1677_v61  ;;  %vm1371_vm13 = vmpackc.low %vm109_vm7, %vm105_vm6  ;;  %vm208_vm7 = vcmp.eq.s32.totalorder %v1801_v25, %v2052_v19 }
  0x2e   :  { %1597 = vmatprep.subr.bf16.mxu1 %v1678_v62  ;;  %1352 = vmatprep.mubr.msk.bf16.mxu0 %vm1351_vm14, %v1697_v50  ;;  %vm1357_vm14 = vmpackc.low %vm106_vm9, %vm102_vm8  ;;  %vm212_vm8 = vcmp.eq.s32.totalorder %v1832_v38, %v2052_v19 }
  0x2f   :  { %1368 = vmatprep.mubr.msk.bf16.mxu1 %vm1367_vm1, %v1697_v50  ;;  %vm211_vm1 = vcmp.eq.s32.totalorder %v1832_v38, %v2033_v14 }
  0x30   :  { %1558 = vmatpush3.bf16.msra.mxu0 %v1679_v63  ;;  %vm1407_vm6 = vmpackc.low %vm211_vm1, %vm207_vm0  ;;  %vm214_vm1 = vcmp.eq.s32.totalorder %v1853_v44, %v2045_v17 }
  0x31   :  { %1598 = vmatpush3.bf16.msra.mxu1 %v1680_v0  ;;  %1559 = vmatprep.subr.bf16.mxu0 %v1681_v1 }
  0x32   :  { %1599 = vmatprep.subr.bf16.mxu1 %v1682_v4 }
  0x33   :  { %1354 = vmatmul.mubr.msk.bf16.gmra.mxu0 %vm1353_vm2, %v1697_v50  ;;  %vm209_vm2 = vcmp.eq.s32.totalorder %v1801_v25, %v2041_v16 }
  0x34   :  { %1370 = vmatmul.mubr.msk.bf16.gmra.mxu1 %vm1369_vm3, %v1697_v50  ;;  %1560 = vmatpush3.bf16.msra.mxu0 %v1683_v5  ;;  %vm213_vm3 = vcmp.eq.s32.totalorder %v1832_v38, %v2041_v16 }
  0x35   :  { %1600 = vmatpush3.bf16.msra.mxu1 %v1684_v6  ;;  %1561 = vmatprep.subr.bf16.mxu0 %v1685_v7  ;;  %vm1423_vm9 = vmpackc.low %vm213_vm3, %vm209_vm2  ;;  %vm218_vm2 = vcmp.eq.s32.totalorder %v1863_v47, %v2045_v17 }
  0x36   :  { %1601 = vmatprep.subr.bf16.mxu1 %v1686_v9  ;;  %1356 = vmatprep.mubr.msk.bf16.mxu0 %vm1355_vm10, %v1697_v50  ;;  %vm215_vm10 = vcmp.eq.s32.totalorder %v1853_v44, %v2033_v14 }
  0x37   :  { %1372 = vmatprep.mubr.msk.bf16.mxu1 %vm1371_vm13, %v1697_v50  ;;  %vm217_vm13 = vcmp.eq.s32.totalorder %v1853_v44, %v2041_v16  ;;  %vm1411_vm0 = vmpackc.low %vm219_vm11, %vm215_vm10  ;;  %vm229_vm10 = vcmp.eq.s32.totalorder %v1931_v58, %v2041_v16 }
  0x38   :  { %1562 = vmatpush3.bf16.msra.mxu0 %v1687_v10  ;;  %vm1429_vm11 = vmpackc.low %vm220_vm5, %vm216_vm4  ;;  %vm233_vm5 = vcmp.eq.s32.totalorder %v1975_v2, %v2041_v16 }
  0x39   :  { %1602 = vmatpush3.bf16.msra.mxu1 %v1688_v11  ;;  %1563 = vmatprep.subr.bf16.mxu0 %v1689_v12 }
  0x3a   :  { %1603 = vmatprep.subr.bf16.mxu1 %v1690_v13 }
  0x3b   :  { %1358 = vmatmul.mubr.msk.bf16.gmra.mxu0 %vm1357_vm14, %v1697_v50  ;;  %vm221_vm14 = vcmp.eq.s32.totalorder %v1863_v47, %v2041_v16 }
  0x3c   :  { %1374 = vmatmul.mubr.msk.bf16.gmra.mxu1 %vm1373_vm15, %v1697_v50  ;;  %1564 = vmatpush3.bf16.msra.mxu0 %v1691_v15  ;;  %vm1425_vm15 = vmpackc.low %vm212_vm8, %vm208_vm7  ;;  %vm227_vm7 = vcmp.eq.s32.totalorder %v1931_v58, %v2033_v14 }
  0x3d   :  { %1604 = vmatpush3.bf16.msra.mxu1 %v1692_v18  ;;  %1565 = vmatprep.subr.bf16.mxu0 %v1693_v20  ;;  %vm1427_vm3 = vmpackc.low %vm221_vm14, %vm217_vm13  ;;  %vm222_vm14 = vcmp.eq.s32.totalorder %v1928_v57, %v2045_v17 }
  0x3e   :  { %1605 = vmatprep.subr.bf16.mxu1 %v1694_v21  ;;  %1408 = vmatprep.mubr.msk.bf16.mxu0 %vm1407_vm6, %v1697_v50  ;;  %vm223_vm6 = vcmp.eq.s32.totalorder %v1928_v57, %v2033_v14  ;;  %vm1413_vm8 = vmpackc.low %vm218_vm2, %vm214_vm1  ;;  %vm228_vm1 = vcmp.eq.s32.totalorder %v1931_v58, %v2052_v19  ;;  %vm231_vm2 = vcmp.eq.s32.totalorder %v1975_v2, %v2033_v14 }
  0x3f   :  { %1424 = vmatprep.mubr.msk.bf16.mxu1 %vm1423_vm9, %v1697_v50  ;;  %vm225_vm9 = vcmp.eq.s32.totalorder %v1928_v57, %v2041_v16 }
  0x40   :  { %1566 = vmatpush3.bf16.msra.mxu0 %v1695_v22  ;;  %vm1431_vm13 = vmpackc.low %vm229_vm10, %vm225_vm9  ;;  %vm230_vm10 = vcmp.eq.s32.totalorder %v1975_v2, %v2045_v17 }
  0x41   :  { %1606 = vmatpush3.bf16.msra.mxu1 %v1696_v23 }
  0x43   :  { %1410 = vmatmul.mubr.msk.bf16.vlgmr.msra.gmra.mxu0 %vm1409_vm12, %v1697_v50  ;;  %vm1415_vm12 = vmpackc.low %vm227_vm7, %vm223_vm6  ;;  %vm237_vm6 = vcmp.eq.s32.totalorder %v1978_v3, %v2041_v16 }
  0x44   :  { %1426 = vmatmul.mubr.msk.bf16.vlgmr.msra.gmra.mxu1 %vm1425_vm15, %v1697_v50  ;;  %1412 = vmatprep.mubr.msk.bf16.mxu0 %vm1411_vm0, %v1697_v50  ;;  %vm226_vm15 = vcmp.eq.s32.totalorder %v1931_v58, %v2045_v17  ;;  %vm224_vm0 = vcmp.eq.s32.totalorder %v1928_v57, %v2052_v19  ;;  %vm1435_vm9 = vmpackc.low %vm237_vm6, %vm233_vm5 }
  0x45   :  { %1428 = vmatprep.mubr.msk.bf16.mxu1 %vm1427_vm3, %v1697_v50  ;;  %vm235_vm3 = vcmp.eq.s32.totalorder %v1978_v3, %v2033_v14  ;;  %vm1417_vm4 = vmpackc.low %vm226_vm15, %vm222_vm14 }
  0x46   :  { %vm1433_vm7 = vmpackc.low %vm228_vm1, %vm224_vm0  ;;  %vm24_vm0 = vcmask 261120   ;;  %vm1182_vm1 = vcmask 257024  }
  0x47   :  { %25 = vst.msk [vmem:[#allocation2] sm:$0xff] %vm24_vm0, %v1698_v24  ;;  %26 = vst.msk [vmem:[#allocation2 + $0x8] sm:$0xff] %vm24_vm0, %v1698_v24 }
  0x48   :  { %27 = vst.msk [vmem:[#allocation2 + $0x10] sm:$0xff] %vm24_vm0, %v1698_v24  ;;  %28 = vst.msk [vmem:[#allocation2 + $0x18] sm:$0xff] %vm24_vm0, %v1698_v24 }
  0x49   :  { %29 = vst.msk [vmem:[#allocation2 + $0x20] sm:$0xff] %vm24_vm0, %v1698_v24  ;;  %30 = vst.msk [vmem:[#allocation2 + $0x28] sm:$0xff] %vm24_vm0, %v1698_v24 }
  0x4a   :  { %31 = vst.msk [vmem:[#allocation2 + $0x30] sm:$0xff] %vm24_vm0, %v1698_v24  ;;  %32 = vst.msk [vmem:[#allocation2 + $0x38] sm:$0xff] %vm24_vm0, %v1698_v24 }
  0x4b   :  { %1414 = vmatmul.mubr.msk.bf16.gmra.mxu0 %vm1413_vm8, %v1697_v50  ;;  %vm1419_vm8 = vmpackc.low %vm235_vm3, %vm231_vm2  ;;  %33 = vst.msk [vmem:[#allocation3] sm:$0xff] %vm24_vm0, %v1698_v24 }
  0x4c   :  { %1430 = vmatmul.mubr.msk.bf16.gmra.mxu1 %vm1429_vm11, %v1697_v50  ;;  %1416 = vmatprep.mubr.msk.bf16.mxu0 %vm1415_vm12, %v1697_v50  ;;  %vm234_vm11 = vcmp.eq.s32.totalorder %v1978_v3, %v2045_v17  ;;  %vm232_vm12 = vcmp.eq.s32.totalorder %v1975_v2, %v2052_v19  ;;  %34 = vst.msk [vmem:[#allocation3 + $0x8] sm:$0xff] %vm24_vm0, %v1698_v24  ;;  %35 = vst.msk [vmem:[#allocation3 + $0x10] sm:$0xff] %vm24_vm0, %v1698_v24 }
  0x4d   :  { %1432 = vmatprep.mubr.msk.bf16.mxu1 %vm1431_vm13, %v1697_v50  ;;  %vm236_vm13 = vcmp.eq.s32.totalorder %v1978_v3, %v2052_v19  ;;  %vm1421_vm14 = vmpackc.low %vm234_vm11, %vm230_vm10  ;;  %36 = vst.msk [vmem:[#allocation3 + $0x18] sm:$0xff] %vm24_vm0, %v1698_v24 }
  0x4e   :  { %vm1437_vm15 = vmpackc.low %vm236_vm13, %vm232_vm12  ;;  %37 = vst.msk [vmem:[#allocation3 + $0x20] sm:$0xff] %vm24_vm0, %v1698_v24  ;;  %v446_v32 = vld [vmem:[#allocation2] sm:$0xff]  ;;  %v447_v41 = vld [vmem:[#allocation2 + $0x8] sm:$0xff] }
  0x4f   :  { %38 = vst.msk [vmem:[#allocation3 + $0x28] sm:$0xff] %vm24_vm0, %v1698_v24  ;;  %39 = vst.msk [vmem:[#allocation3 + $0x30] sm:$0xff] %vm24_vm0, %v1698_v24  ;;  %v449_v60 = vld [vmem:[#allocation2 + $0x18] sm:$0xff] }
  0x50   :  { %40 = vst.msk [vmem:[#allocation3 + $0x38] sm:$0xff] %vm24_vm0, %v1698_v24  ;;  %v450_v7 = vld [vmem:[#allocation2 + $0x20] sm:$0xff]  ;;  %v451_v18 = vld [vmem:[#allocation2 + $0x28] sm:$0xff] }
  0x53   :  { %1418 = vmatmul.mubr.msk.bf16.gmra.mxu0 %vm1417_vm4, %v1697_v50 }
  0x54   :  { %1434 = vmatmul.mubr.msk.bf16.gmra.mxu1 %vm1433_vm7, %v1697_v50  ;;  %1420 = vmatprep.mubr.msk.bf16.mxu0 %vm1419_vm8, %v1697_v50 }
  0x55   :  { %1436 = vmatprep.mubr.msk.bf16.mxu1 %vm1435_vm9, %v1697_v50 }
  0x5b   :  { %1422 = vmatmul.mubr.msk.bf16.gmra.mxu0 %vm1421_vm14, %v1697_v50 }
  0x5c   :  { %1438 = vmatmul.mubr.msk.bf16.gmra.mxu1 %vm1437_vm15, %v1697_v50  ;;  %v448_v50 = vld [vmem:[#allocation2 + $0x10] sm:$0xff] }
  0xe3   :  { %v1487_v25 = vpop.f32.mrf.mxu0 }
  0xe4   :  { %v1527_v26 = vpop.f32.mrf.mxu1 }
  0xe5   :  { %v1488_v27 = vpop.f32.mrf.mxu0 }
  0xe6   :  { %v1489_v28 = vadd.f32 %v1488_v27, %v1487_v25  ;;  %v1528_v29 = vpop.f32.mrf.mxu1 }
  0xe7   :  { %v1529_v30 = vadd.f32 %v1528_v29, %v1527_v26  ;;  %v1490_v31 = vpop.f32.mrf.mxu0  ;;  %v452_v29 = vld [vmem:[#allocation2 + $0x30] sm:$0xff] }
  0xe8   :  { %v1530_v33 = vpop.f32.mrf.mxu1 }
  0xe9   :  { %v746_v34 = vadd.f32 %v1529_v30, %v1489_v28  ;;  %v1491_v35 = vpop.f32.mrf.mxu0 }
  0xea   :  { %v1492_v36 = vadd.f32 %v1491_v35, %v1490_v31  ;;  %v1531_v37 = vpop.f32.mrf.mxu1 }
  0xeb   :  { %v776_v38 = vadd.f32 %v746_v34, %v446_v32  ;;  %v1532_v39 = vadd.f32 %v1531_v37, %v1530_v33  ;;  %v1493_v40 = vpop.f32.mrf.mxu0 }
  0xec   :  { %v1533_v42 = vpop.f32.mrf.mxu1 }
  0xed   :  { %785 = vst.msk [vmem:[#allocation2] sm:$0xff] %vm24_vm0, %v776_v38  ;;  %v749_v43 = vadd.f32 %v1532_v39, %v1492_v36  ;;  %v1494_v44 = vpop.f32.mrf.mxu0  ;;  %v453_v39 = vld [vmem:[#allocation2 + $0x38] sm:$0xff] }
  0xee   :  { %v1495_v45 = vadd.f32 %v1494_v44, %v1493_v40  ;;  %v1534_v46 = vpop.f32.mrf.mxu1 }
  0xef   :  { %v777_v47 = vadd.f32 %v749_v43, %v447_v41  ;;  %v1535_v48 = vadd.f32 %v1534_v46, %v1533_v42  ;;  %v1496_v49 = vpop.f32.mrf.mxu0 }
  0xf0   :  { %v1536_v51 = vpop.f32.mrf.mxu1 }
  0xf1   :  { %786 = vst.msk [vmem:[#allocation2 + $0x8] sm:$0xff] %vm24_vm0, %v777_v47  ;;  %v754_v52 = vadd.f32 %v1535_v48, %v1495_v45  ;;  %v1497_v53 = vpop.f32.mrf.mxu0 }
  0xf2   :  { %v1498_v54 = vadd.f32 %v1497_v53, %v1496_v49  ;;  %v1537_v55 = vpop.f32.mrf.mxu1 }
  0xf3   :  { %v778_v56 = vadd.f32 %v754_v52, %v448_v50  ;;  %v1538_v57 = vadd.f32 %v1537_v55, %v1536_v51  ;;  %v1499_v58 = vpop.f32.mrf.mxu0  ;;  %v793_v52 = vld [vmem:[#allocation3] sm:$0xff] }
  0xf4   :  { %v1142_v59 = vld [vmem:[#allocation2] sm:$0xff]  ;;  %v1539_v61 = vpop.f32.mrf.mxu1 }
  0xf5   :  { %v1455_v62 = vpack.c.bf16 %v1142_v59, %v1142_v59  ;;  %787 = vst.msk [vmem:[#allocation2 + $0x10] sm:$0xff] %vm24_vm0, %v778_v56  ;;  %v757_v63 = vadd.f32 %v1538_v57, %v1498_v54  ;;  %v1500_v0 = vpop.f32.mrf.mxu0 }
  0xf6   :  { %v1501_v1 = vadd.f32 %v1500_v0, %v1499_v58  ;;  %v1540_v2 = vpop.f32.mrf.mxu1 }
  0xf7   :  { %1183 = vst.msk [vmem:[%s2246_s4] sm:$0xf] %vm1182_vm1, %v1455_v62  ;;  %v779_v3 = vadd.f32 %v757_v63, %v449_v60  ;;  %v1541_v4 = vadd.f32 %v1540_v2, %v1539_v61  ;;  %v1502_v5 = vpop.f32.mrf.mxu0  ;;  %v794_v63 = vld [vmem:[#allocation3 + $0x8] sm:$0xff] }
  0xf8   :  { %v1143_v6 = vld [vmem:[#allocation2 + $0x8] sm:$0xff]  ;;  %v1542_v8 = vpop.f32.mrf.mxu1 }
  0xf9   :  { %v1456_v9 = vpack.c.bf16 %v1143_v6, %v1143_v6  ;;  %788 = vst.msk [vmem:[#allocation2 + $0x18] sm:$0xff] %vm24_vm0, %v779_v3  ;;  %v762_v10 = vadd.f32 %v1541_v4, %v1501_v1  ;;  %v1503_v11 = vpop.f32.mrf.mxu0 }
  0xfa   :  { %v1504_v12 = vadd.f32 %v1503_v11, %v1502_v5  ;;  %v1543_v13 = vpop.f32.mrf.mxu1 }
  0xfb   :  { %1184 = vst.msk [vmem:[%s2246_s4 + $0x4] sm:$0xf] %vm1182_vm1, %v1456_v9  ;;  %v780_v14 = vadd.f32 %v762_v10, %v450_v7  ;;  %v1544_v15 = vadd.f32 %v1543_v13, %v1542_v8  ;;  %v1505_v16 = vpop.f32.mrf.mxu0  ;;  %v795_v10 = vld [vmem:[#allocation3 + $0x10] sm:$0xff] }
  0xfc   :  { %v1144_v17 = vld [vmem:[#allocation2 + $0x10] sm:$0xff]  ;;  %v1545_v19 = vpop.f32.mrf.mxu1 }
  0xfd   :  { %v1457_v20 = vpack.c.bf16 %v1144_v17, %v1144_v17  ;;  %789 = vst.msk [vmem:[#allocation2 + $0x20] sm:$0xff] %vm24_vm0, %v780_v14  ;;  %v765_v21 = vadd.f32 %v1544_v15, %v1504_v12  ;;  %v1506_v22 = vpop.f32.mrf.mxu0 }
  0xfe   :  { %v1507_v23 = vadd.f32 %v1506_v22, %v1505_v16  ;;  %v1546_v24 = vpop.f32.mrf.mxu1 }
  0xff   :  { %1185 = vst.msk [vmem:[%s2246_s4 + $0x8] sm:$0xf] %vm1182_vm1, %v1457_v20  ;;  %v781_v25 = vadd.f32 %v765_v21, %v451_v18  ;;  %v1547_v26 = vadd.f32 %v1546_v24, %v1545_v19  ;;  %v1508_v27 = vpop.f32.mrf.mxu0  ;;  %v796_v20 = vld [vmem:[#allocation3 + $0x18] sm:$0xff] }
 0x100   :  { %v1145_v28 = vld [vmem:[#allocation2 + $0x18] sm:$0xff]  ;;  %v1548_v30 = vpop.f32.mrf.mxu1 }
 0x101   :  { %v1458_v31 = vpack.c.bf16 %v1145_v28, %v1145_v28  ;;  %790 = vst.msk [vmem:[#allocation2 + $0x28] sm:$0xff] %vm24_vm0, %v781_v25  ;;  %v770_v32 = vadd.f32 %v1547_v26, %v1507_v23  ;;  %v1509_v33 = vpop.f32.mrf.mxu0 }
 0x102   :  { %v1510_v34 = vadd.f32 %v1509_v33, %v1508_v27  ;;  %v1549_v35 = vpop.f32.mrf.mxu1 }
 0x103   :  { %1186 = vst.msk [vmem:[%s2246_s4 + $0xc] sm:$0xf] %vm1182_vm1, %v1458_v31  ;;  %v782_v36 = vadd.f32 %v770_v32, %v452_v29  ;;  %v1550_v37 = vadd.f32 %v1549_v35, %v1548_v30  ;;  %v1567_v42 = vpop.f32.mrf.mxu0  ;;  %v797_v31 = vld [vmem:[#allocation3 + $0x20] sm:$0xff] }
 0x104   :  { %v1146_v38 = vld [vmem:[#allocation2 + $0x20] sm:$0xff]  ;;  %v1607_v43 = vpop.f32.mrf.mxu1 }
 0x105   :  { %v1459_v40 = vpack.c.bf16 %v1146_v38, %v1146_v38  ;;  %791 = vst.msk [vmem:[#allocation2 + $0x30] sm:$0xff] %vm24_vm0, %v782_v36  ;;  %v773_v41 = vadd.f32 %v1550_v37, %v1510_v34  ;;  %v1568_v45 = vpop.f32.mrf.mxu0 }
 0x106   :  { %v1569_v47 = vadd.f32 %v1568_v45, %v1567_v42  ;;  %v1608_v48 = vpop.f32.mrf.mxu1  ;;  %v798_v42 = vld [vmem:[#allocation3 + $0x28] sm:$0xff] }
 0x107   :  { %1187 = vst.msk [vmem:[%s2246_s4 + $0x10] sm:$0xf] %vm1182_vm1, %v1459_v40  ;;  %v783_v44 = vadd.f32 %v773_v41, %v453_v39  ;;  %v1609_v50 = vadd.f32 %v1608_v48, %v1607_v43  ;;  %v1570_v51 = vpop.f32.mrf.mxu0 }
 0x108   :  { %v1147_v46 = vld [vmem:[#allocation2 + $0x28] sm:$0xff]  ;;  %v1610_v53 = vpop.f32.mrf.mxu1 }
 0x109   :  { %v1460_v49 = vpack.c.bf16 %v1147_v46, %v1147_v46  ;;  %792 = vst.msk [vmem:[#allocation2 + $0x38] sm:$0xff] %vm24_vm0, %v783_v44  ;;  %v1093_v54 = vadd.f32 %v1609_v50, %v1569_v47  ;;  %v1571_v55 = vpop.f32.mrf.mxu0 }
 0x10a   :  { %v1572_v57 = vadd.f32 %v1571_v55, %v1570_v51  ;;  %v1611_v58 = vpop.f32.mrf.mxu1 }
 0x10b   :  { %1188 = vst.msk [vmem:[%s2246_s4 + $0x14] sm:$0xf] %vm1182_vm1, %v1460_v49  ;;  %v1123_v60 = vadd.f32 %v1093_v54, %v793_v52  ;;  %v1612_v61 = vadd.f32 %v1611_v58, %v1610_v53  ;;  %v1573_v62 = vpop.f32.mrf.mxu0  ;;  %v799_v53 = vld [vmem:[#allocation3 + $0x30] sm:$0xff] }
 0x10c   :  { %v1148_v56 = vld [vmem:[#allocation2 + $0x30] sm:$0xff]  ;;  %v1613_v0 = vpop.f32.mrf.mxu1 }
 0x10d   :  { %v1461_v59 = vpack.c.bf16 %v1148_v56, %v1148_v56  ;;  %1131 = vst.msk [vmem:[#allocation3] sm:$0xff] %vm24_vm0, %v1123_v60  ;;  %v1096_v1 = vadd.f32 %v1612_v61, %v1572_v57  ;;  %v1574_v2 = vpop.f32.mrf.mxu0 }
 0x10e   :  { %v1575_v4 = vadd.f32 %v1574_v2, %v1573_v62  ;;  %v1614_v5 = vpop.f32.mrf.mxu1 }
 0x10f   :  { %1189 = vst.msk [vmem:[%s2246_s4 + $0x18] sm:$0xf] %vm1182_vm1, %v1461_v59  ;;  %v1124_v7 = vadd.f32 %v1096_v1, %v794_v63  ;;  %v1615_v8 = vadd.f32 %v1614_v5, %v1613_v0  ;;  %v1576_v9 = vpop.f32.mrf.mxu0  ;;  %v800_v63 = vld [vmem:[#allocation3 + $0x38] sm:$0xff] }
 0x110   :  { %v1149_v3 = vld [vmem:[#allocation2 + $0x38] sm:$0xff]  ;;  %v1616_v11 = vpop.f32.mrf.mxu1 }
 0x111   :  { %v1462_v6 = vpack.c.bf16 %v1149_v3, %v1149_v3  ;;  %1132 = vst.msk [vmem:[#allocation3 + $0x8] sm:$0xff] %vm24_vm0, %v1124_v7  ;;  %v1101_v12 = vadd.f32 %v1615_v8, %v1575_v4  ;;  %v1577_v13 = vpop.f32.mrf.mxu0 }
 0x112   :  { %v1578_v14 = vadd.f32 %v1577_v13, %v1576_v9  ;;  %v1617_v15 = vpop.f32.mrf.mxu1 }
 0x113   :  { %1190 = vst.msk [vmem:[%s2246_s4 + $0x1c] sm:$0xf] %vm1182_vm1, %v1462_v6  ;;  %v1125_v16 = vadd.f32 %v1101_v12, %v795_v10  ;;  %v1618_v17 = vadd.f32 %v1617_v15, %v1616_v11  ;;  %v1579_v18 = vpop.f32.mrf.mxu0 }
 0x114   :  { %v1191_v19 = vld [vmem:[#allocation3] sm:$0xff]  ;;  %v1619_v21 = vpop.f32.mrf.mxu1 }
 0x115   :  { %v1463_v22 = vpack.c.bf16 %v1191_v19, %v1191_v19  ;;  %1133 = vst.msk [vmem:[#allocation3 + $0x10] sm:$0xff] %vm24_vm0, %v1125_v16  ;;  %v1104_v23 = vadd.f32 %v1618_v17, %v1578_v14  ;;  %v1580_v24 = vpop.f32.mrf.mxu0 }
 0x116   :  { %v1581_v25 = vadd.f32 %v1580_v24, %v1579_v18  ;;  %v1620_v26 = vpop.f32.mrf.mxu1 }
 0x117   :  { %1231 = vst.msk [vmem:[%s2247_s5] sm:$0xf] %vm1182_vm1, %v1463_v22  ;;  %v1126_v27 = vadd.f32 %v1104_v23, %v796_v20  ;;  %v1621_v28 = vadd.f32 %v1620_v26, %v1619_v21  ;;  %v1582_v29 = vpop.f32.mrf.mxu0 }
 0x118   :  { %v1192_v30 = vld [vmem:[#allocation3 + $0x8] sm:$0xff]  ;;  %v1622_v32 = vpop.f32.mrf.mxu1 }
 0x119   :  { %v1464_v33 = vpack.c.bf16 %v1192_v30, %v1192_v30  ;;  %1134 = vst.msk [vmem:[#allocation3 + $0x18] sm:$0xff] %vm24_vm0, %v1126_v27  ;;  %v1109_v34 = vadd.f32 %v1621_v28, %v1581_v25  ;;  %v1583_v35 = vpop.f32.mrf.mxu0 }
 0x11a   :  { %v1584_v36 = vadd.f32 %v1583_v35, %v1582_v29  ;;  %v1623_v37 = vpop.f32.mrf.mxu1 }
 0x11b   :  { %1232 = vst.msk [vmem:[%s2247_s5 + $0x4] sm:$0xf] %vm1182_vm1, %v1464_v33  ;;  %v1127_v38 = vadd.f32 %v1109_v34, %v797_v31  ;;  %v1624_v39 = vadd.f32 %v1623_v37, %v1622_v32  ;;  %v1585_v40 = vpop.f32.mrf.mxu0 }
 0x11c   :  { %v1193_v41 = vld [vmem:[#allocation3 + $0x10] sm:$0xff]  ;;  %v1625_v43 = vpop.f32.mrf.mxu1 }
 0x11d   :  { %v1465_v44 = vpack.c.bf16 %v1193_v41, %v1193_v41  ;;  %1135 = vst.msk [vmem:[#allocation3 + $0x20] sm:$0xff] %vm24_vm0, %v1127_v38  ;;  %v1112_v45 = vadd.f32 %v1624_v39, %v1584_v36  ;;  %v1586_v46 = vpop.f32.mrf.mxu0 }
 0x11e   :  { %v1587_v47 = vadd.f32 %v1586_v46, %v1585_v40  ;;  %v1626_v48 = vpop.f32.mrf.mxu1 }
 0x11f   :  { %1233 = vst.msk [vmem:[%s2247_s5 + $0x8] sm:$0xf] %vm1182_vm1, %v1465_v44  ;;  %v1128_v49 = vadd.f32 %v1112_v45, %v798_v42  ;;  %v1627_v50 = vadd.f32 %v1626_v48, %v1625_v43  ;;  %v1588_v51 = vpop.f32.mrf.mxu0 }
 0x120   :  { %v1194_v52 = vld [vmem:[#allocation3 + $0x18] sm:$0xff]  ;;  %v1628_v54 = vpop.f32.mrf.mxu1 }
 0x121   :  { %v1466_v55 = vpack.c.bf16 %v1194_v52, %v1194_v52  ;;  %1136 = vst.msk [vmem:[#allocation3 + $0x28] sm:$0xff] %vm24_vm0, %v1128_v49  ;;  %v1117_v56 = vadd.f32 %v1627_v50, %v1587_v47  ;;  %v1589_v57 = vpop.f32.mrf.mxu0 }
 0x122   :  { %v1590_v58 = vadd.f32 %v1589_v57, %v1588_v51  ;;  %v1629_v59 = vpop.f32.mrf.mxu1 }
 0x123   :  { %1234 = vst.msk [vmem:[%s2247_s5 + $0xc] sm:$0xf] %vm1182_vm1, %v1466_v55  ;;  %v1129_v60 = vadd.f32 %v1117_v56, %v799_v53  ;;  %v1630_v61 = vadd.f32 %v1629_v59, %v1628_v54 }
 0x124   :  { %v1195_v62 = vld [vmem:[#allocation3 + $0x20] sm:$0xff] }
 0x125   :  { %v1467_v0 = vpack.c.bf16 %v1195_v62, %v1195_v62  ;;  %1137 = vst.msk [vmem:[#allocation3 + $0x30] sm:$0xff] %vm24_vm0, %v1129_v60  ;;  %v1120_v1 = vadd.f32 %v1630_v61, %v1590_v58 }
 0x127   :  { %1235 = vst.msk [vmem:[%s2247_s5 + $0x10] sm:$0xf] %vm1182_vm1, %v1467_v0  ;;  %v1130_v2 = vadd.f32 %v1120_v1, %v800_v63 }
 0x128   :  { %v1196_v3 = vld [vmem:[#allocation3 + $0x28] sm:$0xff] }
 0x129   :  { %v1468_v4 = vpack.c.bf16 %v1196_v3, %v1196_v3  ;;  %1138 = vst.msk [vmem:[#allocation3 + $0x38] sm:$0xff] %vm24_vm0, %v1130_v2 }
 0x12b   :  { %1236 = vst.msk [vmem:[%s2247_s5 + $0x14] sm:$0xf] %vm1182_vm1, %v1468_v4 }
 0x12c   :  { %v1197_v5 = vld [vmem:[#allocation3 + $0x30] sm:$0xff] }
 0x12d   :  { %v1469_v6 = vpack.c.bf16 %v1197_v5, %v1197_v5 }
 0x12f   :  { %1237 = vst.msk [vmem:[%s2247_s5 + $0x18] sm:$0xf] %vm1182_vm1, %v1469_v6 }
 0x130   :  { %v1198_v7 = vld [vmem:[#allocation3 + $0x38] sm:$0xff] }
 0x131   :  { %v1470_v8 = vpack.c.bf16 %v1198_v7, %v1198_v7 }
 0x133   :  { %1238 = vst.msk [vmem:[%s2247_s5 + $0x1c] sm:$0xf] %vm1182_vm1, %v1470_v8 }

// kernel: _lambda_.16
= control target key start
LH: loop header
LB: loop body
LE: loop exit
PB: predicated region body
PF: predicated region fallthrough
CT: control target
= control target key end

     0   :  { %v18_v0 = vlaneseq  ;;  %v148_v1 = vmov 0.0   ;;  %vm149_vm0 = vmmov 0   ;;  %vm16_vm1 = vcmask 261120   ;;  %s186_s1 = inlined_call_operand.vmem [shape: bf16[64,32], index: 1, kind: input, shape index: {}]   ;;  %s187_s0 = inlined_call_operand.vmem [shape: s32[1,64], index: 0, kind: input, shape index: {}]   ;;  %s188_s2 = inlined_call_operand.vmem [shape: f32[8,32], index: 2, kind: output, shape index: {}]  }
   0x1   :  { %130 = vmatprep.subr.bf16.mxu0 %v148_v1  ;;  %v144_v2 = vld [vmem:[%s186_s1 + $0x18] sm:$0xff]   ;;  %138 = vmatprep.mubr.msk.bf16.mxu0 %vm149_vm0, %v148_v1  ;;  %17 = vst.msk [vmem:[#allocation2] sm:$0xff] %vm16_vm1, %v148_v1  ;;  %v145_v3 = vld [vmem:[%s186_s1 + $0x10] sm:$0xff]   ;;  %v118_v5 = vld [vmem:[%s187_s0] ss:$0 sm:$0xff]  ;;  %vm62_vm3 = vcmask 523264  }
   0x2   :  { %131 = vmatpush3.bf16.msra.mxu0 %v144_v2  ;;  %v19_v4 = vshrl.u32 %v18_v0, 7  ;;  %v146_v6 = vld [vmem:[%s186_s1 + $0x8] sm:$0xff]   ;;  %v147_v7 = vld [vmem:[%s186_s1] sm:$0xff]  }
   0x3   :  { %132 = vmatprep.subr.bf16.mxu0 %v148_v1 }
   0x4   :  { %vm25_vm2 = vcmp.eq.s32.totalorder %v19_v4, %v118_v5 }
   0x5   :  { %v119_v8 = vsel %vm25_vm2, 1.0, %v148_v1 }
   0x6   :  { %133 = vmatpush3.bf16.msra.mxu0 %v145_v3  ;;  %v28_v9 = vpack.c.bf16 %v119_v8, %v119_v8 }
   0x7   :  { %134 = vmatprep.subr.bf16.mxu0 %v148_v1 }
   0x8   :  { %v29_v10 = vld [vmem:[#allocation2] sm:$0xff] }
   0xa   :  { %135 = vmatpush3.bf16.msra.mxu0 %v146_v6 }
   0xb   :  { %136 = vmatprep.subr.bf16.mxu0 %v148_v1 }
   0xe   :  { %137 = vmatpush3.bf16.msra.mxu0 %v147_v7 }
  0x11   :  { %139 = vmatmul.mubr.msk.bf16.vlgmr.msra.gmra.mxu0 %vm62_vm3, %v28_v9 }
  0xd1   :  { %v100_v11 = vpop.f32.mrf.mxu0 }
  0xd2   :  { %v106_v12 = vadd.f32 %v100_v11, %v29_v10 }
  0xd3   :  { %v140_v13 = vpop.f32.mrf.mxu0 }
  0xd4   :  { %108 = vst.msk [vmem:[#allocation2] sm:$0xff] %vm16_vm1, %v106_v12 }
  0xd5   :  { %v103_v14 = vpop.f32.mrf.mxu0 }
  0xd7   :  { %v141_v15 = vpop.f32.mrf.mxu0 }
  0xdb   :  { %v112_v16 = vld [vmem:[#allocation2] sm:$0xff] }
  0xdc   :  { %113 = vst.msk [vmem:[%s188_s2] sm:$0xff] %vm16_vm1, %v112_v16 }

// kernel: _lambda_.17
= control target key start
LH: loop header
LB: loop body
LE: loop exit
PB: predicated region body
PF: predicated region fallthrough
CT: control target
= control target key end

     0   :  { %v577_v0 = vmov 0.0   ;;  %vm578_vm0 = vmmov 0   ;;  %vm62_vm1 = vcmask 261120   ;;  %vm479_vm2 = vcmask 23552   ;;  %s777_s1 = inlined_call_operand.vmem [shape: f32[32,32], index: 1, kind: input, shape index: {}]   ;;  %s778_s0 = inlined_call_operand.vmem [shape: f32[8,32], index: 0, kind: input, shape index: {}]   ;;  %s779_s2 = inlined_call_operand.vmem [shape: f32[1,32], index: 2, kind: input, shape index: {}]   ;;  %s780_s5 = inlined_call_operand.vmem [shape: f32[32,32], index: 5, kind: input, shape index: {}]   ;;  %s781_s3 = inlined_call_operand.vmem [shape: f32[1,32], index: 3, kind: input, shape index: {}, may-alias: {3,7,11}]   ;;  %s782_s4 = inlined_call_operand.vmem [shape: f32[1,32], index: 4, kind: input, shape index: {}, may-alias: {4,8,12}]   ;;  %s783_s6 = inlined_call_operand.vmem [shape: f32[1,32], index: 6, kind: input, shape index: {}]   ;;  %s784_s9 = inlined_call_operand.vmem [shape: f32[32,32], index: 9, kind: input, shape index: {}]   ;;  %s785_s7 = inlined_call_operand.vmem [shape: f32[1,32], index: 7, kind: input, shape index: {}, may-alias: {3,7,11}]   ;;  %s786_s8 = inlined_call_operand.vmem [shape: f32[1,32], index: 8, kind: input, shape index: {}, may-alias: {4,8,12}]   ;;  %s787_s10 = inlined_call_operand.vmem [shape: f32[1,32], index: 10, kind: input, shape index: {}]   ;;  %s788_s13 = inlined_call_operand.vmem [shape: f32[32,3], index: 13, kind: input, shape index: {}]   ;;  %s789_s11 = inlined_call_operand.vmem [shape: f32[1,32], index: 11, kind: input, shape index: {}, may-alias: {3,7,11}]   ;;  %s790_s12 = inlined_call_operand.vmem [shape: f32[1,32], index: 12, kind: input, shape index: {}, may-alias: {4,8,12}]   ;;  %s791_s14 = inlined_call_operand.vmem [shape: f32[1,3], index: 14, kind: input, shape index: {}]   ;;  %s792_s15 = inlined_call_operand.vmem [shape: f32[8,3], index: 15, kind: output, shape index: {}]  }
   0x1   :  { %519 = vmatprep.subr.mxu0 %v577_v0  ;;  %v54_v1 = vld [vmem:[%s777_s1 + $0x18] sm:$0xff]  ;;  %v53_v2 = vld [vmem:[%s777_s1 + $0x10] sm:$0xff]  ;;  %527 = vmatprep.mubr.msk.f32.mxu0 %vm578_vm0, %v577_v0  ;;  %v52_v3 = vld [vmem:[%s777_s1 + $0x8] sm:$0xff] }
   0x2   :  { %520 = vmatpush3.msra.mxu0 %v54_v1  ;;  %530 = vmatprep.subr.mxu1 %v577_v0  ;;  %v51_v4 = vld [vmem:[%s777_s1] sm:$0xff]  ;;  %v170_v16 = vld [vmem:[%s780_s5 + $0x18] sm:$0xff]  ;;  %v169_v17 = vld [vmem:[%s780_s5 + $0x10] sm:$0xff] }
   0x3   :  { %521 = vmatprep.subr.mxu0 %v577_v0  ;;  %538 = vmatprep.mubr.msk.f32.mxu1 %vm578_vm0, %v577_v0  ;;  %v50_v5 = vld [vmem:[%s778_s0] sm:$0xff]  ;;  %v168_v18 = vld [vmem:[%s780_s5 + $0x8] sm:$0xff]  ;;  %v284_v40 = vld [vmem:[%s784_s9 + $0x18] sm:$0xff] }
   0x4   :  { %522 = vmatpush3.msra.mxu0 %v53_v2  ;;  %v485_v6 = vld [vmem:[%s779_s2] ss:$0 sm:$0xff]  ;;  %531 = vmatpush3.msra.mxu1 %v170_v16  ;;  %v283_v41 = vld [vmem:[%s784_s9 + $0x10] sm:$0xff]  ;;  %v282_v42 = vld [vmem:[%s784_s9 + $0x8] sm:$0xff] }
   0x5   :  { %523 = vmatprep.subr.mxu0 %v577_v0  ;;  %532 = vmatprep.subr.mxu1 %v577_v0  ;;  %v167_v19 = vld [vmem:[%s780_s5] sm:$0xff]  ;;  %v398_v1 = vld [vmem:[%s788_s13 + $0x18] sm:$0xff]  ;;  %v397_v2 = vld [vmem:[%s788_s13 + $0x10] sm:$0xff] }
   0x6   :  { %524 = vmatpush3.msra.mxu0 %v52_v3  ;;  %533 = vmatpush3.msra.mxu1 %v169_v17  ;;  %v487_v24 = vld [vmem:[%s781_s3] ss:$0 sm:$0xff]  ;;  %v396_v3 = vld [vmem:[%s788_s13 + $0x8] sm:$0xff] }
   0x7   :  { %525 = vmatprep.subr.mxu0 %v577_v0  ;;  %534 = vmatprep.subr.mxu1 %v577_v0  ;;  %v488_v26 = vld [vmem:[%s782_s4] ss:$0 sm:$0xff] }
   0x8   :  { %526 = vmatpush3.msra.mxu0 %v51_v4  ;;  %535 = vmatpush3.msra.mxu1 %v168_v18  ;;  %v489_v30 = vld [vmem:[%s783_s6] ss:$0 sm:$0xff] }
   0x9   :  { %528 = vmatmul.mubr.msk.f32.vlgmr.msra.gmra.mxu0 %vm62_vm1, %v50_v5  ;;  %541 = vmatprep.subr.mxu0 %v577_v0  ;;  %v281_v43 = vld [vmem:[%s784_s9] sm:$0xff] }
   0xa   :  { %549 = vmatprep.mubr.msk.f32.mxu0 %vm578_vm0, %v577_v0  ;;  %536 = vmatprep.subr.mxu1 %v577_v0  ;;  %v491_v48 = vld [vmem:[%s785_s7] ss:$0 sm:$0xff] }
   0xb   :  { %537 = vmatpush3.msra.mxu1 %v167_v19  ;;  %542 = vmatpush3.msra.mxu0 %v284_v40  ;;  %v492_v50 = vld [vmem:[%s786_s8] ss:$0 sm:$0xff] }
   0xc   :  { %552 = vmatprep.subr.mxu1 %v577_v0  ;;  %543 = vmatprep.subr.mxu0 %v577_v0  ;;  %v493_v54 = vld [vmem:[%s787_s10] ss:$0 sm:$0xff] }
   0xd   :  { %544 = vmatpush3.msra.mxu0 %v283_v41  ;;  %v395_v4 = vld [vmem:[%s788_s13] sm:$0xff] }
   0xe   :  { %545 = vmatprep.subr.mxu0 %v577_v0 }
   0xf   :  { %546 = vmatpush3.msra.mxu0 %v282_v42 }
  0x10   :  { %547 = vmatprep.subr.mxu0 %v577_v0 }
  0x11   :  { %548 = vmatpush3.msra.mxu0 %v281_v43 }
  0xc9   :  { %v132_v7 = vpop.f32.mrf.mxu0 }
  0xca   :  { %v133_v8 = vadd.f32 %v485_v6, %v132_v7 }
  0xcb   :  { %v529_v9 = vpop.f32.mrf.mxu0 }
  0xcc   :  { %v138_v10 = vsel %vm62_vm1, %v133_v8, 0.0  ;;  %v495_v9 = vld [vmem:[%s789_s11] ss:$0 sm:$0xff] }
  0xcd   :  { %139 = vadd.xlane.f32.xlu0 %v138_v10 }
 0x156   :  { %v140_v11 = vpop.xlane.xlu0 %139 }
 0x157   :  { %v142_v12 = vmul.f32 0.03125, %v140_v11  ;;  %v496_v11 = vld [vmem:[%s790_s12] ss:$0 sm:$0xff] }
 0x159   :  { %v143_v13 = vsub.f32 %v133_v8, %v142_v12 }
 0x15b   :  { %v144_v14 = vmul.f32 %v143_v13, %v143_v13 }
 0x15d   :  { %v145_v15 = vsel %vm62_vm1, %v144_v14, 0.0 }
 0x15e   :  { %146 = vadd.xlane.f32.xlu0 %v145_v15 }
 0x1e7   :  { %v147_v20 = vpop.xlane.xlu0 %146 }
 0x1e8   :  { %v148_v21 = vmul.f32 0.03125, %v147_v20 }
 0x1ea   :  { %v149_v22 = vadd.f32 1e-05, %v148_v21 }
 0x1ec   :  { %565 = vrsqrt.f32 %v149_v22 }
 0x1f9   :  { %v566_v23 = vpop.eup %565 }
 0x1fa   :  { %v151_v25 = vmul.f32 %v566_v23, %v143_v13 }
 0x1fc   :  { %v158_v27 = vmul.f32 %v487_v24, %v151_v25 }
 0x1fe   :  { %v165_v28 = vadd.f32 %v488_v26, %v158_v27 }
 0x200   :  { %567 = vtanh.f32 %v165_v28 }
 0x20d   :  { %v568_v29 = vpop.eup %567 }
 0x20e   :  { %539 = vmatmul.mubr.msk.f32.vlgmr.msra.gmra.mxu1 %vm62_vm1, %v568_v29 }
 0x20f   :  { %560 = vmatprep.mubr.msk.f32.mxu1 %vm578_vm0, %v577_v0  ;;  %553 = vmatpush3.msra.mxu1 %v398_v1 }
 0x210   :  { %554 = vmatprep.subr.mxu1 %v577_v0 }
 0x211   :  { %555 = vmatpush3.msra.mxu1 %v397_v2 }
 0x212   :  { %556 = vmatprep.subr.mxu1 %v577_v0 }
 0x213   :  { %557 = vmatpush3.msra.mxu1 %v396_v3 }
 0x214   :  { %558 = vmatprep.subr.mxu1 %v577_v0  ;;  %v497_v0 = vld [vmem:[%s791_s14] ss:$0 sm:$0xff] }
 0x215   :  { %559 = vmatpush3.msra.mxu1 %v395_v4 }
 0x2ce   :  { %v247_v31 = vpop.f32.mrf.mxu1 }
 0x2cf   :  { %v248_v32 = vadd.f32 %v489_v30, %v247_v31 }
 0x2d0   :  { %v540_v33 = vpop.f32.mrf.mxu1 }
 0x2d1   :  { %v253_v34 = vsel %vm62_vm1, %v248_v32, 0.0 }
 0x2d2   :  { %254 = vadd.xlane.f32.xlu1 %v253_v34 }
 0x35b   :  { %v255_v35 = vpop.xlane.xlu1 %254 }
 0x35c   :  { %v256_v36 = vmul.f32 0.03125, %v255_v35 }
 0x35e   :  { %v257_v37 = vsub.f32 %v248_v32, %v256_v36 }
 0x360   :  { %v258_v38 = vmul.f32 %v257_v37, %v257_v37 }
 0x362   :  { %v259_v39 = vsel %vm62_vm1, %v258_v38, 0.0 }
 0x363   :  { %260 = vadd.xlane.f32.xlu1 %v259_v39 }
 0x3ec   :  { %v261_v44 = vpop.xlane.xlu1 %260 }
 0x3ed   :  { %v262_v45 = vmul.f32 0.03125, %v261_v44 }
 0x3ef   :  { %v263_v46 = vadd.f32 1e-05, %v262_v45 }
 0x3f1   :  { %569 = vrsqrt.f32 %v263_v46 }
 0x3fe   :  { %v570_v47 = vpop.eup %569 }
 0x3ff   :  { %v265_v49 = vmul.f32 %v570_v47, %v257_v37 }
 0x401   :  { %v272_v51 = vmul.f32 %v491_v48, %v265_v49 }
 0x403   :  { %v279_v52 = vadd.f32 %v492_v50, %v272_v51 }
 0x405   :  { %571 = vtanh.f32 %v279_v52 }
 0x412   :  { %v572_v53 = vpop.eup %571 }
 0x413   :  { %550 = vmatmul.mubr.msk.f32.vlgmr.msra.gmra.mxu0 %vm62_vm1, %v572_v53 }
 0x4d3   :  { %v361_v55 = vpop.f32.mrf.mxu0 }
 0x4d4   :  { %v362_v56 = vadd.f32 %v493_v54, %v361_v55 }
 0x4d5   :  { %v551_v57 = vpop.f32.mrf.mxu0 }
 0x4d6   :  { %v367_v58 = vsel %vm62_vm1, %v362_v56, 0.0 }
 0x4d7   :  { %368 = vadd.xlane.f32.xlu0 %v367_v58 }
 0x560   :  { %v369_v59 = vpop.xlane.xlu0 %368 }
 0x561   :  { %v370_v60 = vmul.f32 0.03125, %v369_v59 }
 0x563   :  { %v371_v61 = vsub.f32 %v362_v56, %v370_v60 }
 0x565   :  { %v372_v62 = vmul.f32 %v371_v61, %v371_v61 }
 0x567   :  { %v373_v63 = vsel %vm62_vm1, %v372_v62, 0.0 }
 0x568   :  { %374 = vadd.xlane.f32.xlu1 %v373_v63 }
 0x5f1   :  { %v375_v5 = vpop.xlane.xlu1 %374 }
 0x5f2   :  { %v376_v6 = vmul.f32 0.03125, %v375_v5 }
 0x5f4   :  { %v377_v7 = vadd.f32 1e-05, %v376_v6 }
 0x5f6   :  { %573 = vrsqrt.f32 %v377_v7 }
 0x603   :  { %v574_v8 = vpop.eup %573 }
 0x604   :  { %v379_v10 = vmul.f32 %v574_v8, %v371_v61 }
 0x606   :  { %v386_v12 = vmul.f32 %v495_v9, %v379_v10 }
 0x608   :  { %v393_v13 = vadd.f32 %v496_v11, %v386_v12 }
 0x60a   :  { %575 = vtanh.f32 %v393_v13 }
 0x617   :  { %v576_v14 = vpop.eup %575 }
 0x618   :  { %561 = vmatmul.mubr.msk.f32.vlgmr.msra.gmra.mxu1 %vm62_vm1, %v576_v14 }
 0x6d8   :  { %v475_v15 = vpop.f32.mrf.mxu1 }
 0x6d9   :  { %v476_v16 = vadd.f32 %v497_v0, %v475_v15 }
 0x6da   :  { %v562_v17 = vpop.f32.mrf.mxu1 }
 0x6db   :  { %480 = vst.msk [vmem:[%s792_s15] sm:$0xff] %vm479_vm2, %v476_v16 }

</bundles_post_ra>
